<compile_context>
chip_gen: v7x
topology: tpu7x:2x2x1
jax: 0.10.0
libtpu: 0.0.40
codegen_flags: <defaults>
</compile_context>

<pallas_src>
import functools

import numpy as np
import jax
import jax.numpy as jnp
from jax.experimental import pallas as pl
from jax.experimental.pallas import tpu as pltpu

D = 15


# ---------------------------------------------------------------------------
# The single fused Pallas kernel
# ---------------------------------------------------------------------------
def _encoder4l_kernel(a0_ref,
                      r1_ref, cw1_ref, b1_ref,
                      r2_ref, cw2_ref, bng_ref, g2l_ref, b2l_ref,
                      r3_ref, b3_ref,
                      r4_ref, b4_ref,
                      rf_ref, bf1_ref, bf2_ref,
                      cw3_hbm, cw4_hbm, wf1_hbm, wf2_hbm,
                      o_ref,
                      stk_ref, cw3_v, cw4_v, wf1_v, wf2_v, dma_sems,
                      *, n):
    f32, bf16 = jnp.float32, jnp.bfloat16

    # Prefetch the late-layer weights (~1 MB) into VMEM scratch.  Started now,
    # waited on only right before each consumer -> overlaps with conv1/conv2.
    cp3 = pltpu.make_async_copy(cw3_hbm, cw3_v, dma_sems.at[0])
    cp4 = pltpu.make_async_copy(cw4_hbm, cw4_v, dma_sems.at[1])
    cpf1 = pltpu.make_async_copy(wf1_hbm, wf1_v, dma_sems.at[2])
    cpf2 = pltpu.make_async_copy(wf2_hbm, wf2_v, dma_sems.at[3])
    cp3.start()
    cp4.start()
    cpf1.start()
    cpf2.start()

    # Zero the lane-stacking scratch once: conv1 only fills 64 of each 128-lane
    # slot (its matching weight rows are zero), so the rest must be exact 0.
    stk_ref[...] = jnp.zeros_like(stk_ref)

    def conv(a16, r_stack_ref, cw_ref, m, kd, ks, wait=None):
        # (1) ONE MXU op selects all 3*m tap rows (tap kh of output row i picks
        #     input row 2i+kh-pad).  R is 0/1, so the f32->bf16 recast of the
        #     selected activations is exact.
        rows = jnp.dot(r_stack_ref[...], a16,
                       preferred_element_type=f32).astype(bf16)
        # (2) Lane-stack the three taps (slot offsets are 128-multiples -> plain
        #     aligned stores; sublane slices of `rows` are 8-aligned views).
        for kh in range(3):
            stk_ref[0:m, kh * ks:kh * ks + kd] = rows[kh * m:(kh + 1) * m, :]
        if wait is not None:
            wait()                      # weight DMA must have landed by now
        # (3) ONE big-K MXU op: fused (kw, C_in -> C_out) weights for all taps.
        return jnp.dot(stk_ref[0:m, 0:3 * ks], cw_ref[...],
                       preferred_element_type=f32)

    # conv1 (1->8, s2, p1) + ReLU:      (n*64, 64) -> (n*32, 256)
    a1 = jnp.maximum(conv(a0_ref[...].astype(bf16), r1_ref, cw1_ref,
                          n * 32, 64, 128) + b1_ref[...], 0.0).astype(bf16)

    # conv2 (8->16, s2, p1):            -> (n*16, 256)   (bias cancels under BN)
    z2 = conv(a1, r2_ref, cw2_ref, n * 16, 256, 256)
    # BatchNorm2d(16): training-mode batch statistics, biased variance, eps=1e-5.
    # NOTE: divisor assumes conv2's 16x16 output grid has no padded positions.
    cnt = float(n * 16 * 16)
    s1 = jnp.sum(z2, axis=0, keepdims=True)                        # (1, 256)
    s2 = jnp.sum(z2 * z2, axis=0, keepdims=True)                   # (1, 256)
    mean_l = jnp.dot(s1, bng_ref[...], preferred_element_type=f32) / cnt
    ex2_l = jnp.dot(s2, bng_ref[...], preferred_element_type=f32) / cnt
    var_l = ex2_l - mean_l * mean_l
    scale_l = g2l_ref[...] * jax.lax.rsqrt(var_l + 1e-5)
    shift_l = b2l_ref[...] - mean_l * scale_l
    a2 = jnp.maximum(z2 * scale_l + shift_l, 0.0).astype(bf16)

    # conv3 (16->32, s2, p0) + ReLU:    -> (n*8, 256)   (7x7 stored on 8x8 grid)
    a3 = jnp.maximum(conv(a2, r3_ref, cw3_v, n * 8, 256, 256, cp3.wait)
                     + b3_ref[...], 0.0).astype(bf16)
    # conv4 (32->64, s2, p0) + ReLU:    -> (n*4, 256)   (3x3 stored on 4x4 grid)
    a4 = jnp.maximum(conv(a3, r4_ref, cw4_v, n * 4, 256, 256, cp4.wait)
                     + b4_ref[...], 0.0).astype(bf16)

    # fc1 (576->128) + ReLU: the 3 h-taps handled like a conv     -> (8, 128)
    f1 = jnp.maximum(conv(a4, rf_ref, wf1_v, 8, 256, 256, cpf1.wait)
                     + bf1_ref[...], 0.0).astype(bf16)
    # fc2 (128->15), zero-padded to a lane-dense (8, 128) output slab.
    cpf2.wait()
    o_ref[...] = (jnp.dot(f1, wf2_v[...], preferred_element_type=f32)
                  + bf2_ref[...])


def _full_spec(shape):
    nd = len(shape)
    return pl.BlockSpec(shape, lambda i, _nd=nd: (0,) * _nd)


@jax.jit
def encoder4l_forward(x_nchw, c):
    n = x_nchw.shape[0]
    # NCHW (C_in = 1) input -> grid-matrix: rows (n, h), cols w.  No lane pad.
    a0 = x_nchw.reshape(n * 64, 64)

    vmem_args = (a0,
                 c["r1"], c["cw1"], c["b1"],
                 c["r2"], c["cw2"], c["bng"], c["g2l"], c["b2l"],
                 c["r3"], c["b3"],
                 c["r4"], c["b4"],
                 c["rf"], c["bf1"], c["bf2"])
    any_args = (c["cw3"], c["cw4"], c["wf1"], c["wf2"])

    out = pl.pallas_call(
        functools.partial(_encoder4l_kernel, n=n),
        out_shape=jax.ShapeDtypeStruct((8, 128), jnp.float32),
        grid=(1,),
        in_specs=([_full_spec(a.shape) for a in vmem_args]
                  + [pl.BlockSpec(memory_space=pl.ANY)] * len(any_args)),
        out_specs=_full_spec((8, 128)),
        scratch_shapes=[
            pltpu.VMEM((n * 32, 768), jnp.bfloat16),   # lane-stacking scratch
            pltpu.VMEM((768, 256), jnp.bfloat16),      # cw3 landing buffer
            pltpu.VMEM((768, 256), jnp.bfloat16),      # cw4 landing buffer
            pltpu.VMEM((768, 128), jnp.bfloat16),      # wf1 landing buffer
            pltpu.VMEM((128, 128), jnp.bfloat16),      # wf2 landing buffer
            pltpu.SemaphoreType.DMA((4,)),
        ],
        compiler_params=pltpu.CompilerParams(
            dimension_semantics=("arbitrary",)),
    )(*vmem_args, *any_args)
    return out[:n, :D]


# ---------------------------------------------------------------------------
# One-time host-side weight repack (outside the hot path)
# ---------------------------------------------------------------------------
def _row_select_stack(n, ho_blk, ho_real, hin_blk, hin_real, pad):
    """Stacked 0/1 row-tap selection: rows [kh*n*ho_blk + b*ho_blk + i]."""
    r = np.zeros((3 * n * ho_blk, n * hin_blk), np.float32)
    for kh in range(3):
        for b in range(n):
            for i in range(ho_real):
                h = 2 * i + kh - pad
                if 0 <= h < hin_real:
                    r[kh * n * ho_blk + b * ho_blk + i, b * hin_blk + h] = 1.0
    return r


def _col_weight_cat(w_oihw, win_blk, win_real, wo_blk, wo_real, pad):
    """kh-concatenated fused (stride-2 column selection x (kw, Cin->Cout))."""
    cout, cin = w_oihw.shape[:2]
    cw = np.zeros((3 * win_blk * cin, wo_blk * cout), np.float32)
    for kh in range(3):
        base = kh * win_blk * cin
        for j in range(wo_real):
            for kw in range(3):
                w = 2 * j + kw - pad
                if 0 <= w < win_real:
                    cw[base + w * cin: base + (w + 1) * cin,
                       j * cout:(j + 1) * cout] = w_oihw[:, :, kh, kw].T
    return cw


def _bias_lane(b, wo_blk, wo_real):
    cout = b.shape[0]
    bl = np.zeros((1, wo_blk * cout), np.float32)
    for j in range(wo_real):
        bl[0, j * cout:(j + 1) * cout] = b
    return bl


def prepare_constants(params, n):
    """Repack PyTorch-layout weights into the kernel's stacked selection /
    fused-weight matrices.  Pure host-side numpy; done once per weight set."""
    assert 1 <= n <= 8
    p = {k: np.asarray(v, np.float32) for k, v in params.items()}
    c = {}
    # conv1: 64x64x1 -> 32x32x8, pad=1.  Stack slots are 128 lanes wide (only
    # the first 64 carry data; the rest are zero in both scratch and weights).
    c["r1"] = _row_select_stack(n, 32, 32, 64, 64, 1)
    c["cw1"] = _col_weight_cat(p["w1"], 128, 64, 32, 32, 1)
    c["b1"] = _bias_lane(p["b1"], 32, 32)
    # conv2: 32x32x8 -> 16x16x16, pad=1 (conv bias dropped: BN subtracts it).
    c["r2"] = _row_select_stack(n, 16, 16, 32, 32, 1)
    c["cw2"] = _col_weight_cat(p["w2"], 32, 32, 16, 16, 1)
    # BN helpers: 0/1 channel-grouping matrix (sums the 16 w-groups of each
    # channel, lane -> lane) plus lane-broadcast gamma/beta.
    bng = np.zeros((256, 256), np.float32)
    for w in range(16):
        for w2 in range(16):
            for ch in range(16):
                bng[w * 16 + ch, w2 * 16 + ch] = 1.0
    c["bng"] = bng
    c["g2l"] = np.tile(p["g2"], 16).reshape(1, 256)
    c["b2l"] = np.tile(p["beta2"], 16).reshape(1, 256)
    # conv3: 16x16x16 -> 7x7x32 (stored on an 8x8 grid), pad=0
    c["r3"] = _row_select_stack(n, 8, 7, 16, 16, 0)
    c["cw3"] = _col_weight_cat(p["w3"], 16, 16, 8, 7, 0)
    c["b3"] = _bias_lane(p["b3"], 8, 7)
    # conv4: 7x7x32 (stored 8x8) -> 3x3x64 (stored 4x4), pad=0
    c["r4"] = _row_select_stack(n, 4, 3, 8, 7, 0)
    c["cw4"] = _col_weight_cat(p["w4"], 8, 7, 4, 3, 0)
    c["b4"] = _bias_lane(p["b4"], 4, 3)
    # fc1: contracts over (c, h, w) of the 3x3x64 map; h via 0/1 row taps,
    # (w, c) via repacked weights (PyTorch flatten order is (c, h, w)).
    rf = np.zeros((3 * 8, n * 4), np.float32)
    for h in range(3):
        for b in range(n):
            rf[h * 8 + b, b * 4 + h] = 1.0
    c["rf"] = rf
    wf1 = p["wf1"].reshape(64, 3, 3, 128)          # (c, h, w, out)
    wf1c = np.zeros((3 * 256, 128), np.float32)
    for h in range(3):
        for w in range(3):
            wf1c[h * 256 + w * 64: h * 256 + (w + 1) * 64, :] = wf1[:, h, w, :]
    c["wf1"] = wf1c
    c["bf1"] = p["bf1"].reshape(1, 128)
    wf2 = np.zeros((128, 128), np.float32)
    wf2[:, :D] = p["wf2"]
    c["wf2"] = wf2
    bf2 = np.zeros((1, 128), np.float32)
    bf2[0, :D] = p["bf2"]
    c["bf2"] = bf2

    bf16_keys = ("r1", "cw1", "r2", "cw2", "r3", "cw3", "r4", "cw4",
                 "rf", "wf1", "wf2")
    return {k: jnp.asarray(v, jnp.bfloat16 if k in bf16_keys else jnp.float32)
            for k, v in c.items()}


# ---------------------------------------------------------------------------
# Params + plain-JAX reference (for a sanity check)
# ---------------------------------------------------------------------------
def init_params(key):
    ks = jax.random.split(key, 12)

    def w(k, shape, fan_in):
        return (jax.random.normal(k, shape, jnp.float32)
                / jnp.sqrt(fan_in)).astype(jnp.float32)

    return {
        "w1": w(ks[0], (8, 1, 3, 3), 1 * 9),     "b1": w(ks[1], (8,), 9),
        "w2": w(ks[2], (16, 8, 3, 3), 8 * 9),    "b2": w(ks[3], (16,), 72),
        "g2": jnp.ones((16,), jnp.float32),      "beta2": jnp.zeros((16,), jnp.float32),
        "w3": w(ks[4], (32, 16, 3, 3), 16 * 9),  "b3": w(ks[5], (32,), 144),
        "w4": w(ks[6], (64, 32, 3, 3), 32 * 9),  "b4": w(ks[7], (64,), 288),
        "wf1": w(ks[8], (576, 128), 576),        "bf1": w(ks[9], (128,), 576),
        "wf2": w(ks[10], (128, D), 128),         "bf2": w(ks[11], (D,), 128),
    }


def reference_forward(x, p):
    dn = ("NCHW", "OIHW", "NCHW")

    def conv(y, w, b, stride, pad):
        y = jax.lax.conv_general_dilated(y, w, (stride, stride),
                                         ((pad, pad), (pad, pad)),
                                         dimension_numbers=dn)
        return y + b.reshape(1, -1, 1, 1)

    y = jnp.maximum(conv(x, p["w1"], p["b1"], 2, 1), 0.0)
    y = conv(y, p["w2"], p["b2"], 2, 1)
    mean = jnp.mean(y, axis=(0, 2, 3), keepdims=True)
    var = jnp.mean((y - mean) ** 2, axis=(0, 2, 3), keepdims=True)
    y = (y - mean) * jax.lax.rsqrt(var + 1e-5)
    y = jnp.maximum(y * p["g2"].reshape(1, -1, 1, 1)
                    + p["beta2"].reshape(1, -1, 1, 1), 0.0)
    y = jnp.maximum(conv(y, p["w3"], p["b3"], 2, 0), 0.0)
    y = jnp.maximum(conv(y, p["w4"], p["b4"], 2, 0), 0.0)
    y = y.reshape(y.shape[0], -1)                 # PyTorch Flatten: (c, h, w)
    y = jnp.maximum(y @ p["wf1"] + p["bf1"], 0.0)
    return y @ p["wf2"] + p["bf2"]


if __name__ == "__main__":
    key = jax.random.PRNGKey(0)
    k_x, k_p = jax.random.split(key)
    # Encoder4L implies 64x64 single-channel inputs (3*3*64 features after 4 stride-2 convs).
    x = jax.random.normal(k_x, (2, 1, 64, 64), jnp.float32)
    params = init_params(k_p)
    consts = prepare_constants(params, n=2)

    out = jax.block_until_ready(encoder4l_forward(x, consts))
    assert out.shape == (2, D) and out.dtype == jnp.float32, (out.shape, out.dtype)

    # Sanity check vs. a plain-JAX/XLA reference (bf16 MXU inputs, f32 accumulation).
    ref = jax.block_until_ready(reference_forward(x, params))
    rel = float(jnp.max(jnp.abs(out - ref)) / (jnp.max(jnp.abs(ref)) + 1e-6))
    assert rel < 0.1, f"mismatch vs reference: rel max err {rel}"
    print("KERNEL_OK")
</pallas_src>

<mosaic_0001>
module attributes {stable_mosaic.version = 11 : i64} {
  func.func @_encoder4l_kernel(%arg0: i32, %arg1: memref<128x64xf32, #tpu.memory_space<vmem>>, %arg2: memref<192x128xbf16, #tpu.memory_space<vmem>>, %arg3: memref<384x256xbf16, #tpu.memory_space<vmem>>, %arg4: memref<1x256xf32, #tpu.memory_space<vmem>>, %arg5: memref<96x64xbf16, #tpu.memory_space<vmem>>, %arg6: memref<768x256xbf16, #tpu.memory_space<vmem>>, %arg7: memref<256x256xf32, #tpu.memory_space<vmem>>, %arg8: memref<1x256xf32, #tpu.memory_space<vmem>>, %arg9: memref<1x256xf32, #tpu.memory_space<vmem>>, %arg10: memref<48x32xbf16, #tpu.memory_space<vmem>>, %arg11: memref<1x256xf32, #tpu.memory_space<vmem>>, %arg12: memref<24x16xbf16, #tpu.memory_space<vmem>>, %arg13: memref<1x256xf32, #tpu.memory_space<vmem>>, %arg14: memref<24x8xbf16, #tpu.memory_space<vmem>>, %arg15: memref<1x128xf32, #tpu.memory_space<vmem>>, %arg16: memref<1x128xf32, #tpu.memory_space<vmem>>, %arg17: memref<768x256xbf16, #tpu.memory_space<any>>, %arg18: memref<768x256xbf16, #tpu.memory_space<any>>, %arg19: memref<768x128xbf16, #tpu.memory_space<any>>, %arg20: memref<128x128xbf16, #tpu.memory_space<any>>, %arg21: memref<8x128xf32, #tpu.memory_space<vmem>>, %arg22: memref<64x768xbf16, #tpu.memory_space<vmem>>, %arg23: memref<768x256xbf16, #tpu.memory_space<vmem>>, %arg24: memref<768x256xbf16, #tpu.memory_space<vmem>>, %arg25: memref<768x128xbf16, #tpu.memory_space<vmem>>, %arg26: memref<128x128xbf16, #tpu.memory_space<vmem>>, %arg27: memref<4x!tpu.dma_semaphore, #tpu.memory_space<semaphore_mem>>) attributes {dimension_semantics = [#tpu.dimension_semantics<arbitrary>], iteration_bounds = array<i64: 1>, scalar_prefetch = 0 : i64, scratch_operands = 6 : i64, tpu.core_type = #tpu.core_type<tc>, window_params = [{pipeline_mode = #tpu.pipeline_mode<synchronous>, transform_indices = @transform_0, window_bounds = array<i64: 128, 64>}, {pipeline_mode = #tpu.pipeline_mode<synchronous>, transform_indices = @transform_1, window_bounds = array<i64: 192, 128>}, {pipeline_mode = #tpu.pipeline_mode<synchronous>, transform_indices = @transform_2, window_bounds = array<i64: 384, 256>}, {pipeline_mode = #tpu.pipeline_mode<synchronous>, transform_indices = @transform_3, window_bounds = array<i64: 1, 256>}, {pipeline_mode = #tpu.pipeline_mode<synchronous>, transform_indices = @transform_4, window_bounds = array<i64: 96, 64>}, {pipeline_mode = #tpu.pipeline_mode<synchronous>, transform_indices = @transform_5, window_bounds = array<i64: 768, 256>}, {pipeline_mode = #tpu.pipeline_mode<synchronous>, transform_indices = @transform_6, window_bounds = array<i64: 256, 256>}, {pipeline_mode = #tpu.pipeline_mode<synchronous>, transform_indices = @transform_7, window_bounds = array<i64: 1, 256>}, {pipeline_mode = #tpu.pipeline_mode<synchronous>, transform_indices = @transform_8, window_bounds = array<i64: 1, 256>}, {pipeline_mode = #tpu.pipeline_mode<synchronous>, transform_indices = @transform_9, window_bounds = array<i64: 48, 32>}, {pipeline_mode = #tpu.pipeline_mode<synchronous>, transform_indices = @transform_10, window_bounds = array<i64: 1, 256>}, {pipeline_mode = #tpu.pipeline_mode<synchronous>, transform_indices = @transform_11, window_bounds = array<i64: 24, 16>}, {pipeline_mode = #tpu.pipeline_mode<synchronous>, transform_indices = @transform_12, window_bounds = array<i64: 1, 256>}, {pipeline_mode = #tpu.pipeline_mode<synchronous>, transform_indices = @transform_13, window_bounds = array<i64: 24, 8>}, {pipeline_mode = #tpu.pipeline_mode<synchronous>, transform_indices = @transform_14, window_bounds = array<i64: 1, 128>}, {pipeline_mode = #tpu.pipeline_mode<synchronous>, transform_indices = @transform_15, window_bounds = array<i64: 1, 128>}, {}, {}, {}, {}, {pipeline_mode = #tpu.pipeline_mode<synchronous>, transform_indices = @transform_20, window_bounds = array<i64: 8, 128>}]} {
    %c0_i32 = arith.constant 0 : i32
    %0 = tpu.memref_slice %arg27[%c0_i32] : memref<4x!tpu.dma_semaphore, #tpu.memory_space<semaphore_mem>> -> memref<1x!tpu.dma_semaphore, #tpu.memory_space<semaphore_mem>>
    %1 = tpu.memref_squeeze %0 : memref<1x!tpu.dma_semaphore, #tpu.memory_space<semaphore_mem>> -> memref<!tpu.dma_semaphore, #tpu.memory_space<semaphore_mem>>
    tpu.enqueue_dma source(%arg17 : memref<768x256xbf16, #tpu.memory_space<any>>) target(%arg23 : memref<768x256xbf16, #tpu.memory_space<vmem>>) target_semaphore(%1 : memref<!tpu.dma_semaphore, #tpu.memory_space<semaphore_mem>>)
    %c1_i32 = arith.constant 1 : i32
    %2 = tpu.memref_slice %arg27[%c1_i32] : memref<4x!tpu.dma_semaphore, #tpu.memory_space<semaphore_mem>> -> memref<1x!tpu.dma_semaphore, #tpu.memory_space<semaphore_mem>>
    %3 = tpu.memref_squeeze %2 : memref<1x!tpu.dma_semaphore, #tpu.memory_space<semaphore_mem>> -> memref<!tpu.dma_semaphore, #tpu.memory_space<semaphore_mem>>
    tpu.enqueue_dma source(%arg18 : memref<768x256xbf16, #tpu.memory_space<any>>) target(%arg24 : memref<768x256xbf16, #tpu.memory_space<vmem>>) target_semaphore(%3 : memref<!tpu.dma_semaphore, #tpu.memory_space<semaphore_mem>>)
    %c2_i32 = arith.constant 2 : i32
    %4 = tpu.memref_slice %arg27[%c2_i32] : memref<4x!tpu.dma_semaphore, #tpu.memory_space<semaphore_mem>> -> memref<1x!tpu.dma_semaphore, #tpu.memory_space<semaphore_mem>>
    %5 = tpu.memref_squeeze %4 : memref<1x!tpu.dma_semaphore, #tpu.memory_space<semaphore_mem>> -> memref<!tpu.dma_semaphore, #tpu.memory_space<semaphore_mem>>
    tpu.enqueue_dma source(%arg19 : memref<768x128xbf16, #tpu.memory_space<any>>) target(%arg25 : memref<768x128xbf16, #tpu.memory_space<vmem>>) target_semaphore(%5 : memref<!tpu.dma_semaphore, #tpu.memory_space<semaphore_mem>>)
    %c3_i32 = arith.constant 3 : i32
    %6 = tpu.memref_slice %arg27[%c3_i32] : memref<4x!tpu.dma_semaphore, #tpu.memory_space<semaphore_mem>> -> memref<1x!tpu.dma_semaphore, #tpu.memory_space<semaphore_mem>>
    %7 = tpu.memref_squeeze %6 : memref<1x!tpu.dma_semaphore, #tpu.memory_space<semaphore_mem>> -> memref<!tpu.dma_semaphore, #tpu.memory_space<semaphore_mem>>
    tpu.enqueue_dma source(%arg20 : memref<128x128xbf16, #tpu.memory_space<any>>) target(%arg26 : memref<128x128xbf16, #tpu.memory_space<vmem>>) target_semaphore(%7 : memref<!tpu.dma_semaphore, #tpu.memory_space<semaphore_mem>>)
    %cst = arith.constant 0.000000e+00 : bf16
    %8 = vector.broadcast %cst : bf16 to vector<64x768xbf16>
    %c0 = arith.constant 0 : index
    %c0_0 = arith.constant 0 : index
    %9 = vector.load %arg22[%c0, %c0_0] : memref<64x768xbf16, #tpu.memory_space<vmem>>, vector<64x768xbf16>
    tpu.vector_store %arg22[%c0, %c0_0], %8 {strides = array<i32>} : memref<64x768xbf16, #tpu.memory_space<vmem>>, vector<64x768xbf16>,
    %c0_1 = arith.constant 0 : index
    %c0_2 = arith.constant 0 : index
    %10 = vector.load %arg1[%c0_1, %c0_2] : memref<128x64xf32, #tpu.memory_space<vmem>>, vector<128x64xf32>
    %11 = arith.truncf %10 : vector<128x64xf32> to vector<128x64xbf16>
    %c0_3 = arith.constant 0 : index
    %c0_4 = arith.constant 0 : index
    %12 = vector.load %arg2[%c0_3, %c0_4] : memref<192x128xbf16, #tpu.memory_space<vmem>>, vector<192x128xbf16>
    %cst_5 = arith.constant dense<0.000000e+00> : vector<192x64xf32>
    %13 = tpu.matmul %12, %11, %cst_5 {dimension_numbers = #tpu.dot_dimension_numbers<[1], [0], [0], [1], [0, 0, 1, 1], [], []>} : vector<192x128xbf16>, vector<128x64xbf16>, vector<192x64xf32> -> vector<192x64xf32>
    %14 = arith.truncf %13 : vector<192x64xf32> to vector<192x64xbf16>
    %15 = vector.extract_strided_slice %14 {offsets = [0, 0], sizes = [64, 64], strides = [1, 1]} : vector<192x64xbf16> to vector<64x64xbf16>
    %c0_6 = arith.constant 0 : index
    %c0_7 = arith.constant 0 : index
    %16 = vector.load %arg22[%c0_6, %c0_7] : memref<64x768xbf16, #tpu.memory_space<vmem>>, vector<64x64xbf16>
    tpu.vector_store %arg22[%c0_6, %c0_7], %15 {strides = array<i32>} : memref<64x768xbf16, #tpu.memory_space<vmem>>, vector<64x64xbf16>,
    %17 = vector.extract_strided_slice %14 {offsets = [64, 0], sizes = [64, 64], strides = [1, 1]} : vector<192x64xbf16> to vector<64x64xbf16>
    %c0_8 = arith.constant 0 : index
    %c128 = arith.constant 128 : index
    %18 = vector.load %arg22[%c0_8, %c128] : memref<64x768xbf16, #tpu.memory_space<vmem>>, vector<64x64xbf16>
    tpu.vector_store %arg22[%c0_8, %c128], %17 {strides = array<i32>} : memref<64x768xbf16, #tpu.memory_space<vmem>>, vector<64x64xbf16>,
    %19 = vector.extract_strided_slice %14 {offsets = [128, 0], sizes = [64, 64], strides = [1, 1]} : vector<192x64xbf16> to vector<64x64xbf16>
    %c0_9 = arith.constant 0 : index
    %c256 = arith.constant 256 : index
    %20 = vector.load %arg22[%c0_9, %c256] : memref<64x768xbf16, #tpu.memory_space<vmem>>, vector<64x64xbf16>
    tpu.vector_store %arg22[%c0_9, %c256], %19 {strides = array<i32>} : memref<64x768xbf16, #tpu.memory_space<vmem>>, vector<64x64xbf16>,
    %c0_10 = arith.constant 0 : index
    %c0_11 = arith.constant 0 : index
    %21 = vector.load %arg22[%c0_10, %c0_11] : memref<64x768xbf16, #tpu.memory_space<vmem>>, vector<64x384xbf16>
    %c0_12 = arith.constant 0 : index
    %c0_13 = arith.constant 0 : index
    %22 = vector.load %arg3[%c0_12, %c0_13] : memref<384x256xbf16, #tpu.memory_space<vmem>>, vector<384x256xbf16>
    %cst_14 = arith.constant dense<0.000000e+00> : vector<64x256xf32>
    %23 = tpu.matmul %21, %22, %cst_14 {dimension_numbers = #tpu.dot_dimension_numbers<[1], [0], [0], [1], [0, 0, 1, 1], [], []>} : vector<64x384xbf16>, vector<384x256xbf16>, vector<64x256xf32> -> vector<64x256xf32>
    %c0_15 = arith.constant 0 : index
    %c0_16 = arith.constant 0 : index
    %24 = vector.load %arg4[%c0_15, %c0_16] : memref<1x256xf32, #tpu.memory_space<vmem>>, vector<1x256xf32>
    %25 = vector.broadcast %24 : vector<1x256xf32> to vector<64x256xf32>
    %26 = arith.addf %23, %25 : vector<64x256xf32>
    %cst_17 = arith.constant 0.000000e+00 : f32
    %27 = vector.broadcast %cst_17 : f32 to vector<64x256xf32>
    %28 = arith.maximumf %26, %27 : vector<64x256xf32>
    %29 = arith.truncf %28 : vector<64x256xf32> to vector<64x256xbf16>
    %c0_18 = arith.constant 0 : index
    %c0_19 = arith.constant 0 : index
    %30 = vector.load %arg5[%c0_18, %c0_19] : memref<96x64xbf16, #tpu.memory_space<vmem>>, vector<96x64xbf16>
    %cst_20 = arith.constant dense<0.000000e+00> : vector<96x256xf32>
    %31 = tpu.matmul %30, %29, %cst_20 {dimension_numbers = #tpu.dot_dimension_numbers<[1], [0], [0], [1], [0, 0, 1, 1], [], []>} : vector<96x64xbf16>, vector<64x256xbf16>, vector<96x256xf32> -> vector<96x256xf32>
    %32 = arith.truncf %31 : vector<96x256xf32> to vector<96x256xbf16>
    %33 = vector.extract_strided_slice %32 {offsets = [0, 0], sizes = [32, 256], strides = [1, 1]} : vector<96x256xbf16> to vector<32x256xbf16>
    %c0_21 = arith.constant 0 : index
    %c0_22 = arith.constant 0 : index
    %34 = vector.load %arg22[%c0_21, %c0_22] : memref<64x768xbf16, #tpu.memory_space<vmem>>, vector<32x256xbf16>
    tpu.vector_store %arg22[%c0_21, %c0_22], %33 {strides = array<i32>} : memref<64x768xbf16, #tpu.memory_space<vmem>>, vector<32x256xbf16>,
    %35 = vector.extract_strided_slice %32 {offsets = [32, 0], sizes = [32, 256], strides = [1, 1]} : vector<96x256xbf16> to vector<32x256xbf16>
    %c0_23 = arith.constant 0 : index
    %c256_24 = arith.constant 256 : index
    %36 = vector.load %arg22[%c0_23, %c256_24] : memref<64x768xbf16, #tpu.memory_space<vmem>>, vector<32x256xbf16>
    tpu.vector_store %arg22[%c0_23, %c256_24], %35 {strides = array<i32>} : memref<64x768xbf16, #tpu.memory_space<vmem>>, vector<32x256xbf16>,
    %37 = vector.extract_strided_slice %32 {offsets = [64, 0], sizes = [32, 256], strides = [1, 1]} : vector<96x256xbf16> to vector<32x256xbf16>
    %c0_25 = arith.constant 0 : index
    %c512 = arith.constant 512 : index
    %38 = vector.load %arg22[%c0_25, %c512] : memref<64x768xbf16, #tpu.memory_space<vmem>>, vector<32x256xbf16>
    tpu.vector_store %arg22[%c0_25, %c512], %37 {strides = array<i32>} : memref<64x768xbf16, #tpu.memory_space<vmem>>, vector<32x256xbf16>,
    %c0_26 = arith.constant 0 : index
    %c0_27 = arith.constant 0 : index
    %39 = vector.load %arg22[%c0_26, %c0_27] : memref<64x768xbf16, #tpu.memory_space<vmem>>, vector<32x768xbf16>
    %c0_28 = arith.constant 0 : index
    %c0_29 = arith.constant 0 : index
    %40 = vector.load %arg6[%c0_28, %c0_29] : memref<768x256xbf16, #tpu.memory_space<vmem>>, vector<768x256xbf16>
    %cst_30 = arith.constant dense<0.000000e+00> : vector<32x256xf32>
    %41 = tpu.matmul %39, %40, %cst_30 {dimension_numbers = #tpu.dot_dimension_numbers<[1], [0], [0], [1], [0, 0, 1, 1], [], []>} : vector<32x768xbf16>, vector<768x256xbf16>, vector<32x256xf32> -> vector<32x256xf32>
    %cst_31 = arith.constant dense<0.000000e+00> : vector<256xf32>
    %42 = vector.multi_reduction <add>, %41, %cst_31 [0] : vector<32x256xf32> to vector<256xf32>
    %43 = vector.shape_cast %42 : vector<256xf32> to vector<1x256xf32>
    %44 = arith.mulf %41, %41 : vector<32x256xf32>
    %cst_32 = arith.constant dense<0.000000e+00> : vector<256xf32>
    %45 = vector.multi_reduction <add>, %44, %cst_32 [0] : vector<32x256xf32> to vector<256xf32>
    %46 = vector.shape_cast %45 : vector<256xf32> to vector<1x256xf32>
    %c0_33 = arith.constant 0 : index
    %c0_34 = arith.constant 0 : index
    %47 = vector.load %arg7[%c0_33, %c0_34] : memref<256x256xf32, #tpu.memory_space<vmem>>, vector<256x256xf32>
    %cst_35 = arith.constant dense<0.000000e+00> : vector<1x256xf32>
    %48 = tpu.matmul %43, %47, %cst_35 {dimension_numbers = #tpu.dot_dimension_numbers<[1], [0], [0], [1], [0, 0, 1, 1], [], []>} : vector<1x256xf32>, vector<256x256xf32>, vector<1x256xf32> -> vector<1x256xf32>
    %cst_36 = arith.constant 5.120000e+02 : f32
    %49 = vector.broadcast %cst_36 : f32 to vector<1x256xf32>
    %50 = arith.divf %48, %49 : vector<1x256xf32>
    %c0_37 = arith.constant 0 : index
    %c0_38 = arith.constant 0 : index
    %51 = vector.load %arg7[%c0_37, %c0_38] : memref<256x256xf32, #tpu.memory_space<vmem>>, vector<256x256xf32>
    %cst_39 = arith.constant dense<0.000000e+00> : vector<1x256xf32>
    %52 = tpu.matmul %46, %51, %cst_39 {dimension_numbers = #tpu.dot_dimension_numbers<[1], [0], [0], [1], [0, 0, 1, 1], [], []>} : vector<1x256xf32>, vector<256x256xf32>, vector<1x256xf32> -> vector<1x256xf32>
    %cst_40 = arith.constant 5.120000e+02 : f32
    %53 = vector.broadcast %cst_40 : f32 to vector<1x256xf32>
    %54 = arith.divf %52, %53 : vector<1x256xf32>
    %55 = arith.mulf %50, %50 : vector<1x256xf32>
    %56 = arith.subf %54, %55 : vector<1x256xf32>
    %c0_41 = arith.constant 0 : index
    %c0_42 = arith.constant 0 : index
    %57 = vector.load %arg8[%c0_41, %c0_42] : memref<1x256xf32, #tpu.memory_space<vmem>>, vector<1x256xf32>
    %cst_43 = arith.constant 9.99999974E-6 : f32
    %58 = vector.broadcast %cst_43 : f32 to vector<1x256xf32>
    %59 = arith.addf %56, %58 : vector<1x256xf32>
    %60 = math.rsqrt %59 : vector<1x256xf32>
    %61 = arith.mulf %57, %60 : vector<1x256xf32>
    %c0_44 = arith.constant 0 : index
    %c0_45 = arith.constant 0 : index
    %62 = vector.load %arg9[%c0_44, %c0_45] : memref<1x256xf32, #tpu.memory_space<vmem>>, vector<1x256xf32>
    %63 = arith.mulf %50, %61 : vector<1x256xf32>
    %64 = arith.subf %62, %63 : vector<1x256xf32>
    %65 = vector.broadcast %61 : vector<1x256xf32> to vector<32x256xf32>
    %66 = arith.mulf %41, %65 : vector<32x256xf32>
    %67 = vector.broadcast %64 : vector<1x256xf32> to vector<32x256xf32>
    %68 = arith.addf %66, %67 : vector<32x256xf32>
    %cst_46 = arith.constant 0.000000e+00 : f32
    %69 = vector.broadcast %cst_46 : f32 to vector<32x256xf32>
    %70 = arith.maximumf %68, %69 : vector<32x256xf32>
    %71 = arith.truncf %70 : vector<32x256xf32> to vector<32x256xbf16>
    %c0_47 = arith.constant 0 : index
    %c0_48 = arith.constant 0 : index
    %72 = vector.load %arg10[%c0_47, %c0_48] : memref<48x32xbf16, #tpu.memory_space<vmem>>, vector<48x32xbf16>
    %cst_49 = arith.constant dense<0.000000e+00> : vector<48x256xf32>
    %73 = tpu.matmul %72, %71, %cst_49 {dimension_numbers = #tpu.dot_dimension_numbers<[1], [0], [0], [1], [0, 0, 1, 1], [], []>} : vector<48x32xbf16>, vector<32x256xbf16>, vector<48x256xf32> -> vector<48x256xf32>
    %74 = arith.truncf %73 : vector<48x256xf32> to vector<48x256xbf16>
    %75 = vector.extract_strided_slice %74 {offsets = [0, 0], sizes = [16, 256], strides = [1, 1]} : vector<48x256xbf16> to vector<16x256xbf16>
    %c0_50 = arith.constant 0 : index
    %c0_51 = arith.constant 0 : index
    %76 = vector.load %arg22[%c0_50, %c0_51] : memref<64x768xbf16, #tpu.memory_space<vmem>>, vector<16x256xbf16>
    tpu.vector_store %arg22[%c0_50, %c0_51], %75 {strides = array<i32>} : memref<64x768xbf16, #tpu.memory_space<vmem>>, vector<16x256xbf16>,
    %77 = vector.extract_strided_slice %74 {offsets = [16, 0], sizes = [16, 256], strides = [1, 1]} : vector<48x256xbf16> to vector<16x256xbf16>
    %c0_52 = arith.constant 0 : index
    %c256_53 = arith.constant 256 : index
    %78 = vector.load %arg22[%c0_52, %c256_53] : memref<64x768xbf16, #tpu.memory_space<vmem>>, vector<16x256xbf16>
    tpu.vector_store %arg22[%c0_52, %c256_53], %77 {strides = array<i32>} : memref<64x768xbf16, #tpu.memory_space<vmem>>, vector<16x256xbf16>,
    %79 = vector.extract_strided_slice %74 {offsets = [32, 0], sizes = [16, 256], strides = [1, 1]} : vector<48x256xbf16> to vector<16x256xbf16>
    %c0_54 = arith.constant 0 : index
    %c512_55 = arith.constant 512 : index
    %80 = vector.load %arg22[%c0_54, %c512_55] : memref<64x768xbf16, #tpu.memory_space<vmem>>, vector<16x256xbf16>
    tpu.vector_store %arg22[%c0_54, %c512_55], %79 {strides = array<i32>} : memref<64x768xbf16, #tpu.memory_space<vmem>>, vector<16x256xbf16>,
    %c0_i32_56 = arith.constant 0 : i32
    %81 = tpu.memref_slice %arg27[%c0_i32_56] : memref<4x!tpu.dma_semaphore, #tpu.memory_space<semaphore_mem>> -> memref<1x!tpu.dma_semaphore, #tpu.memory_space<semaphore_mem>>
    %82 = tpu.memref_squeeze %81 : memref<1x!tpu.dma_semaphore, #tpu.memory_space<semaphore_mem>> -> memref<!tpu.dma_semaphore, #tpu.memory_space<semaphore_mem>>
    tpu.wait_dma2 semaphore(%82 : memref<!tpu.dma_semaphore, #tpu.memory_space<semaphore_mem>>) src(%arg17 : memref<768x256xbf16, #tpu.memory_space<any>>) dst(%arg23 : memref<768x256xbf16, #tpu.memory_space<vmem>>)
    %c0_57 = arith.constant 0 : index
    %c0_58 = arith.constant 0 : index
    %83 = vector.load %arg22[%c0_57, %c0_58] : memref<64x768xbf16, #tpu.memory_space<vmem>>, vector<16x768xbf16>
    %c0_59 = arith.constant 0 : index
    %c0_60 = arith.constant 0 : index
    %84 = vector.load %arg23[%c0_59, %c0_60] : memref<768x256xbf16, #tpu.memory_space<vmem>>, vector<768x256xbf16>
    %cst_61 = arith.constant dense<0.000000e+00> : vector<16x256xf32>
    %85 = tpu.matmul %83, %84, %cst_61 {dimension_numbers = #tpu.dot_dimension_numbers<[1], [0], [0], [1], [0, 0, 1, 1], [], []>} : vector<16x768xbf16>, vector<768x256xbf16>, vector<16x256xf32> -> vector<16x256xf32>
    %c0_62 = arith.constant 0 : index
    %c0_63 = arith.constant 0 : index
    %86 = vector.load %arg11[%c0_62, %c0_63] : memref<1x256xf32, #tpu.memory_space<vmem>>, vector<1x256xf32>
    %87 = vector.broadcast %86 : vector<1x256xf32> to vector<16x256xf32>
    %88 = arith.addf %85, %87 : vector<16x256xf32>
    %cst_64 = arith.constant 0.000000e+00 : f32
    %89 = vector.broadcast %cst_64 : f32 to vector<16x256xf32>
    %90 = arith.maximumf %88, %89 : vector<16x256xf32>
    %91 = arith.truncf %90 : vector<16x256xf32> to vector<16x256xbf16>
    %c0_65 = arith.constant 0 : index
    %c0_66 = arith.constant 0 : index
    %92 = vector.load %arg12[%c0_65, %c0_66] : memref<24x16xbf16, #tpu.memory_space<vmem>>, vector<24x16xbf16>
    %cst_67 = arith.constant dense<0.000000e+00> : vector<24x256xf32>
    %93 = tpu.matmul %92, %91, %cst_67 {dimension_numbers = #tpu.dot_dimension_numbers<[1], [0], [0], [1], [0, 0, 1, 1], [], []>} : vector<24x16xbf16>, vector<16x256xbf16>, vector<24x256xf32> -> vector<24x256xf32>
    %94 = arith.truncf %93 : vector<24x256xf32> to vector<24x256xbf16>
    %95 = vector.extract_strided_slice %94 {offsets = [0, 0], sizes = [8, 256], strides = [1, 1]} : vector<24x256xbf16> to vector<8x256xbf16>
    %c0_68 = arith.constant 0 : index
    %c0_69 = arith.constant 0 : index
    %96 = vector.load %arg22[%c0_68, %c0_69] : memref<64x768xbf16, #tpu.memory_space<vmem>>, vector<8x256xbf16>
    tpu.vector_store %arg22[%c0_68, %c0_69], %95 {strides = array<i32>} : memref<64x768xbf16, #tpu.memory_space<vmem>>, vector<8x256xbf16>,
    %97 = vector.extract_strided_slice %94 {offsets = [8, 0], sizes = [8, 256], strides = [1, 1]} : vector<24x256xbf16> to vector<8x256xbf16>
    %c0_70 = arith.constant 0 : index
    %c256_71 = arith.constant 256 : index
    %98 = vector.load %arg22[%c0_70, %c256_71] : memref<64x768xbf16, #tpu.memory_space<vmem>>, vector<8x256xbf16>
    tpu.vector_store %arg22[%c0_70, %c256_71], %97 {strides = array<i32>} : memref<64x768xbf16, #tpu.memory_space<vmem>>, vector<8x256xbf16>,
    %99 = vector.extract_strided_slice %94 {offsets = [16, 0], sizes = [8, 256], strides = [1, 1]} : vector<24x256xbf16> to vector<8x256xbf16>
    %c0_72 = arith.constant 0 : index
    %c512_73 = arith.constant 512 : index
    %100 = vector.load %arg22[%c0_72, %c512_73] : memref<64x768xbf16, #tpu.memory_space<vmem>>, vector<8x256xbf16>
    tpu.vector_store %arg22[%c0_72, %c512_73], %99 {strides = array<i32>} : memref<64x768xbf16, #tpu.memory_space<vmem>>, vector<8x256xbf16>,
    %c1_i32_74 = arith.constant 1 : i32
    %101 = tpu.memref_slice %arg27[%c1_i32_74] : memref<4x!tpu.dma_semaphore, #tpu.memory_space<semaphore_mem>> -> memref<1x!tpu.dma_semaphore, #tpu.memory_space<semaphore_mem>>
    %102 = tpu.memref_squeeze %101 : memref<1x!tpu.dma_semaphore, #tpu.memory_space<semaphore_mem>> -> memref<!tpu.dma_semaphore, #tpu.memory_space<semaphore_mem>>
    tpu.wait_dma2 semaphore(%102 : memref<!tpu.dma_semaphore, #tpu.memory_space<semaphore_mem>>) src(%arg18 : memref<768x256xbf16, #tpu.memory_space<any>>) dst(%arg24 : memref<768x256xbf16, #tpu.memory_space<vmem>>)
    %c0_75 = arith.constant 0 : index
    %c0_76 = arith.constant 0 : index
    %103 = vector.load %arg22[%c0_75, %c0_76] : memref<64x768xbf16, #tpu.memory_space<vmem>>, vector<8x768xbf16>
    %c0_77 = arith.constant 0 : index
    %c0_78 = arith.constant 0 : index
    %104 = vector.load %arg24[%c0_77, %c0_78] : memref<768x256xbf16, #tpu.memory_space<vmem>>, vector<768x256xbf16>
    %cst_79 = arith.constant dense<0.000000e+00> : vector<8x256xf32>
    %105 = tpu.matmul %103, %104, %cst_79 {dimension_numbers = #tpu.dot_dimension_numbers<[1], [0], [0], [1], [0, 0, 1, 1], [], []>} : vector<8x768xbf16>, vector<768x256xbf16>, vector<8x256xf32> -> vector<8x256xf32>
    %c0_80 = arith.constant 0 : index
    %c0_81 = arith.constant 0 : index
    %106 = vector.load %arg13[%c0_80, %c0_81] : memref<1x256xf32, #tpu.memory_space<vmem>>, vector<1x256xf32>
    %107 = vector.broadcast %106 : vector<1x256xf32> to vector<8x256xf32>
    %108 = arith.addf %105, %107 : vector<8x256xf32>
    %cst_82 = arith.constant 0.000000e+00 : f32
    %109 = vector.broadcast %cst_82 : f32 to vector<8x256xf32>
    %110 = arith.maximumf %108, %109 : vector<8x256xf32>
    %111 = arith.truncf %110 : vector<8x256xf32> to vector<8x256xbf16>
    %c0_83 = arith.constant 0 : index
    %c0_84 = arith.constant 0 : index
    %112 = vector.load %arg14[%c0_83, %c0_84] : memref<24x8xbf16, #tpu.memory_space<vmem>>, vector<24x8xbf16>
    %cst_85 = arith.constant dense<0.000000e+00> : vector<24x256xf32>
    %113 = tpu.matmul %112, %111, %cst_85 {dimension_numbers = #tpu.dot_dimension_numbers<[1], [0], [0], [1], [0, 0, 1, 1], [], []>} : vector<24x8xbf16>, vector<8x256xbf16>, vector<24x256xf32> -> vector<24x256xf32>
    %114 = arith.truncf %113 : vector<24x256xf32> to vector<24x256xbf16>
    %115 = vector.extract_strided_slice %114 {offsets = [0, 0], sizes = [8, 256], strides = [1, 1]} : vector<24x256xbf16> to vector<8x256xbf16>
    %c0_86 = arith.constant 0 : index
    %c0_87 = arith.constant 0 : index
    %116 = vector.load %arg22[%c0_86, %c0_87] : memref<64x768xbf16, #tpu.memory_space<vmem>>, vector<8x256xbf16>
    tpu.vector_store %arg22[%c0_86, %c0_87], %115 {strides = array<i32>} : memref<64x768xbf16, #tpu.memory_space<vmem>>, vector<8x256xbf16>,
    %117 = vector.extract_strided_slice %114 {offsets = [8, 0], sizes = [8, 256], strides = [1, 1]} : vector<24x256xbf16> to vector<8x256xbf16>
    %c0_88 = arith.constant 0 : index
    %c256_89 = arith.constant 256 : index
    %118 = vector.load %arg22[%c0_88, %c256_89] : memref<64x768xbf16, #tpu.memory_space<vmem>>, vector<8x256xbf16>
    tpu.vector_store %arg22[%c0_88, %c256_89], %117 {strides = array<i32>} : memref<64x768xbf16, #tpu.memory_space<vmem>>, vector<8x256xbf16>,
    %119 = vector.extract_strided_slice %114 {offsets = [16, 0], sizes = [8, 256], strides = [1, 1]} : vector<24x256xbf16> to vector<8x256xbf16>
    %c0_90 = arith.constant 0 : index
    %c512_91 = arith.constant 512 : index
    %120 = vector.load %arg22[%c0_90, %c512_91] : memref<64x768xbf16, #tpu.memory_space<vmem>>, vector<8x256xbf16>
    tpu.vector_store %arg22[%c0_90, %c512_91], %119 {strides = array<i32>} : memref<64x768xbf16, #tpu.memory_space<vmem>>, vector<8x256xbf16>,
    %c2_i32_92 = arith.constant 2 : i32
    %121 = tpu.memref_slice %arg27[%c2_i32_92] : memref<4x!tpu.dma_semaphore, #tpu.memory_space<semaphore_mem>> -> memref<1x!tpu.dma_semaphore, #tpu.memory_space<semaphore_mem>>
    %122 = tpu.memref_squeeze %121 : memref<1x!tpu.dma_semaphore, #tpu.memory_space<semaphore_mem>> -> memref<!tpu.dma_semaphore, #tpu.memory_space<semaphore_mem>>
    tpu.wait_dma2 semaphore(%122 : memref<!tpu.dma_semaphore, #tpu.memory_space<semaphore_mem>>) src(%arg19 : memref<768x128xbf16, #tpu.memory_space<any>>) dst(%arg25 : memref<768x128xbf16, #tpu.memory_space<vmem>>)
    %c0_93 = arith.constant 0 : index
    %c0_94 = arith.constant 0 : index
    %123 = vector.load %arg22[%c0_93, %c0_94] : memref<64x768xbf16, #tpu.memory_space<vmem>>, vector<8x768xbf16>
    %c0_95 = arith.constant 0 : index
    %c0_96 = arith.constant 0 : index
    %124 = vector.load %arg25[%c0_95, %c0_96] : memref<768x128xbf16, #tpu.memory_space<vmem>>, vector<768x128xbf16>
    %cst_97 = arith.constant dense<0.000000e+00> : vector<8x128xf32>
    %125 = tpu.matmul %123, %124, %cst_97 {dimension_numbers = #tpu.dot_dimension_numbers<[1], [0], [0], [1], [0, 0, 1, 1], [], []>} : vector<8x768xbf16>, vector<768x128xbf16>, vector<8x128xf32> -> vector<8x128xf32>
    %c0_98 = arith.constant 0 : index
    %c0_99 = arith.constant 0 : index
    %126 = vector.load %arg15[%c0_98, %c0_99] : memref<1x128xf32, #tpu.memory_space<vmem>>, vector<1x128xf32>
    %127 = vector.broadcast %126 : vector<1x128xf32> to vector<8x128xf32>
    %128 = arith.addf %125, %127 : vector<8x128xf32>
    %cst_100 = arith.constant 0.000000e+00 : f32
    %129 = vector.broadcast %cst_100 : f32 to vector<8x128xf32>
    %130 = arith.maximumf %128, %129 : vector<8x128xf32>
    %131 = arith.truncf %130 : vector<8x128xf32> to vector<8x128xbf16>
    %c3_i32_101 = arith.constant 3 : i32
    %132 = tpu.memref_slice %arg27[%c3_i32_101] : memref<4x!tpu.dma_semaphore, #tpu.memory_space<semaphore_mem>> -> memref<1x!tpu.dma_semaphore, #tpu.memory_space<semaphore_mem>>
    %133 = tpu.memref_squeeze %132 : memref<1x!tpu.dma_semaphore, #tpu.memory_space<semaphore_mem>> -> memref<!tpu.dma_semaphore, #tpu.memory_space<semaphore_mem>>
    tpu.wait_dma2 semaphore(%133 : memref<!tpu.dma_semaphore, #tpu.memory_space<semaphore_mem>>) src(%arg20 : memref<128x128xbf16, #tpu.memory_space<any>>) dst(%arg26 : memref<128x128xbf16, #tpu.memory_space<vmem>>)
    %c0_102 = arith.constant 0 : index
    %c0_103 = arith.constant 0 : index
    %134 = vector.load %arg26[%c0_102, %c0_103] : memref<128x128xbf16, #tpu.memory_space<vmem>>, vector<128x128xbf16>
    %cst_104 = arith.constant dense<0.000000e+00> : vector<8x128xf32>
    %135 = tpu.matmul %131, %134, %cst_104 {dimension_numbers = #tpu.dot_dimension_numbers<[1], [0], [0], [1], [0, 0, 1, 1], [], []>} : vector<8x128xbf16>, vector<128x128xbf16>, vector<8x128xf32> -> vector<8x128xf32>
    %c0_105 = arith.constant 0 : index
    %c0_106 = arith.constant 0 : index
    %136 = vector.load %arg16[%c0_105, %c0_106] : memref<1x128xf32, #tpu.memory_space<vmem>>, vector<1x128xf32>
    %137 = vector.broadcast %136 : vector<1x128xf32> to vector<8x128xf32>
    %138 = arith.addf %135, %137 : vector<8x128xf32>
    %c0_107 = arith.constant 0 : index
    %c0_108 = arith.constant 0 : index
    %139 = vector.load %arg21[%c0_107, %c0_108] : memref<8x128xf32, #tpu.memory_space<vmem>>, vector<8x128xf32>
    tpu.vector_store %arg21[%c0_107, %c0_108], %138 {strides = array<i32>} : memref<8x128xf32, #tpu.memory_space<vmem>>, vector<8x128xf32>,
    return
  }
  func.func @transform_0(%arg0: i32) -> (i32, i32) {
    %c0_i32 = arith.constant 0 : i32
    %c0_i32_0 = arith.constant 0 : i32
    %c0_i32_1 = arith.constant 0 : i32
    return %c0_i32, %c0_i32_0 : i32, i32
  }
  func.func @transform_1(%arg0: i32) -> (i32, i32) {
    %c0_i32 = arith.constant 0 : i32
    %c0_i32_0 = arith.constant 0 : i32
    %c0_i32_1 = arith.constant 0 : i32
    return %c0_i32, %c0_i32_0 : i32, i32
  }
  func.func @transform_2(%arg0: i32) -> (i32, i32) {
    %c0_i32 = arith.constant 0 : i32
    %c0_i32_0 = arith.constant 0 : i32
    %c0_i32_1 = arith.constant 0 : i32
    return %c0_i32, %c0_i32_0 : i32, i32
  }
  func.func @transform_3(%arg0: i32) -> (i32, i32) {
    %c0_i32 = arith.constant 0 : i32
    %c0_i32_0 = arith.constant 0 : i32
    %c0_i32_1 = arith.constant 0 : i32
    return %c0_i32, %c0_i32_0 : i32, i32
  }
  func.func @transform_4(%arg0: i32) -> (i32, i32) {
    %c0_i32 = arith.constant 0 : i32
    %c0_i32_0 = arith.constant 0 : i32
    %c0_i32_1 = arith.constant 0 : i32
    return %c0_i32, %c0_i32_0 : i32, i32
  }
  func.func @transform_5(%arg0: i32) -> (i32, i32) {
    %c0_i32 = arith.constant 0 : i32
    %c0_i32_0 = arith.constant 0 : i32
    %c0_i32_1 = arith.constant 0 : i32
    return %c0_i32, %c0_i32_0 : i32, i32
  }
  func.func @transform_6(%arg0: i32) -> (i32, i32) {
    %c0_i32 = arith.constant 0 : i32
    %c0_i32_0 = arith.constant 0 : i32
    %c0_i32_1 = arith.constant 0 : i32
    return %c0_i32, %c0_i32_0 : i32, i32
  }
  func.func @transform_7(%arg0: i32) -> (i32, i32) {
    %c0_i32 = arith.constant 0 : i32
    %c0_i32_0 = arith.constant 0 : i32
    %c0_i32_1 = arith.constant 0 : i32
    return %c0_i32, %c0_i32_0 : i32, i32
  }
  func.func @transform_8(%arg0: i32) -> (i32, i32) {
    %c0_i32 = arith.constant 0 : i32
    %c0_i32_0 = arith.constant 0 : i32
    %c0_i32_1 = arith.constant 0 : i32
    return %c0_i32, %c0_i32_0 : i32, i32
  }
  func.func @transform_9(%arg0: i32) -> (i32, i32) {
    %c0_i32 = arith.constant 0 : i32
    %c0_i32_0 = arith.constant 0 : i32
    %c0_i32_1 = arith.constant 0 : i32
    return %c0_i32, %c0_i32_0 : i32, i32
  }
  func.func @transform_10(%arg0: i32) -> (i32, i32) {
    %c0_i32 = arith.constant 0 : i32
    %c0_i32_0 = arith.constant 0 : i32
    %c0_i32_1 = arith.constant 0 : i32
    return %c0_i32, %c0_i32_0 : i32, i32
  }
  func.func @transform_11(%arg0: i32) -> (i32, i32) {
    %c0_i32 = arith.constant 0 : i32
    %c0_i32_0 = arith.constant 0 : i32
    %c0_i32_1 = arith.constant 0 : i32
    return %c0_i32, %c0_i32_0 : i32, i32
  }
  func.func @transform_12(%arg0: i32) -> (i32, i32) {
    %c0_i32 = arith.constant 0 : i32
    %c0_i32_0 = arith.constant 0 : i32
    %c0_i32_1 = arith.constant 0 : i32
    return %c0_i32, %c0_i32_0 : i32, i32
  }
  func.func @transform_13(%arg0: i32) -> (i32, i32) {
    %c0_i32 = arith.constant 0 : i32
    %c0_i32_0 = arith.constant 0 : i32
    %c0_i32_1 = arith.constant 0 : i32
    return %c0_i32, %c0_i32_0 : i32, i32
  }
  func.func @transform_14(%arg0: i32) -> (i32, i32) {
    %c0_i32 = arith.constant 0 : i32
    %c0_i32_0 = arith.constant 0 : i32
    %c0_i32_1 = arith.constant 0 : i32
    return %c0_i32, %c0_i32_0 : i32, i32
  }
  func.func @transform_15(%arg0: i32) -> (i32, i32) {
    %c0_i32 = arith.constant 0 : i32
    %c0_i32_0 = arith.constant 0 : i32
    %c0_i32_1 = arith.constant 0 : i32
    return %c0_i32, %c0_i32_0 : i32, i32
  }
  func.func @transform_20(%arg0: i32) -> (i32, i32) {
    %c0_i32 = arith.constant 0 : i32
    %c0_i32_0 = arith.constant 0 : i32
    %c0_i32_1 = arith.constant 0 : i32
    return %c0_i32, %c0_i32_0 : i32, i32
  }
}

</mosaic_0001>

<bundles_post_ra>
// kernel: encoder4l_forward.1
= control target key start
LH: loop header
LB: loop body
LE: loop exit
PB: predicated region body
PF: predicated region fallthrough
CT: control target
= control target key end

     0   :  { %s5321_s0 = inlined_call_operand.vmem [shape: f32[128,64], index: 0, kind: input, shape index: {}]   ;;  %s5322_s1 = inlined_call_operand.hbm [shape: bf16[192,128], index: 1, kind: input, shape index: {}]   ;;  %s5323_s2 = inlined_call_operand.hbm [shape: bf16[384,256], index: 2, kind: input, shape index: {}]   ;;  %s5324_s3 = inlined_call_operand.hbm [shape: f32[1,256], index: 3, kind: input, shape index: {}]   ;;  %s5325_s4 = inlined_call_operand.vmem [shape: bf16[96,64], index: 4, kind: input, shape index: {}]   ;;  %s5326_s5 = inlined_call_operand.hbm [shape: bf16[768,256], index: 5, kind: input, shape index: {}]   ;;  %s5327_s6 = inlined_call_operand.hbm [shape: f32[256,256], index: 6, kind: input, shape index: {}]   ;;  %s5328_s7 = inlined_call_operand.hbm [shape: f32[1,256], index: 7, kind: input, shape index: {}]   ;;  %s5329_s8 = inlined_call_operand.hbm [shape: f32[1,256], index: 8, kind: input, shape index: {}]   ;;  %s5330_s9 = inlined_call_operand.vmem [shape: bf16[48,32], index: 9, kind: input, shape index: {}]   ;;  %s5331_s10 = inlined_call_operand.hbm [shape: f32[1,256], index: 10, kind: input, shape index: {}]   ;;  %s5332_s11 = inlined_call_operand.vmem [shape: bf16[24,16], index: 11, kind: input, shape index: {}]   ;;  %s5333_s12 = inlined_call_operand.hbm [shape: f32[1,256], index: 12, kind: input, shape index: {}]   ;;  %s5334_s13 = inlined_call_operand.vmem [shape: bf16[24,8], index: 13, kind: input, shape index: {}]   ;;  %s5335_s14 = inlined_call_operand.hbm [shape: f32[1,128], index: 14, kind: input, shape index: {}]   ;;  %s5336_s15 = inlined_call_operand.hbm [shape: f32[1,128], index: 15, kind: input, shape index: {}]   ;;  %s5337_s16 = inlined_call_operand.hbm [shape: bf16[768,256], index: 16, kind: input, shape index: {}]   ;;  %s5338_s17 = inlined_call_operand.hbm [shape: bf16[768,256], index: 17, kind: input, shape index: {}]   ;;  %s5339_s18 = inlined_call_operand.hbm [shape: bf16[768,128], index: 18, kind: input, shape index: {}]   ;;  %s5340_s19 = inlined_call_operand.vmem [shape: bf16[128,128], index: 19, kind: input, shape index: {}]   ;;  %s5341_s20 = inlined_call_operand.vmem [shape: f32[8,128], index: 20, kind: output, shape index: {}]  }
   0x1   :  { %5354 = sst [smem:[#allocation56_spill]] %s5321_s0 }
   0x2   :  { %5355 = sst [smem:[#allocation57_spill]] %s5322_s1 }
   0x3   :  { %5356 = sst [smem:[#allocation58_spill]] %s5323_s2 }
   0x4   :  { %5357 = sst [smem:[#allocation59_spill]] %s5324_s3 }
   0x5   :  { %5358 = sst [smem:[#allocation60_spill]] %s5325_s4 }
   0x6   :  { %5359 = sst [smem:[#allocation61_spill]] %s5334_s13 }
   0x7   :  { %5360 = sst [smem:[#allocation62_spill]] %s5341_s20 }
   0x8   :  { %25 = vsyncpa [#allocation9], 0 }
   0x9   :  { %26 = vsyncpa [#allocation11], 0 }
   0xa   :  { %27 = vsyncpa [#allocation14], 0 }
   0xb   :  { %28 = vsyncpa [#allocation17], 0 }
   0xc   :  { %29 = vsyncpa [#allocation20], 0 }
   0xd   :  { %30 = vsyncpa [#allocation23], 0  ;;  %s4566_s1 = smov [#allocation10]   ;;  %s5361_s2 = sld [smem:[#allocation58_spill]] }
   0xe   :  { %s50_s22 = sshll.u32 %s4566_s1, 4  ;;  %s51_s22 = int_to_ptr.vmem [resolvable:$true] %s50_s22 }
  0x13   :  { %s4282_s25 = scalar_lea.hbm %s5361_s2, 6144 }
  0x14   :  { %p4283_p0 = scmp.ne.s32.totalorder %s5361_s2, %s4282_s25  ;;  %p4286_p1 = scmp.lt.u32.totalorder %s4282_s25, %s5361_s2 }
  0x16   :  { %p4288_p2 = pnand %p4286_p1, %p4283_p0 }
  0x18   :  { %4291 = shalt.err (!%p4288_p2)
}
  0x19   :  { %s4292_s4 = scalar_lea.vmem %s51_s22, 6144  ;;  %p4297_p4 = scmp.lt.s32.totalorder %s51_s22, %s51_s22 }
  0x1a   :  { %p4293_p3 = scmp.ne.s32.totalorder %s51_s22, %s4292_s4  ;;  %p4298_p5 = scmp.lt.s32.totalorder %s4292_s4, %s4292_s4 }
  0x1c   :  { %p4299_p6 = por %p4298_p5, %p4297_p4 }
  0x1e   :  { %p4300_p7 = pnand %p4299_p6, %p4293_p3 }
  0x20   :  { %4303 = shalt.err (!%p4300_p7)
}
  0x21   :  { %s4567_s29 = smov 128   ;;  %s4568_s30 = smov 8  }
  0x22   :  { %56 = dma.hbm_to_vmem [thread:$0]  %s5361_s2, 6144, %s51_s22, [#allocation11], %s4567_s29, %s4567_s29, %s4568_s30  }
  0x23   :  { %s4569_s1 = smov [#allocation13]   ;;  %s4570_s24 = smov [#allocation16]  }
  0x24   :  { %s74_s23 = sshll.u32 %s4569_s1, 4  ;;  %s99_s25 = sshll.u32 %s4570_s24, 4  ;;  %s75_s23 = int_to_ptr.vmem [resolvable:$true] %s74_s23  ;;  %s100_s25 = int_to_ptr.vmem [resolvable:$true] %s99_s25 }
  0x25   :  { %s4304_s27 = scalar_lea.hbm %s5326_s5, 12288 }
  0x26   :  { %p4305_p8 = scmp.ne.s32.totalorder %s5326_s5, %s4304_s27  ;;  %p4308_p9 = scmp.lt.u32.totalorder %s4304_s27, %s5326_s5 }
  0x28   :  { %p4310_p10 = pnand %p4308_p9, %p4305_p8 }
  0x2a   :  { %4313 = shalt.err (!%p4310_p10)
}
  0x2b   :  { %s4314_s22 = scalar_lea.vmem %s75_s23, 12288  ;;  %p4319_p12 = scmp.lt.s32.totalorder %s75_s23, %s75_s23 }
  0x2c   :  { %p4315_p11 = scmp.ne.s32.totalorder %s75_s23, %s4314_s22  ;;  %p4320_p13 = scmp.lt.s32.totalorder %s4314_s22, %s4314_s22 }
  0x2e   :  { %p4321_p0 = por %p4320_p13, %p4319_p12 }
  0x30   :  { %p4322_p1 = pnand %p4321_p0, %p4315_p11 }
  0x32   :  { %4325 = shalt.err (!%p4322_p1)
}
  0x33   :  { %80 = dma.hbm_to_vmem [thread:$0]  %s5326_s5, 12288, %s75_s23, [#allocation14], %s4567_s29, %s4567_s29, %s4568_s30  }
  0x34   :  { %s4326_s13 = scalar_lea.hbm %s5328_s7, 32 }
  0x35   :  { %p4327_p2 = scmp.ne.s32.totalorder %s5328_s7, %s4326_s13  ;;  %p4330_p3 = scmp.lt.u32.totalorder %s4326_s13, %s5328_s7 }
  0x37   :  { %p4332_p4 = pnand %p4330_p3, %p4327_p2 }
  0x39   :  { %4335 = shalt.err (!%p4332_p4)
}
  0x3a   :  { %s4336_s27 = scalar_lea.vmem %s100_s25, 32  ;;  %p4341_p6 = scmp.lt.s32.totalorder %s100_s25, %s100_s25 }
  0x3b   :  { %p4337_p5 = scmp.ne.s32.totalorder %s100_s25, %s4336_s27  ;;  %p4342_p7 = scmp.lt.s32.totalorder %s4336_s27, %s4336_s27 }
  0x3d   :  { %p4343_p8 = por %p4342_p7, %p4341_p6 }
  0x3f   :  { %p4344_p9 = pnand %p4343_p8, %p4337_p5 }
  0x41   :  { %4347 = shalt.err (!%p4344_p9)
}
  0x42   :  { %102 = dma.hbm_to_vmem [thread:$0]  %s5328_s7, 32, %s100_s25, [#allocation17]  }
  0x43   :  { %s4571_s23 = smov [#allocation19]   ;;  %s4572_s4 = smov [#allocation22]  }
  0x44   :  { %s121_s28 = sshll.u32 %s4571_s23, 4  ;;  %s145_s22 = sshll.u32 %s4572_s4, 4  ;;  %s122_s28 = int_to_ptr.vmem [resolvable:$true] %s121_s28  ;;  %s146_s22 = int_to_ptr.vmem [resolvable:$true] %s145_s22 }
  0x45   :  { %s4348_s21 = scalar_lea.hbm %s5331_s10, 32 }
  0x46   :  { %p4349_p10 = scmp.ne.s32.totalorder %s5331_s10, %s4348_s21  ;;  %p4352_p11 = scmp.lt.u32.totalorder %s4348_s21, %s5331_s10 }
  0x48   :  { %p4354_p12 = pnand %p4352_p11, %p4349_p10 }
  0x4a   :  { %4357 = shalt.err (!%p4354_p12)
}
  0x4b   :  { %s4358_s7 = scalar_lea.vmem %s122_s28, 32  ;;  %p4363_p0 = scmp.lt.s32.totalorder %s122_s28, %s122_s28 }
  0x4c   :  { %p4359_p13 = scmp.ne.s32.totalorder %s122_s28, %s4358_s7  ;;  %p4364_p1 = scmp.lt.s32.totalorder %s4358_s7, %s4358_s7 }
  0x4e   :  { %p4365_p2 = por %p4364_p1, %p4363_p0 }
  0x50   :  { %p4366_p3 = pnand %p4365_p2, %p4359_p13 }
  0x52   :  { %4369 = shalt.err (!%p4366_p3)
}
  0x53   :  { %124 = dma.hbm_to_vmem [thread:$0]  %s5331_s10, 32, %s122_s28, [#allocation20]  }
  0x54   :  { %s4370_s5 = scalar_lea.hbm %s5335_s14, 16 }
  0x55   :  { %p4371_p4 = scmp.ne.s32.totalorder %s5335_s14, %s4370_s5  ;;  %p4374_p5 = scmp.lt.u32.totalorder %s4370_s5, %s5335_s14 }
  0x57   :  { %p4376_p6 = pnand %p4374_p5, %p4371_p4 }
  0x59   :  { %4379 = shalt.err (!%p4376_p6)
}
  0x5a   :  { %s4380_s0 = scalar_lea.vmem %s146_s22, 16  ;;  %s4384_s21 = scalar_lea.vmem %s146_s22, 32 }
  0x5b   :  { %p4381_p7 = scmp.ne.s32.totalorder %s146_s22, %s4380_s0  ;;  %p4385_p8 = scmp.lt.s32.totalorder %s146_s22, %s146_s22 }
  0x5c   :  { %p4386_p9 = scmp.lt.s32.totalorder %s4384_s21, %s4380_s0 }
  0x5e   :  { %p4387_p10 = por %p4386_p9, %p4385_p8 }
  0x60   :  { %p4388_p11 = pnand %p4387_p10, %p4381_p7 }
  0x62   :  { %4391 = shalt.err (!%p4388_p11)
}
  0x63   :  { %148 = dma.hbm_to_vmem [thread:$0]  %s5335_s14, 16, %s146_s22, [#allocation23]  }
  0x64   :  { %s4573_s1 = smov [#allocation8]   ;;  %s5362_s7 = sld [smem:[#allocation57_spill]] }
  0x65   :  { %s38_s13 = sshll.u32 %s4573_s1, 4  ;;  %s39_s13 = int_to_ptr.vmem [resolvable:$true] %s38_s13 }
  0x6a   :  { %s4392_s25 = scalar_lea.hbm %s5362_s7, 1536 }
  0x6b   :  { %p4393_p12 = scmp.ne.s32.totalorder %s5362_s7, %s4392_s25  ;;  %p4396_p13 = scmp.lt.u32.totalorder %s4392_s25, %s5362_s7 }
  0x6d   :  { %p4398_p0 = pnand %p4396_p13, %p4393_p12 }
  0x6f   :  { %4401 = shalt.err (!%p4398_p0)
}
  0x70   :  { %s4402_s30 = scalar_lea.vmem %s39_s13, 1536  ;;  %p4407_p2 = scmp.lt.s32.totalorder %s39_s13, %s39_s13 }
  0x71   :  { %p4403_p1 = scmp.ne.s32.totalorder %s39_s13, %s4402_s30  ;;  %p4408_p3 = scmp.lt.s32.totalorder %s4402_s30, %s4402_s30 }
  0x73   :  { %p4409_p4 = por %p4408_p3, %p4407_p2 }
  0x75   :  { %p4410_p5 = pnand %p4409_p4, %p4403_p1 }
  0x77   :  { %4413 = shalt.err (!%p4410_p5)
}
  0x78   :  { %s4574_s14 = smov 64   ;;  %s4575_s22 = smov 4  }
  0x79   :  { %44 = dma.hbm_to_vmem [thread:$0]  %s5362_s7, 1536, %s39_s13, [#allocation9], %s4574_s14, %s4574_s14, %s4575_s22  }
  0x7a   :  { %s4576_s2 = smov [#allocation12]   ;;  %s4577_s21 = smov [#allocation15]  }
  0x7b   :  { %s63_s0 = sshll.u32 %s4576_s2, 4  ;;  %s86_s10 = sshll.u32 %s4577_s21, 4  ;;  %s64_s0 = int_to_ptr.vmem [resolvable:$true] %s63_s0  ;;  %s4779_s10 = int_to_ptr.vmem [resolvable:$true] %s86_s10 }
  0x7c   :  { %s5363_s20 = sld [smem:[#allocation59_spill]] }
  0x82   :  { %s4414_s24 = scalar_lea.hbm %s5363_s20, 32 }
  0x83   :  { %p4415_p6 = scmp.ne.s32.totalorder %s5363_s20, %s4414_s24  ;;  %p4418_p7 = scmp.lt.u32.totalorder %s4414_s24, %s5363_s20 }
  0x85   :  { %p4420_p8 = pnand %p4418_p7, %p4415_p6 }
  0x87   :  { %4423 = shalt.err (!%p4420_p8)
}
  0x88   :  { %s4424_s13 = scalar_lea.vmem %s64_s0, 32  ;;  %p4429_p10 = scmp.lt.s32.totalorder %s64_s0, %s64_s0 }
  0x89   :  { %p4425_p9 = scmp.ne.s32.totalorder %s64_s0, %s4424_s13  ;;  %p4430_p11 = scmp.lt.s32.totalorder %s4424_s13, %s4424_s13 }
  0x8b   :  { %p4431_p12 = por %p4430_p11, %p4429_p10 }
  0x8d   :  { %p4432_p13 = pnand %p4431_p12, %p4425_p9 }
  0x8f   :  { %4435 = shalt.err (!%p4432_p13)
}
  0x90   :  { %66 = dma.hbm_to_vmem [thread:$0]  %s5363_s20, 32, %s64_s0, [#allocation11]  }
  0x91   :  { %s4436_s4 = scalar_lea.hbm %s5327_s6, 8192 }
  0x92   :  { %p4437_p0 = scmp.ne.s32.totalorder %s5327_s6, %s4436_s4  ;;  %p4440_p1 = scmp.lt.u32.totalorder %s4436_s4, %s5327_s6 }
  0x94   :  { %p4442_p2 = pnand %p4440_p1, %p4437_p0 }
  0x96   :  { %4445 = shalt.err (!%p4442_p2)
}
  0x97   :  { %s4446_s24 = scalar_lea.vmem %s4779_s10, 8192  ;;  %p4451_p4 = scmp.lt.s32.totalorder %s4779_s10, %s4779_s10 }
  0x98   :  { %p4447_p3 = scmp.ne.s32.totalorder %s4779_s10, %s4446_s24  ;;  %p4452_p5 = scmp.lt.s32.totalorder %s4446_s24, %s4446_s24 }
  0x9a   :  { %p4453_p6 = por %p4452_p5, %p4451_p4 }
  0x9c   :  { %p4454_p7 = pnand %p4453_p6, %p4447_p3 }
  0x9e   :  { %4457 = shalt.err (!%p4454_p7)
}
  0x9f   :  { %s4578_s0 = smov 256   ;;  %s4579_s20 = smov 16  }
  0xa0   :  { %92 = dma.hbm_to_vmem [thread:$0]  %s5327_s6, 8192, %s4779_s10, [#allocation14], %s4578_s0, %s4578_s0, %s4579_s20  }
  0xa1   :  { %s4580_s26 = smov [#allocation18]   ;;  %s4581_s13 = smov [#allocation21]  }
  0xa2   :  { %s109_s27 = sshll.u32 %s4580_s26, 4  ;;  %s133_s7 = sshll.u32 %s4581_s13, 4  ;;  %s110_s27 = int_to_ptr.vmem [resolvable:$true] %s109_s27  ;;  %s134_s7 = int_to_ptr.vmem [resolvable:$true] %s133_s7 }
  0xa3   :  { %s4458_s23 = scalar_lea.hbm %s5329_s8, 32 }
  0xa4   :  { %p4459_p8 = scmp.ne.s32.totalorder %s5329_s8, %s4458_s23  ;;  %p4462_p9 = scmp.lt.u32.totalorder %s4458_s23, %s5329_s8 }
  0xa6   :  { %p4464_p10 = pnand %p4462_p9, %p4459_p8 }
  0xa8   :  { %4467 = shalt.err (!%p4464_p10)
}
  0xa9   :  { %s4468_s6 = scalar_lea.vmem %s110_s27, 32  ;;  %p4473_p12 = scmp.lt.s32.totalorder %s110_s27, %s110_s27 }
  0xaa   :  { %p4469_p11 = scmp.ne.s32.totalorder %s110_s27, %s4468_s6  ;;  %p4474_p13 = scmp.lt.s32.totalorder %s4468_s6, %s4468_s6 }
  0xac   :  { %p4475_p0 = por %p4474_p13, %p4473_p12 }
  0xae   :  { %p4476_p1 = pnand %p4475_p0, %p4469_p11 }
  0xb0   :  { %4479 = shalt.err (!%p4476_p1)
}
  0xb1   :  { %112 = dma.hbm_to_vmem [thread:$0]  %s5329_s8, 32, %s110_s27, [#allocation17]  }
  0xb2   :  { %s4480_s25 = scalar_lea.hbm %s5333_s12, 32 }
  0xb3   :  { %p4481_p2 = scmp.ne.s32.totalorder %s5333_s12, %s4480_s25  ;;  %p4484_p3 = scmp.lt.u32.totalorder %s4480_s25, %s5333_s12 }
  0xb5   :  { %p4486_p4 = pnand %p4484_p3, %p4481_p2 }
  0xb7   :  { %4489 = shalt.err (!%p4486_p4)
}
  0xb8   :  { %s4490_s30 = scalar_lea.vmem %s134_s7, 32  ;;  %p4495_p6 = scmp.lt.s32.totalorder %s134_s7, %s134_s7 }
  0xb9   :  { %p4491_p5 = scmp.ne.s32.totalorder %s134_s7, %s4490_s30  ;;  %p4496_p7 = scmp.lt.s32.totalorder %s4490_s30, %s4490_s30 }
  0xbb   :  { %p4497_p8 = por %p4496_p7, %p4495_p6 }
  0xbd   :  { %p4498_p9 = pnand %p4497_p8, %p4491_p5 }
  0xbf   :  { %4501 = shalt.err (!%p4498_p9)
}
  0xc0   :  { %136 = dma.hbm_to_vmem [thread:$0]  %s5333_s12, 32, %s134_s7, [#allocation20]  }
  0xc1   :  { %s4582_s23 = smov [#allocation24]   ;;  %s4502_s28 = scalar_lea.hbm %s5336_s15, 16 }
  0xc2   :  { %s155_s4 = sshll.u32 %s4582_s23, 4  ;;  %p4503_p10 = scmp.ne.s32.totalorder %s5336_s15, %s4502_s28  ;;  %s156_s4 = int_to_ptr.vmem [resolvable:$true] %s155_s4 }
  0xc3   :  { %p4506_p11 = scmp.lt.u32.totalorder %s4502_s28, %s5336_s15 }
  0xc5   :  { %p4508_p12 = pnand %p4506_p11, %p4503_p10 }
  0xc7   :  { %4511 = shalt.err (!%p4508_p12)
}
  0xc8   :  { %s4512_s20 = scalar_lea.vmem %s156_s4, 16  ;;  %s4516_s12 = scalar_lea.vmem %s156_s4, 32 }
  0xc9   :  { %p4513_p13 = scmp.ne.s32.totalorder %s156_s4, %s4512_s20  ;;  %p4517_p0 = scmp.lt.s32.totalorder %s156_s4, %s156_s4 }
  0xca   :  { %p4518_p1 = scmp.lt.s32.totalorder %s4516_s12, %s4512_s20 }
  0xcc   :  { %p4519_p2 = por %p4518_p1, %p4517_p0 }
  0xce   :  { %p4520_p3 = pnand %p4519_p2, %p4513_p13 }
  0xd0   :  { %4523 = shalt.err (!%p4520_p3)
}
  0xd1   :  { %158 = dma.hbm_to_vmem [thread:$0]  %s5336_s15, 16, %s156_s4, [#allocation23]  }
  0xd2   :  { %4546 = dma.done.wait [#allocation9], 1536  }
  0xd3   :  { %4547 = vsyncadd [#allocation9], 4294965760 }
  0xd4   :  { %4548 = dma.done.wait [#allocation11], 6176  }
  0xd5   :  { %4549 = vsyncadd [#allocation11], 4294961120 }
  0xd6   :  { %4550 = dma.done.wait [#allocation14], 20480  }
  0xd7   :  { %4551 = vsyncadd [#allocation14], 4294946816 }
  0xd8   :  { %4552 = dma.done.wait [#allocation17], 64  }
  0xd9   :  { %4553 = vsyncadd [#allocation17], 4294967232 }
  0xda   :  { %4554 = dma.done.wait [#allocation20], 64  }
  0xdb   :  { %4555 = vsyncadd [#allocation20], 4294967232 }
  0xdc   :  { %4556 = dma.done.wait [#allocation23], 32  }
  0xdd   :  { %4557 = vsyncadd [#allocation23], 4294967264  ;;  %s197_s3 = sld [smem:[#allocation0]]   ;;  %209 = sst [smem:[#allocation26]] %s4578_s0 }
  0xde   :  { %211 = sst [smem:[#allocation26 + $0x1]] %s4578_s0  ;;  %s4583_s26 = smov [#allocation3]  }
  0xdf   :  { %s205_s13 = sshll.u32 %s4583_s26, 4  ;;  %215 = sst [smem:[#allocation26 + $0x3]] %s4574_s14  ;;  %s206_s13 = int_to_ptr.vmem [resolvable:$true] %s205_s13 }
  0xe0   :  { %217 = sst [smem:[#allocation26 + $0x4]] %s4567_s29  ;;  %s4584_s30 = smov 2  }
  0xe1   :  { %221 = sst [smem:[#allocation26 + $0x6]] %s4567_s29  ;;  %s4585_s8 = smov [#allocation4]  }
  0xe2   :  { %223 = sst [smem:[#allocation26 + $0x7]] %s4574_s14  ;;  %s240_s27 = sshll.u32 %s4585_s8, 4  ;;  %s241_s27 = int_to_ptr.vmem [resolvable:$true] %s240_s27 }
  0xe3   :  { %s3461_s15 = sshll.u32 %s197_s3, 26  ;;  %225 = sst [smem:[#allocation26 + $0x8]] %s4575_s22 }
  0xe4   :  { %s3462_s5 = sadd.s32 134217728, %s3461_s15  ;;  %213 = sst [smem:[#allocation26 + $0x2]] %s4584_s30 }
  0xe5   :  { %219 = sst [smem:[#allocation26 + $0x5]] %s4584_s30  ;;  %s4586_s23 = smov [#allocation7]  }
  0xe6   :  { %s4587_s4 = smov [#allocation25]   ;;  %s4588_s28 = smov [#allocation5]  }
  0xe7   :  { %227 = dma.general %s5337_s16, 12288, %s206_s13, %s4586_s23, %s4587_s4, [#allocation26], %s3462_s5, 0  }
  0xe8   :  { %244 = sst [smem:[#allocation28]] %s4578_s0  ;;  %s271_s6 = sshll.u32 %s4588_s28, 4  ;;  %s272_s6 = int_to_ptr.vmem [resolvable:$true] %s271_s6 }
  0xe9   :  { %246 = sst [smem:[#allocation28 + $0x1]] %s4578_s0  ;;  %s4589_s16 = smov [#allocation7 + $0x1]  }
  0xea   :  { %248 = sst [smem:[#allocation28 + $0x2]] %s4584_s30  ;;  %s4590_s10 = smov [#allocation27]  }
  0xeb   :  { %250 = sst [smem:[#allocation28 + $0x3]] %s4574_s14  ;;  %s4524_s12 = scalar_lea.hbm %s5339_s18, 6144 }
  0xec   :  { %252 = sst [smem:[#allocation28 + $0x4]] %s4567_s29  ;;  %p4525_p4 = scmp.ne.s32.totalorder %s5339_s18, %s4524_s12 }
  0xed   :  { %254 = sst [smem:[#allocation28 + $0x5]] %s4584_s30  ;;  %p4528_p5 = scmp.lt.u32.totalorder %s4524_s12, %s5339_s18 }
  0xee   :  { %256 = sst [smem:[#allocation28 + $0x6]] %s4567_s29 }
  0xef   :  { %258 = sst [smem:[#allocation28 + $0x7]] %s4574_s14  ;;  %p4530_p6 = pnand %p4528_p5, %p4525_p4 }
  0xf0   :  { %260 = sst [smem:[#allocation28 + $0x8]] %s4575_s22 }
  0xf1   :  { %262 = dma.general %s5338_s17, 12288, %s241_s27, %s4589_s16, %s4590_s10, [#allocation28], %s3462_s5, 0  }
  0xf2   :  { %4533 = shalt.err (!%p4530_p6)  }
  0xf3   :  { %s4534_s14 = scalar_lea.vmem %s272_s6, 6144  ;;  %p4539_p8 = scmp.lt.s32.totalorder %s272_s6, %s272_s6 }
  0xf4   :  { %p4535_p7 = scmp.ne.s32.totalorder %s272_s6, %s4534_s14  ;;  %p4540_p9 = scmp.lt.s32.totalorder %s4534_s14, %s4534_s14 }
  0xf6   :  { %p4541_p10 = por %p4540_p9, %p4539_p8 }
  0xf8   :  { %p4542_p11 = pnand %p4541_p10, %p4535_p7 }
  0xfa   :  { %4545 = shalt.err (!%p4542_p11)  }
  0xfb   :  { %274 = dma.hbm_to_vmem [thread:$0]  %s5339_s18, 6144, %s272_s6, [#allocation7 + $0x2]  ;;  %v4883_v0 = vld [vmem:[%s5340_s19] sm:$0xff]  ;;  %v4888_v1 = vld [vmem:[%s5340_s19 + $0x8] sm:$0xff]  ;;  %v4893_v2 = vld [vmem:[%s5340_s19 + $0x10] sm:$0xff] }
  0xfc   :  { %5364 = vst [vmem:[#allocation44_spill] sm:$0xff] %v4883_v0  ;;  %5365 = vst [vmem:[#allocation45_spill] sm:$0xff] %v4888_v1  ;;  %v4898_v3 = vld [vmem:[%s5340_s19 + $0x18] sm:$0xff]  ;;  %v4903_v4 = vld [vmem:[%s5340_s19 + $0x20] sm:$0xff] }
  0xfd   :  { %5366 = vst [vmem:[#allocation46_spill] sm:$0xff] %v4893_v2  ;;  %5367 = vst [vmem:[#allocation47_spill] sm:$0xff] %v4898_v3  ;;  %v4908_v5 = vld [vmem:[%s5340_s19 + $0x28] sm:$0xff]  ;;  %v4913_v6 = vld [vmem:[%s5340_s19 + $0x30] sm:$0xff] }
  0xfe   :  { %5368 = vst [vmem:[#allocation48_spill] sm:$0xff] %v4903_v4  ;;  %5369 = vst [vmem:[#allocation49_spill] sm:$0xff] %v4908_v5  ;;  %v4918_v7 = vld [vmem:[%s5340_s19 + $0x38] sm:$0xff] }
  0xff   :  { %5370 = vst [vmem:[#allocation50_spill] sm:$0xff] %v4913_v6  ;;  %5371 = vst [vmem:[#allocation51_spill] sm:$0xff] %v4918_v7 }
 0x100   :  { %331 = vsyncadd [#allocation7 + $0x3], 1024  ;;  %s5372_s24 = sld [smem:[#allocation56_spill]]  ;;  %v4036_v19 = vld [vmem:[#allocation8] sm:$0xff]   ;;  %v4051_v31 = vld [vmem:[#allocation10 + $0x14] ss:$8 sps:$4 sm:$0xff]  }
 0x101   :  { %3765 = vmatprep.mubr.bf16.mxu0 %v4036_v19  ;;  %v4048_v29 = vld [vmem:[#allocation10 + $0x4] ss:$8 sps:$4 sm:$0xff]   ;;  %v4050_v30 = vld [vmem:[#allocation10] ss:$8 sps:$4 sm:$0xff]   ;;  %v4053_v34 = vld [vmem:[#allocation10 + $0x10] ss:$8 sps:$4 sm:$0xff]  }
 0x102   :  { %942 = vmatprep.subr.bf16.mxu1 %v4048_v29  ;;  %v4054_v36 = vld [vmem:[#allocation10 + $0x24] ss:$8 sps:$4 sm:$0xff]   ;;  %v4056_v38 = vld [vmem:[#allocation10 + $0x20] ss:$8 sps:$4 sm:$0xff]   ;;  %v4057_v39 = vld [vmem:[#allocation10 + $0x34] ss:$8 sps:$4 sm:$0xff]  }
 0x103   :  { %943 = vmatpush1.bf16.msra.mxu1 %v4050_v30  ;;  %v4059_v40 = vld [vmem:[#allocation10 + $0x30] ss:$8 sps:$4 sm:$0xff]   ;;  %v4037_v41 = vld [vmem:[#allocation8 + $0x8] sm:$0xff]   ;;  %v4063_v45 = vld [vmem:[#allocation10 + $0x54] ss:$8 sps:$4 sm:$0xff]   ;;  %v5348_v63 = vmov 0  }
 0x104   :  { %944 = vmatprep.subr.bf16.mxu1 %v4051_v31  ;;  %v4060_v42 = vld [vmem:[#allocation10 + $0x44] ss:$8 sps:$4 sm:$0xff]   ;;  %v4038_v43 = vld [vmem:[#allocation8 + $0x10] sm:$0xff]   ;;  %v4062_v44 = vld [vmem:[#allocation10 + $0x40] ss:$8 sps:$4 sm:$0xff]   ;;  %338 = vst [vmem:[#allocation2 + $0x30] sm:$0xff] %v5348_v63 }
 0x105   :  { %v4065_v46 = vld [vmem:[#allocation10 + $0x50] ss:$8 sps:$4 sm:$0xff]   ;;  %v4066_v47 = vld [vmem:[#allocation10 + $0x64] ss:$8 sps:$4 sm:$0xff]   ;;  %v4068_v50 = vld [vmem:[#allocation10 + $0x60] ss:$8 sps:$4 sm:$0xff]  }
 0x106   :  { %v356_v8 = vld [vmem:[%s5372_s24] sm:$0xff]  ;;  %v357_v9 = vld [vmem:[%s5372_s24 + $0x8] sm:$0xff]  ;;  %v358_v11 = vld [vmem:[%s5372_s24 + $0x10] sm:$0xff]  ;;  %347 = vst [vmem:[#allocation2 + $0x78] sm:$0xff] %v5348_v63  ;;  %vm617_vm0 = vcmask 523264   ;;  %s5373_s25 = sld [smem:[#allocation60_spill]] }
 0x107   :  { %v372_v10 = vpack.c.bf16 %v357_v9, %v356_v8  ;;  %v359_v12 = vld [vmem:[%s5372_s24 + $0x18] sm:$0xff]  ;;  %v360_v14 = vld [vmem:[%s5372_s24 + $0x20] sm:$0xff]  ;;  %v361_v15 = vld [vmem:[%s5372_s24 + $0x28] sm:$0xff]  ;;  %945 = vmatpush1.bf16.msra.mxu1 %v4053_v34  ;;  %332 = vst [vmem:[#allocation2] sm:$0xff] %v5348_v63  ;;  %vm2412_vm1 = vcmask 261120  }
 0x108   :  { %v373_v13 = vpack.c.bf16 %v359_v12, %v358_v11  ;;  %v374_v16 = vpack.c.bf16 %v361_v15, %v360_v14  ;;  %v362_v17 = vld [vmem:[%s5372_s24 + $0x30] sm:$0xff]  ;;  %v363_v18 = vld [vmem:[%s5372_s24 + $0x38] sm:$0xff]  ;;  %v364_v21 = vld [vmem:[%s5372_s24 + $0x40] sm:$0xff]  ;;  %946 = vmatprep.subr.bf16.mxu1 %v4054_v36  ;;  %333 = vst [vmem:[#allocation2 + $0x8] sm:$0xff] %v5348_v63 }
 0x109   :  { %3749 = vmatprep.subr.bf16.mxu0 %v372_v10  ;;  %v375_v20 = vpack.c.bf16 %v363_v18, %v362_v17  ;;  %v365_v22 = vld [vmem:[%s5372_s24 + $0x48] sm:$0xff]  ;;  %v366_v24 = vld [vmem:[%s5372_s24 + $0x50] sm:$0xff]  ;;  %v367_v25 = vld [vmem:[%s5372_s24 + $0x58] sm:$0xff]  ;;  %334 = vst [vmem:[#allocation2 + $0x10] sm:$0xff] %v5348_v63 }
 0x10a   :  { %3750 = vmatpush3.bf16.msra.mxu0 %v372_v10  ;;  %v376_v23 = vpack.c.bf16 %v365_v22, %v364_v21  ;;  %v368_v26 = vld [vmem:[%s5372_s24 + $0x60] sm:$0xff]  ;;  %v377_v27 = vpack.c.bf16 %v367_v25, %v366_v24  ;;  %v369_v28 = vld [vmem:[%s5372_s24 + $0x68] sm:$0xff]  ;;  %v370_v33 = vld [vmem:[%s5372_s24 + $0x70] sm:$0xff]  ;;  %339 = vst [vmem:[#allocation2 + $0x38] sm:$0xff] %v5348_v63 }
 0x10b   :  { %3751 = vmatprep.subr.bf16.mxu0 %v373_v13  ;;  %v378_v32 = vpack.c.bf16 %v369_v28, %v368_v26  ;;  %v371_v35 = vld [vmem:[%s5372_s24 + $0x78] sm:$0xff]  ;;  %947 = vmatpush1.bf16.msra.mxu1 %v4056_v38  ;;  %v4040_v49 = vld [vmem:[#allocation8 + $0x20] sm:$0xff]   ;;  %v4041_v54 = vld [vmem:[#allocation8 + $0x28] sm:$0xff]   ;;  %340 = vst [vmem:[#allocation2 + $0x40] sm:$0xff] %v5348_v63 }
 0x10c   :  { %v379_v37 = vpack.c.bf16 %v371_v35, %v370_v33  ;;  %948 = vmatprep.subr.bf16.mxu1 %v4057_v39  ;;  %v4039_v48 = vld [vmem:[#allocation8 + $0x18] sm:$0xff]   ;;  %v4072_v53 = vld [vmem:[#allocation10 + $0x84] ss:$8 sps:$4 sm:$0xff]   ;;  %v4042_v55 = vld [vmem:[#allocation8 + $0x30] sm:$0xff]   ;;  %344 = vst [vmem:[#allocation2 + $0x60] sm:$0xff] %v5348_v63 }
 0x10d   :  { %v4069_v51 = vld [vmem:[#allocation10 + $0x74] ss:$8 sps:$4 sm:$0xff]   ;;  %v4071_v52 = vld [vmem:[#allocation10 + $0x70] ss:$8 sps:$4 sm:$0xff]   ;;  %v4044_v57 = vld [vmem:[#allocation8 + $0x40] sm:$0xff]   ;;  %345 = vst [vmem:[#allocation2 + $0x68] sm:$0xff] %v5348_v63 }
 0x10e   :  { %3752 = vmatpush3.bf16.msra.mxu0 %v373_v13  ;;  %v4043_v56 = vld [vmem:[#allocation8 + $0x38] sm:$0xff]   ;;  %v4045_v58 = vld [vmem:[#allocation8 + $0x48] sm:$0xff]   ;;  %v4046_v59 = vld [vmem:[#allocation8 + $0x50] sm:$0xff]   ;;  %346 = vst [vmem:[#allocation2 + $0x70] sm:$0xff] %v5348_v63 }
 0x10f   :  { %3753 = vmatprep.subr.bf16.mxu0 %v374_v16  ;;  %949 = vmatpush1.bf16.msra.mxu1 %v4059_v40  ;;  %v4047_v60 = vld [vmem:[#allocation8 + $0x58] sm:$0xff]   ;;  %v4074_v61 = vld [vmem:[#allocation10 + $0x80] ss:$8 sps:$4 sm:$0xff]   ;;  %350 = vst [vmem:[#allocation2 + $0x90] sm:$0xff] %v5348_v63  ;;  %351 = vst [vmem:[#allocation2 + $0x98] sm:$0xff] %v5348_v63 }
 0x110   :  { %950 = vmatprep.subr.bf16.mxu1 %v4060_v42  ;;  %v4075_v62 = vld [vmem:[#allocation10 + $0x94] ss:$8 sps:$4 sm:$0xff]   ;;  %352 = vst [vmem:[#allocation2 + $0xa0] sm:$0xff] %v5348_v63  ;;  %v4077_v8 = vld [vmem:[#allocation10 + $0x90] ss:$8 sps:$4 sm:$0xff]  }
 0x111   :  { %v4078_v9 = vld [vmem:[#allocation10 + $0xa4] ss:$8 sps:$4 sm:$0xff]   ;;  %v4080_v10 = vld [vmem:[#allocation10 + $0xa0] ss:$8 sps:$4 sm:$0xff]   ;;  %v4081_v11 = vld [vmem:[#allocation10 + $0xb4] ss:$8 sps:$4 sm:$0xff]  }
 0x112   :  { %3754 = vmatpush3.bf16.msra.mxu0 %v374_v16  ;;  %v4083_v12 = vld [vmem:[#allocation10 + $0xb0] ss:$8 sps:$4 sm:$0xff]   ;;  %v4084_v13 = vld [vmem:[#allocation10 + $0xc4] ss:$8 sps:$4 sm:$0xff]   ;;  %v4086_v14 = vld [vmem:[#allocation10 + $0xc0] ss:$8 sps:$4 sm:$0xff]  }
 0x113   :  { %3755 = vmatprep.subr.bf16.mxu0 %v375_v20  ;;  %951 = vmatpush1.bf16.msra.mxu1 %v4062_v44  ;;  %v4087_v15 = vld [vmem:[#allocation10 + $0xd4] ss:$8 sps:$4 sm:$0xff]   ;;  %v4089_v16 = vld [vmem:[#allocation10 + $0xd0] ss:$8 sps:$4 sm:$0xff]   ;;  %v4090_v17 = vld [vmem:[#allocation10 + $0xe4] ss:$8 sps:$4 sm:$0xff]  }
 0x114   :  { %952 = vmatprep.subr.bf16.mxu1 %v4063_v45  ;;  %v4092_v18 = vld [vmem:[#allocation10 + $0xe0] ss:$8 sps:$4 sm:$0xff]   ;;  %v4093_v19 = vld [vmem:[#allocation10 + $0xf4] ss:$8 sps:$4 sm:$0xff]   ;;  %v4098_v21 = vld [vmem:[#allocation10 + $0x104] ss:$8 sps:$4 sm:$0xff]  }
 0x115   :  { %v4096_v45 = vld [vmem:[#allocation10 + $0x100] ss:$8 sps:$4 sm:$0xff]  }
 0x116   :  { %3756 = vmatpush3.bf16.msra.mxu0 %v375_v20  ;;  %v4095_v20 = vld [vmem:[#allocation10 + $0xf0] ss:$8 sps:$4 sm:$0xff]  }
 0x117   :  { %3757 = vmatprep.subr.bf16.mxu0 %v376_v23  ;;  %953 = vmatpush1.bf16.msra.mxu1 %v4065_v46 }
 0x118   :  { %954 = vmatprep.subr.bf16.mxu1 %v4066_v47 }
 0x11a   :  { %3758 = vmatpush3.bf16.msra.mxu0 %v376_v23 }
 0x11b   :  { %3759 = vmatprep.subr.bf16.mxu0 %v377_v27  ;;  %955 = vmatpush1.bf16.msra.mxu1 %v4068_v50 }
 0x11c   :  { %956 = vmatprep.subr.bf16.mxu1 %v4069_v51  ;;  %v4099_v51 = vld [vmem:[#allocation10 + $0x110] ss:$8 sps:$4 sm:$0xff]  }
 0x11e   :  { %3760 = vmatpush3.bf16.msra.mxu0 %v377_v27 }
 0x11f   :  { %3761 = vmatprep.subr.bf16.mxu0 %v378_v32  ;;  %957 = vmatpush1.bf16.msra.mxu1 %v4071_v52 }
 0x120   :  { %958 = vmatprep.subr.bf16.mxu1 %v4072_v53  ;;  %v4104_v53 = vld [vmem:[#allocation10 + $0x124] ss:$8 sps:$4 sm:$0xff]  }
 0x122   :  { %3762 = vmatpush3.bf16.msra.mxu0 %v378_v32 }
 0x123   :  { %3763 = vmatprep.subr.bf16.mxu0 %v379_v37  ;;  %959 = vmatpush1.bf16.msra.mxu1 %v4074_v61  ;;  %v4107_v61 = vld [vmem:[#allocation10 + $0x134] ss:$8 sps:$4 sm:$0xff]  }
 0x124   :  { %960 = vmatprep.subr.bf16.mxu1 %v4075_v62 }
 0x126   :  { %3764 = vmatpush3.bf16.msra.mxu0 %v379_v37 }
 0x127   :  { %961 = vmatpush1.bf16.msra.mxu1 %v4077_v8  ;;  %v4105_v8 = vld [vmem:[#allocation10 + $0x130] ss:$8 sps:$4 sm:$0xff]  }
 0x128   :  { %962 = vmatprep.subr.bf16.mxu1 %v4078_v9 }
 0x129   :  { %3766 = vmatmul.mubr.bf16.vlgmr.msra.gmra.mrb[0].mxu0 %v4037_v41 }
 0x12a   :  { %3769 = vmatprep.mubr.bf16.mxu0 %v4038_v43 }
 0x12b   :  { %963 = vmatpush1.bf16.msra.mxu1 %v4080_v10  ;;  %v4110_v10 = vld [vmem:[#allocation10 + $0x144] ss:$8 sps:$4 sm:$0xff]  }
 0x12c   :  { %964 = vmatprep.subr.bf16.mxu1 %v4081_v11 }
 0x12f   :  { %965 = vmatpush1.bf16.msra.mxu1 %v4083_v12 }
 0x130   :  { %966 = vmatprep.subr.bf16.mxu1 %v4084_v13 }
 0x131   :  { %3770 = vmatmul.mubr.bf16.gmra.mrb[4].mxu0 %v4039_v48  ;;  %v4101_v48 = vld [vmem:[#allocation10 + $0x114] ss:$8 sps:$4 sm:$0xff]  }
 0x132   :  { %3773 = vmatprep.mubr.bf16.mxu0 %v4040_v49 }
 0x133   :  { %967 = vmatpush1.bf16.msra.mxu1 %v4086_v14 }
 0x134   :  { %968 = vmatprep.subr.bf16.mxu1 %v4087_v15  ;;  %v4108_v15 = vld [vmem:[#allocation10 + $0x140] ss:$8 sps:$4 sm:$0xff]  }
 0x137   :  { %969 = vmatpush1.bf16.msra.mxu1 %v4089_v16 }
 0x138   :  { %970 = vmatprep.subr.bf16.mxu1 %v4090_v17  ;;  %v4113_v17 = vld [vmem:[#allocation10 + $0x154] ss:$8 sps:$4 sm:$0xff]  }
 0x139   :  { %3774 = vmatmul.mubr.bf16.gmra.mrb[8].mxu0 %v4041_v54 }
 0x13a   :  { %3777 = vmatprep.mubr.bf16.mxu0 %v4042_v55 }
 0x13b   :  { %971 = vmatpush1.bf16.msra.mxu1 %v4092_v18 }
 0x13c   :  { %972 = vmatprep.subr.bf16.mxu1 %v4093_v19 }
 0x13f   :  { %973 = vmatpush1.bf16.msra.mxu1 %v4095_v20  ;;  %v4111_v20 = vld [vmem:[#allocation10 + $0x150] ss:$8 sps:$4 sm:$0xff]  }
 0x140   :  { %1015 = vmatprep.subr.bf16.mxu1 %v4098_v21  ;;  %v4116_v21 = vld [vmem:[#allocation10 + $0x164] ss:$8 sps:$4 sm:$0xff]  }
 0x141   :  { %3778 = vmatmul.mubr.bf16.gmra.mrb[12].mxu0 %v4043_v56 }
 0x142   :  { %3781 = vmatprep.mubr.bf16.mxu0 %v4044_v57 }
 0x149   :  { %3782 = vmatmul.mubr.bf16.gmra.mrb[16].mxu0 %v4045_v58  ;;  %v4102_v58 = vld [vmem:[#allocation10 + $0x120] ss:$8 sps:$4 sm:$0xff]  }
 0x14a   :  { %3785 = vmatprep.mubr.bf16.mxu0 %v4046_v59 }
 0x151   :  { %3786 = vmatmul.mubr.bf16.gmra.mrb[20].mxu0 %v4047_v60 }
 0x152   :  { %1204 = vmatprep.mubr.bf16.mxu0 %v5348_v63 }
 0x1fc   :  { %v3767_v22 = vpop.f32.mrb[0].mxu0 }
 0x1fd   :  { %v510_v23 = vpop.f32.mrb[1].mxu0 }
 0x1fe   :  { %v3768_v24 = vpop.f32.mrb[2].mxu0 }
 0x1ff   :  { %v606_v25 = vpack.c.bf16 %v3768_v24, %v3767_v22  ;;  %v513_v26 = vpop.f32.mrb[3].mxu0  ;;  %v4114_v22 = vld [vmem:[#allocation10 + $0x160] ss:$8 sps:$4 sm:$0xff]  }
 0x200   :  { %v605_v27 = vpack.c.bf16 %v513_v26, %v510_v23  ;;  %v4119_v23 = vld [vmem:[#allocation10 + $0x174] ss:$8 sps:$4 sm:$0xff]  }
 0x201   :  { %619 = vst.msk [vmem:[#allocation2 + $0x30] sm:$0xff] %vm617_vm0, %v606_v25  ;;  %v4117_v25 = vld [vmem:[#allocation10 + $0x170] ss:$8 sps:$4 sm:$0xff]  }
 0x202   :  { %618 = vst.msk [vmem:[#allocation2] sm:$0xff] %vm617_vm0, %v605_v27 }
 0x204   :  { %v3771_v28 = vpop.f32.mrb[4].mxu0 }
 0x205   :  { %v526_v29 = vpop.f32.mrb[5].mxu0 }
 0x206   :  { %v3772_v30 = vpop.f32.mrb[6].mxu0 }
 0x207   :  { %v608_v31 = vpack.c.bf16 %v3772_v30, %v3771_v28  ;;  %v529_v32 = vpop.f32.mrb[7].mxu0  ;;  %v692_v30 = vlaneseq }
 0x208   :  { %v607_v33 = vpack.c.bf16 %v529_v32, %v526_v29  ;;  %v633_v62 = vld [vmem:[#allocation2 + $0x30] sm:$0xff] }
 0x209   :  { %621 = vst.msk [vmem:[#allocation2 + $0x90] sm:$0xff] %vm617_vm0, %v608_v31  ;;  %v630_v49 = vld [vmem:[#allocation2] sm:$0xff]  ;;  %v4998_v31 = vshrl.u32 %v692_v30, 7 }
 0x20a   :  { %620 = vst.msk [vmem:[#allocation2 + $0x60] sm:$0xff] %vm617_vm0, %v607_v33  ;;  %v690_v33 = vld [vmem:[#allocation12] sm:$0x3] }
 0x20b   :  { %v5001_v32 = vsub.s32 0, %v4998_v31 }
 0x20c   :  { %v3775_v34 = vpop.f32.mrb[8].mxu0 }
 0x20d   :  { %v542_v35 = vpop.f32.mrb[9].mxu0 }
 0x20e   :  { %v3776_v36 = vpop.f32.mrb[10].mxu0 }
 0x20f   :  { %v610_v37 = vpack.c.bf16 %v3776_v36, %v3775_v34  ;;  %v545_v38 = vpop.f32.mrb[11].mxu0  ;;  %v5004_v34 = vsub.s32 1, %v4998_v31 }
 0x210   :  { %v609_v39 = vpack.c.bf16 %v545_v38, %v542_v35  ;;  %v639_v24 = vld [vmem:[#allocation2 + $0x90] sm:$0xff]  ;;  %v695_v35 = vrot.slane %v690_v33, %v5001_v32 }
 0x211   :  { %623 = vst.msk [vmem:[#allocation2 + $0x38] sm:$0xff] %vm617_vm0, %v610_v37  ;;  %v636_v18 = vld [vmem:[#allocation2 + $0x60] sm:$0xff]  ;;  %v699_v36 = vrot.slane %v690_v33, %v5004_v34 }
 0x212   :  { %622 = vst.msk [vmem:[#allocation2 + $0x8] sm:$0xff] %vm617_vm0, %v609_v39 }
 0x214   :  { %v3779_v40 = vpop.f32.mrb[12].mxu0 }
 0x215   :  { %v558_v41 = vpop.f32.mrb[13].mxu0 }
 0x216   :  { %v3780_v42 = vpop.f32.mrb[14].mxu0 }
 0x217   :  { %v612_v43 = vpack.c.bf16 %v3780_v42, %v3779_v40  ;;  %v561_v44 = vpop.f32.mrb[15].mxu0 }
 0x218   :  { %v611_v46 = vpack.c.bf16 %v561_v44, %v558_v41  ;;  %v634_v50 = vld [vmem:[#allocation2 + $0x38] sm:$0xff] }
 0x219   :  { %v631_v47 = vld [vmem:[#allocation2 + $0x8] sm:$0xff]  ;;  %625 = vst.msk [vmem:[#allocation2 + $0x98] sm:$0xff] %vm617_vm0, %v612_v43 }
 0x21a   :  { %974 = vmatprep.mubr.bf16.mxu1 %v631_v47  ;;  %624 = vst.msk [vmem:[#allocation2 + $0x68] sm:$0xff] %vm617_vm0, %v611_v46 }
 0x21b   :  { %975 = vmatmul.mubr.bf16.vlgmr.msra.gmra.mrb[0].mxu1 %v630_v49 }
 0x21c   :  { %984 = vmatprep.mubr.bf16.mxu1 %v634_v50  ;;  %1016 = vmatpush1.bf16.msra.mxu1 %v4096_v45  ;;  %v3783_v52 = vpop.f32.mrb[16].mxu0 }
 0x21d   :  { %1017 = vmatprep.subr.bf16.mxu1 %v4101_v48  ;;  %v574_v54 = vpop.f32.mrb[17].mxu0 }
 0x21e   :  { %v3784_v55 = vpop.f32.mrb[18].mxu0 }
 0x21f   :  { %v614_v56 = vpack.c.bf16 %v3784_v55, %v3783_v52  ;;  %v577_v57 = vpop.f32.mrb[19].mxu0 }
 0x220   :  { %1018 = vmatpush1.bf16.msra.mxu1 %v4099_v51  ;;  %v613_v59 = vpack.c.bf16 %v577_v57, %v574_v54  ;;  %v640_v19 = vld [vmem:[#allocation2 + $0x98] sm:$0xff] }
 0x221   :  { %1019 = vmatprep.subr.bf16.mxu1 %v4104_v53  ;;  %v637_v60 = vld [vmem:[#allocation2 + $0x68] sm:$0xff]  ;;  %627 = vst.msk [vmem:[#allocation2 + $0x40] sm:$0xff] %vm617_vm0, %v614_v56 }
 0x222   :  { %626 = vst.msk [vmem:[#allocation2 + $0x10] sm:$0xff] %vm617_vm0, %v613_v59 }
 0x223   :  { %985 = vmatmul.mubr.bf16.gmra.mrb[4].mxu1 %v633_v62 }
 0x224   :  { %1020 = vmatpush1.bf16.msra.mxu1 %v4102_v58  ;;  %994 = vmatprep.mubr.bf16.mxu1 %v637_v60  ;;  %v3787_v9 = vpop.f32.mrb[20].mxu0 }
 0x225   :  { %1021 = vmatprep.subr.bf16.mxu1 %v4107_v61  ;;  %v590_v11 = vpop.f32.mrb[21].mxu0 }
 0x226   :  { %v3788_v12 = vpop.f32.mrb[22].mxu0 }
 0x227   :  { %v616_v13 = vpack.c.bf16 %v3788_v12, %v3787_v9  ;;  %v593_v14 = vpop.f32.mrb[23].mxu0 }
 0x228   :  { %1022 = vmatpush1.bf16.msra.mxu1 %v4105_v8  ;;  %v615_v16 = vpack.c.bf16 %v593_v14, %v590_v11  ;;  %v635_v27 = vld [vmem:[#allocation2 + $0x40] sm:$0xff] }
 0x229   :  { %1023 = vmatprep.subr.bf16.mxu1 %v4110_v10  ;;  %629 = vst.msk [vmem:[#allocation2 + $0xa0] sm:$0xff] %vm617_vm0, %v616_v13  ;;  %v632_v26 = vld [vmem:[#allocation2 + $0x10] sm:$0xff] }
 0x22a   :  { %628 = vst.msk [vmem:[#allocation2 + $0x70] sm:$0xff] %vm617_vm0, %v615_v16 }
 0x22b   :  { %995 = vmatmul.mubr.bf16.gmra.mrb[8].mxu1 %v636_v18 }
 0x22c   :  { %1004 = vmatprep.mubr.bf16.mxu1 %v640_v19  ;;  %1024 = vmatpush1.bf16.msra.mxu1 %v4108_v15 }
 0x22d   :  { %1025 = vmatprep.subr.bf16.mxu1 %v4113_v17 }
 0x230   :  { %1026 = vmatpush1.bf16.msra.mxu1 %v4111_v20  ;;  %v641_v29 = vld [vmem:[#allocation2 + $0xa0] sm:$0xff] }
 0x231   :  { %1027 = vmatprep.subr.bf16.mxu1 %v4116_v21  ;;  %v638_v28 = vld [vmem:[#allocation2 + $0x70] sm:$0xff] }
 0x233   :  { %1005 = vmatmul.mubr.bf16.gmra.mrb[12].mxu1 %v639_v24 }
 0x234   :  { %1028 = vmatpush1.bf16.msra.mxu1 %v4114_v22  ;;  %1047 = vmatprep.mubr.bf16.mxu1 %v5348_v63 }
 0x235   :  { %1029 = vmatprep.subr.bf16.mxu1 %v4119_v23 }
 0x238   :  { %1030 = vmatpush1.bf16.msra.mxu1 %v4117_v25 }
 0x23b   :  { %1048 = vmatmul.mubr.bf16.vlgmr.msra.gmra.mrb[0].mxu1 %v632_v26 }
 0x23c   :  { %1057 = vmatprep.mubr.bf16.mxu1 %v5348_v63 }
 0x243   :  { %1058 = vmatmul.mubr.bf16.gmra.mrb[4].mxu1 %v635_v27 }
 0x244   :  { %1067 = vmatprep.mubr.bf16.mxu1 %v5348_v63 }
 0x24b   :  { %1068 = vmatmul.mubr.bf16.gmra.mrb[8].mxu1 %v638_v28 }
 0x24c   :  { %1077 = vmatprep.mubr.bf16.mxu1 %v5348_v63 }
 0x253   :  { %1078 = vmatmul.mubr.bf16.gmra.mrb[12].mxu1 %v641_v29 }
 0x30e   :  { %v1049_v37 = vpop.f32.mrb[0].mxu1 }
 0x30f   :  { %v3937_v38 = vadd.f32 %v1049_v37, %v695_v35  ;;  %v1051_v39 = vpop.f32.mrb[1].mxu1 }
 0x310   :  { %v3938_v40 = vadd.f32 %v1051_v39, %v699_v36  ;;  %v1053_v41 = vpop.f32.mrb[2].mxu1 }
 0x311   :  { %v3939_v42 = vadd.f32 %v1053_v41, %v695_v35  ;;  %v1055_v43 = vpop.f32.mrb[3].mxu1  ;;  %v1088_v45 = vmax.f32 %v3937_v38, 0.0 }
 0x312   :  { %v3940_v44 = vadd.f32 %v1055_v43, %v699_v36  ;;  %v1089_v47 = vmax.f32 %v3938_v40, 0.0  ;;  %v4128_v43 = vld [vmem:[#allocation13 + $0x4] ss:$8 sps:$4 sm:$0xff]  }
 0x313   :  { %v1090_v46 = vmax.f32 %v3939_v42, 0.0 }
 0x314   :  { %v1091_v48 = vmax.f32 %v3940_v44, 0.0  ;;  %v4120_v44 = vld [vmem:[%s5373_s25] sm:$0xff]  }
 0x315   :  { %v1104_v49 = vpack.c.bf16 %v1090_v46, %v1088_v45  ;;  %v4126_v45 = vld [vmem:[#allocation13] ss:$8 sps:$4 sm:$0xff]   ;;  %v4131_v46 = vld [vmem:[#allocation13 + $0x14] ss:$8 sps:$4 sm:$0xff]  }
 0x316   :  { %v1105_v50 = vpack.c.bf16 %v1091_v48, %v1089_v47  ;;  %v1059_v51 = vpop.f32.mrb[4].mxu1  ;;  %v4121_v47 = vld [vmem:[%s5373_s25 + $0x8] sm:$0xff]  }
 0x317   :  { %v3941_v52 = vadd.f32 %v1059_v51, %v695_v35  ;;  %v1061_v53 = vpop.f32.mrb[5].mxu1  ;;  %v4132_v48 = vld [vmem:[#allocation13 + $0x20] ss:$8 sps:$4 sm:$0xff]   ;;  %v4140_v51 = vld [vmem:[#allocation13 + $0x44] ss:$8 sps:$4 sm:$0xff]  }
 0x318   :  { %v3942_v54 = vadd.f32 %v1061_v53, %v699_v36  ;;  %v1063_v55 = vpop.f32.mrb[6].mxu1  ;;  %1172 = vmatprep.subr.bf16.mxu0 %v1105_v50  ;;  %v4135_v50 = vld [vmem:[#allocation13 + $0x30] ss:$8 sps:$4 sm:$0xff]   ;;  %v4138_v53 = vld [vmem:[#allocation13 + $0x40] ss:$8 sps:$4 sm:$0xff]  }
 0x319   :  { %v3943_v56 = vadd.f32 %v1063_v55, %v695_v35  ;;  %v1065_v57 = vpop.f32.mrb[7].mxu1  ;;  %1173 = vmatpush1.bf16.msra.mxu0 %v1104_v49  ;;  %v1092_v59 = vmax.f32 %v3941_v52, 0.0  ;;  %v4137_v49 = vld [vmem:[#allocation13 + $0x34] ss:$8 sps:$4 sm:$0xff]   ;;  %v4141_v55 = vld [vmem:[#allocation13 + $0x50] ss:$8 sps:$4 sm:$0xff]  }
 0x31a   :  { %v3944_v58 = vadd.f32 %v1065_v57, %v699_v36  ;;  %v1093_v61 = vmax.f32 %v3942_v54, 0.0  ;;  %v4122_v52 = vld [vmem:[%s5373_s25 + $0x10] sm:$0xff]   ;;  %v4123_v57 = vld [vmem:[%s5373_s25 + $0x18] sm:$0xff]  }
 0x31b   :  { %v1094_v60 = vmax.f32 %v3943_v56, 0.0  ;;  %v4143_v54 = vld [vmem:[#allocation13 + $0x54] ss:$8 sps:$4 sm:$0xff]   ;;  %v4146_v56 = vld [vmem:[#allocation13 + $0x64] ss:$8 sps:$4 sm:$0xff]  }
 0x31c   :  { %v1095_v62 = vmax.f32 %v3944_v58, 0.0  ;;  %v4144_v58 = vld [vmem:[#allocation13 + $0x60] ss:$8 sps:$4 sm:$0xff]  }
 0x31d   :  { %v1106_v8 = vpack.c.bf16 %v1094_v60, %v1092_v59  ;;  %v4149_v59 = vld [vmem:[#allocation13 + $0x74] ss:$8 sps:$4 sm:$0xff]   ;;  %v4147_v60 = vld [vmem:[#allocation13 + $0x70] ss:$8 sps:$4 sm:$0xff]  }
 0x31e   :  { %v1107_v9 = vpack.c.bf16 %v1095_v62, %v1093_v61  ;;  %v1069_v10 = vpop.f32.mrb[8].mxu1  ;;  %v4152_v61 = vld [vmem:[#allocation13 + $0x84] ss:$8 sps:$4 sm:$0xff]  }
 0x31f   :  { %v3945_v11 = vadd.f32 %v1069_v10, %v695_v35  ;;  %v1071_v12 = vpop.f32.mrb[9].mxu1  ;;  %v4124_v62 = vld [vmem:[%s5373_s25 + $0x20] sm:$0xff]   ;;  %v4153_v10 = vld [vmem:[#allocation13 + $0x90] ss:$8 sps:$4 sm:$0xff]  }
 0x320   :  { %v3946_v13 = vadd.f32 %v1071_v12, %v699_v36  ;;  %v1073_v14 = vpop.f32.mrb[10].mxu1  ;;  %1174 = vmatprep.subr.bf16.mxu0 %v1107_v9  ;;  %v4155_v9 = vld [vmem:[#allocation13 + $0x94] ss:$8 sps:$4 sm:$0xff]   ;;  %v4125_v12 = vld [vmem:[%s5373_s25 + $0x28] sm:$0xff]  }
 0x321   :  { %v3947_v15 = vadd.f32 %v1073_v14, %v695_v35  ;;  %v1075_v16 = vpop.f32.mrb[11].mxu1  ;;  %1175 = vmatpush1.bf16.msra.mxu0 %v1106_v8  ;;  %v1096_v18 = vmax.f32 %v3945_v11, 0.0  ;;  %v4150_v8 = vld [vmem:[#allocation13 + $0x80] ss:$8 sps:$4 sm:$0xff]   ;;  %v4158_v11 = vld [vmem:[#allocation13 + $0xa4] ss:$8 sps:$4 sm:$0xff]  }
 0x322   :  { %v3948_v17 = vadd.f32 %v1075_v16, %v699_v36  ;;  %v1097_v20 = vmax.f32 %v3946_v13, 0.0  ;;  %v4156_v13 = vld [vmem:[#allocation13 + $0xa0] ss:$8 sps:$4 sm:$0xff]   ;;  %v4161_v14 = vld [vmem:[#allocation13 + $0xb4] ss:$8 sps:$4 sm:$0xff]  }
 0x323   :  { %v1098_v19 = vmax.f32 %v3947_v15, 0.0  ;;  %v4159_v15 = vld [vmem:[#allocation13 + $0xb0] ss:$8 sps:$4 sm:$0xff]   ;;  %v4164_v16 = vld [vmem:[#allocation13 + $0xc4] ss:$8 sps:$4 sm:$0xff]  }
 0x324   :  { %v1099_v21 = vmax.f32 %v3948_v17, 0.0  ;;  %v4162_v17 = vld [vmem:[#allocation13 + $0xc0] ss:$8 sps:$4 sm:$0xff]  }
 0x325   :  { %v1108_v22 = vpack.c.bf16 %v1098_v19, %v1096_v18  ;;  %v4167_v18 = vld [vmem:[#allocation13 + $0xd4] ss:$8 sps:$4 sm:$0xff]   ;;  %v4165_v19 = vld [vmem:[#allocation13 + $0xd0] ss:$8 sps:$4 sm:$0xff]  }
 0x326   :  { %v1109_v23 = vpack.c.bf16 %v1099_v21, %v1097_v20  ;;  %v1079_v24 = vpop.f32.mrb[12].mxu1  ;;  %v4170_v20 = vld [vmem:[#allocation13 + $0xe4] ss:$8 sps:$4 sm:$0xff]   ;;  %v4168_v21 = vld [vmem:[#allocation13 + $0xe0] ss:$8 sps:$4 sm:$0xff]  }
 0x327   :  { %v3949_v25 = vadd.f32 %v1079_v24, %v695_v35  ;;  %v1081_v26 = vpop.f32.mrb[13].mxu1  ;;  %v4176_v24 = vld [vmem:[#allocation13 + $0x104] ss:$8 sps:$4 sm:$0xff]  }
 0x328   :  { %v3950_v27 = vadd.f32 %v1081_v26, %v699_v36  ;;  %v1083_v28 = vpop.f32.mrb[14].mxu1  ;;  %1176 = vmatprep.subr.bf16.mxu0 %v1109_v23  ;;  %v4171_v23 = vld [vmem:[#allocation13 + $0xf0] ss:$8 sps:$4 sm:$0xff]  }
 0x329   :  { %v3951_v29 = vadd.f32 %v1083_v28, %v695_v35  ;;  %v1085_v30 = vpop.f32.mrb[15].mxu1  ;;  %1177 = vmatpush1.bf16.msra.mxu0 %v1108_v22  ;;  %v1100_v37 = vmax.f32 %v3949_v25, 0.0  ;;  %v4129_v35 = vld [vmem:[#allocation13 + $0x10] ss:$8 sps:$4 sm:$0xff]   ;;  %v4173_v22 = vld [vmem:[#allocation13 + $0xf4] ss:$8 sps:$4 sm:$0xff]  }
 0x32a   :  { %v3952_v33 = vadd.f32 %v1085_v30, %v699_v36  ;;  %v1101_v39 = vmax.f32 %v3950_v27, 0.0  ;;  %v4134_v36 = vld [vmem:[#allocation13 + $0x24] ss:$8 sps:$4 sm:$0xff]  }
 0x32b   :  { %v1102_v38 = vmax.f32 %v3951_v29, 0.0 }
 0x32c   :  { %v1103_v40 = vmax.f32 %v3952_v33, 0.0  ;;  %v4174_v33 = vld [vmem:[#allocation13 + $0x100] ss:$8 sps:$4 sm:$0xff]  }
 0x32d   :  { %v1110_v41 = vpack.c.bf16 %v1102_v38, %v1100_v37  ;;  %v4179_v37 = vld [vmem:[#allocation13 + $0x114] ss:$8 sps:$4 sm:$0xff]   ;;  %v4177_v38 = vld [vmem:[#allocation13 + $0x110] ss:$8 sps:$4 sm:$0xff]  }
 0x32e   :  { %v1111_v42 = vpack.c.bf16 %v1103_v40, %v1101_v39  ;;  %v4182_v40 = vld [vmem:[#allocation13 + $0x124] ss:$8 sps:$4 sm:$0xff]  }
 0x330   :  { %1178 = vmatprep.subr.bf16.mxu0 %v1111_v42 }
 0x331   :  { %1179 = vmatpush1.bf16.msra.mxu0 %v1110_v41 }
 0x332   :  { %1877 = vmatprep.subr.bf16.mxu0 %v4128_v43 }
 0x334   :  { %3531 = vmatmul.mubr.msk.bf16.vlgmr.msra.gmra.mrb[24].mxu0 %vm617_vm0, %v4120_v44 }
 0x335   :  { %1214 = vmatprep.mubr.bf16.mxu0 %v5348_v63  ;;  %1878 = vmatpush1.bf16.msra.mxu0 %v4126_v45  ;;  %v4180_v45 = vld [vmem:[#allocation13 + $0x120] ss:$8 sps:$4 sm:$0xff]  }
 0x336   :  { %1879 = vmatprep.subr.bf16.mxu0 %v4131_v46 }
 0x339   :  { %1880 = vmatpush1.bf16.msra.mxu0 %v4129_v35  ;;  %v4185_v35 = vld [vmem:[#allocation13 + $0x134] ss:$8 sps:$4 sm:$0xff]  }
 0x33a   :  { %1881 = vmatprep.subr.bf16.mxu0 %v4134_v36  ;;  %v4183_v36 = vld [vmem:[#allocation13 + $0x130] ss:$8 sps:$4 sm:$0xff]  }
 0x33c   :  { %3532 = vmatmul.mubr.msk.bf16.gmra.mrb[28].mxu0 %vm617_vm0, %v4121_v47  ;;  %v4188_v47 = vld [vmem:[#allocation13 + $0x144] ss:$8 sps:$4 sm:$0xff]  }
 0x33d   :  { %1224 = vmatprep.mubr.bf16.mxu0 %v5348_v63  ;;  %1882 = vmatpush1.bf16.msra.mxu0 %v4132_v48  ;;  %v2081_v48 = vld [vmem:[#allocation15 + $0x8] sm:$0xff] }
 0x33e   :  { %1883 = vmatprep.subr.bf16.mxu0 %v4137_v49  ;;  %v2083_v49 = vld [vmem:[#allocation15 + $0x18] sm:$0xff] }
 0x341   :  { %1884 = vmatpush1.bf16.msra.mxu0 %v4135_v50  ;;  %v2080_v50 = vld [vmem:[#allocation15] sm:$0xff] }
 0x342   :  { %1885 = vmatprep.subr.bf16.mxu0 %v4140_v51 }
 0x344   :  { %3533 = vmatmul.mubr.msk.bf16.gmra.mrb[32].mxu0 %vm617_vm0, %v4122_v52  ;;  %v5039_v52 = vpack.c.bf16 %v2083_v49, %v2081_v48  ;;  %v2100_v49 = vld [vmem:[#allocation15 + $0xa0] sm:$0xff] }
 0x345   :  { %1234 = vmatprep.mubr.bf16.mxu0 %v5348_v63  ;;  %1886 = vmatpush1.bf16.msra.mxu0 %v4138_v53  ;;  %v2082_v53 = vld [vmem:[#allocation15 + $0x10] sm:$0xff] }
 0x346   :  { %1887 = vmatprep.subr.bf16.mxu0 %v4143_v54  ;;  %v2085_v54 = vld [vmem:[#allocation15 + $0x28] sm:$0xff]  ;;  %3810 = vmatprep.subr.bf16.mxu1 %v5039_v52 }
 0x349   :  { %1888 = vmatpush1.bf16.msra.mxu0 %v4141_v55  ;;  %v2087_v55 = vld [vmem:[#allocation15 + $0x38] sm:$0xff] }
 0x34a   :  { %1889 = vmatprep.subr.bf16.mxu0 %v4146_v56 }
 0x34c   :  { %3534 = vmatmul.mubr.msk.bf16.gmra.mrb[36].mxu0 %vm617_vm0, %v4123_v57  ;;  %v5041_v57 = vpack.c.bf16 %v2082_v53, %v2080_v50  ;;  %v2102_v50 = vld [vmem:[#allocation15 + $0xb0] sm:$0xff]  ;;  %v4200_v53 = vld [vmem:[#allocation13 + $0x184] ss:$8 sps:$4 sm:$0xff]  }
 0x34d   :  { %1244 = vmatprep.mubr.bf16.mxu0 %v5348_v63  ;;  %1890 = vmatpush1.bf16.msra.mxu0 %v4144_v58  ;;  %v5043_v58 = vpack.c.bf16 %v2087_v55, %v2085_v54  ;;  %v2105_v55 = vld [vmem:[#allocation15 + $0xc8] sm:$0xff] }
 0x34e   :  { %1891 = vmatprep.subr.bf16.mxu0 %v4149_v59  ;;  %v2084_v59 = vld [vmem:[#allocation15 + $0x20] sm:$0xff]  ;;  %3812 = vmatpush1.bf16.msra.mxu1 %v5041_v57 }
 0x34f   :  { %3814 = vmatprep.subr.bf16.mxu1 %v5043_v58 }
 0x351   :  { %1892 = vmatpush1.bf16.msra.mxu0 %v4147_v60  ;;  %v2086_v60 = vld [vmem:[#allocation15 + $0x30] sm:$0xff] }
 0x352   :  { %1893 = vmatprep.subr.bf16.mxu0 %v4152_v61  ;;  %v2089_v61 = vld [vmem:[#allocation15 + $0x48] sm:$0xff] }
 0x354   :  { %3535 = vmatmul.mubr.msk.bf16.gmra.mrb[40].mxu0 %vm617_vm0, %v4124_v62 }
 0x355   :  { %1254 = vmatprep.mubr.bf16.mxu0 %v5348_v63  ;;  %1894 = vmatpush1.bf16.msra.mxu0 %v4150_v8  ;;  %v2091_v8 = vld [vmem:[#allocation15 + $0x58] sm:$0xff] }
 0x356   :  { %1895 = vmatprep.subr.bf16.mxu0 %v4155_v9 }
 0x359   :  { %1896 = vmatpush1.bf16.msra.mxu0 %v4153_v10 }
 0x35a   :  { %1897 = vmatprep.subr.bf16.mxu0 %v4158_v11  ;;  %v5051_v11 = vpack.c.bf16 %v2086_v60, %v2084_v59 }
 0x35c   :  { %3536 = vmatmul.mubr.msk.bf16.gmra.mrb[44].mxu0 %vm617_vm0, %v4125_v12  ;;  %v4186_v12 = vld [vmem:[#allocation13 + $0x140] ss:$8 sps:$4 sm:$0xff]   ;;  %3816 = vmatpush1.bf16.msra.mxu1 %v5051_v11 }
 0x35d   :  { %1898 = vmatpush1.bf16.msra.mxu0 %v4156_v13 }
 0x35e   :  { %1899 = vmatprep.subr.bf16.mxu0 %v4161_v14  ;;  %v5054_v14 = vpack.c.bf16 %v2091_v8, %v2089_v61  ;;  %v5094_v8 = vpack.c.bf16 %v2102_v50, %v2100_v49 }
 0x360   :  { %3818 = vmatprep.subr.bf16.mxu1 %v5054_v14 }
 0x361   :  { %1900 = vmatpush1.bf16.msra.mxu0 %v4159_v15  ;;  %v2088_v15 = vld [vmem:[#allocation15 + $0x40] sm:$0xff] }
 0x362   :  { %1901 = vmatprep.subr.bf16.mxu0 %v4164_v16  ;;  %v2090_v16 = vld [vmem:[#allocation15 + $0x50] sm:$0xff] }
 0x365   :  { %1902 = vmatpush1.bf16.msra.mxu0 %v4162_v17  ;;  %v4191_v17 = vld [vmem:[#allocation13 + $0x154] ss:$8 sps:$4 sm:$0xff]  }
 0x366   :  { %1903 = vmatprep.subr.bf16.mxu0 %v4167_v18  ;;  %v2093_v18 = vld [vmem:[#allocation15 + $0x68] sm:$0xff] }
 0x369   :  { %1904 = vmatpush1.bf16.msra.mxu0 %v4165_v19  ;;  %v2095_v19 = vld [vmem:[#allocation15 + $0x78] sm:$0xff] }
 0x36a   :  { %1905 = vmatprep.subr.bf16.mxu0 %v4170_v20  ;;  %v5057_v20 = vpack.c.bf16 %v2090_v16, %v2088_v15  ;;  %v2104_v15 = vld [vmem:[#allocation15 + $0xc0] sm:$0xff]  ;;  %v2106_v16 = vld [vmem:[#allocation15 + $0xd0] sm:$0xff] }
 0x36c   :  { %3820 = vmatpush1.bf16.msra.mxu1 %v5057_v20 }
 0x36d   :  { %1906 = vmatpush1.bf16.msra.mxu0 %v4168_v21  ;;  %v4189_v21 = vld [vmem:[#allocation13 + $0x150] ss:$8 sps:$4 sm:$0xff]  }
 0x36e   :  { %1907 = vmatprep.subr.bf16.mxu0 %v4173_v22 }
 0x371   :  { %1908 = vmatpush1.bf16.msra.mxu0 %v4171_v23  ;;  %v5060_v23 = vpack.c.bf16 %v2095_v19, %v2093_v18  ;;  %v2109_v18 = vld [vmem:[#allocation15 + $0xe8] sm:$0xff]  ;;  %v2111_v19 = vld [vmem:[#allocation15 + $0xf8] sm:$0xff] }
 0x372   :  { %1930 = vmatprep.subr.bf16.mxu0 %v4176_v24  ;;  %v2092_v24 = vld [vmem:[#allocation15 + $0x60] sm:$0xff] }
 0x373   :  { %3822 = vmatprep.subr.bf16.mxu1 %v5060_v23 }
 0x407   :  { %v1206_v25 = vpop.f32.mrb[24].mxu0 }
 0x408   :  { %v1208_v26 = vpop.f32.mrb[25].mxu0 }
 0x409   :  { %v1210_v27 = vpop.f32.mrb[26].mxu0 }
 0x40a   :  { %v1265_v28 = vpack.c.bf16 %v1210_v27, %v1206_v25  ;;  %v1212_v29 = vpop.f32.mrb[27].mxu0  ;;  %v2094_v25 = vld [vmem:[#allocation15 + $0x70] sm:$0xff] }
 0x40b   :  { %v1266_v30 = vpack.c.bf16 %v1212_v29, %v1208_v26  ;;  %v4194_v26 = vld [vmem:[#allocation13 + $0x164] ss:$8 sps:$4 sm:$0xff]   ;;  %v2099_v29 = vld [vmem:[#allocation15 + $0x98] sm:$0xff] }
 0x40d   :  { %1909 = vmatprep.mubr.bf16.mxu0 %v1266_v30 }
 0x40e   :  { %1910 = vmatmul.mubr.bf16.vlgmr.msra.gmra.mrb[48].mxu0 %v1265_v28  ;;  %v2097_v28 = vld [vmem:[#allocation15 + $0x88] sm:$0xff] }
 0x40f   :  { %1931 = vmatpush1.bf16.msra.mxu0 %v4174_v33  ;;  %v1216_v39 = vpop.f32.mrb[28].mxu0 }
 0x410   :  { %1932 = vmatprep.subr.bf16.mxu0 %v4179_v37  ;;  %v1218_v41 = vpop.f32.mrb[29].mxu0 }
 0x411   :  { %v1220_v42 = vpop.f32.mrb[30].mxu0 }
 0x412   :  { %v1267_v43 = vpack.c.bf16 %v1220_v42, %v1216_v39  ;;  %v1222_v44 = vpop.f32.mrb[31].mxu0  ;;  %v4192_v39 = vld [vmem:[#allocation13 + $0x160] ss:$8 sps:$4 sm:$0xff]  }
 0x413   :  { %1933 = vmatpush1.bf16.msra.mxu0 %v4177_v38  ;;  %v1268_v46 = vpack.c.bf16 %v1222_v44, %v1218_v41  ;;  %v5069_v38 = vpack.c.bf16 %v2094_v25, %v2092_v24  ;;  %v5074_v41 = vpack.c.bf16 %v2099_v29, %v2097_v28  ;;  %v2096_v42 = vld [vmem:[#allocation15 + $0x80] sm:$0xff]  ;;  %v4197_v44 = vld [vmem:[#allocation13 + $0x174] ss:$8 sps:$4 sm:$0xff]   ;;  %v5107_v25 = vpack.c.bf16 %v2111_v19, %v2109_v18 }
 0x414   :  { %1934 = vmatprep.subr.bf16.mxu0 %v4182_v40  ;;  %1279 = vst [vmem:[#allocation2 + $0x30] sm:$0xff] %v1267_v43  ;;  %v2110_v28 = vld [vmem:[#allocation15 + $0xf0] sm:$0xff]  ;;  %v4206_v29 = vld [vmem:[#allocation13 + $0x1a4] ss:$8 sps:$4 sm:$0xff]  }
 0x415   :  { %1280 = vst [vmem:[#allocation2 + $0x38] sm:$0xff] %v1268_v46  ;;  %1919 = vmatprep.mubr.bf16.mxu0 %v1268_v46  ;;  %v2103_v46 = vld [vmem:[#allocation15 + $0xb8] sm:$0xff]  ;;  %3824 = vmatpush1.bf16.msra.mxu1 %v5069_v38  ;;  %v2116_v19 = vld [vmem:[#allocation15 + $0x120] sm:$0xff] }
 0x416   :  { %1920 = vmatmul.mubr.bf16.gmra.mrb[52].mxu0 %v1267_v43  ;;  %v2098_v43 = vld [vmem:[#allocation15 + $0x90] sm:$0xff]  ;;  %3826 = vmatprep.subr.bf16.mxu1 %v5074_v41 }
 0x417   :  { %1935 = vmatpush1.bf16.msra.mxu0 %v4180_v45  ;;  %v5037_v51 = vpop.f32.mrb[32].mxu0  ;;  %v2101_v45 = vld [vmem:[#allocation15 + $0xa8] sm:$0xff] }
 0x418   :  { %1936 = vmatprep.subr.bf16.mxu0 %v4185_v35  ;;  %v1228_v56 = vpop.f32.mrb[33].mxu0  ;;  %v5078_v35 = vpack.c.bf16 %v2098_v43, %v2096_v42  ;;  %v5083_v48 = vpack.c.bf16 %v2103_v46, %v2101_v45  ;;  %v2115_v42 = vld [vmem:[#allocation15 + $0x118] sm:$0xff] }
 0x419   :  { %v5045_v62 = vpop.f32.mrb[34].mxu0 }
 0x41a   :  { %v1269_v9 = vpack.c.bf16 %v5045_v62, %v5037_v51  ;;  %v1232_v10 = vpop.f32.mrb[35].mxu0  ;;  %3828 = vmatpush1.bf16.msra.mxu1 %v5078_v35  ;;  %v4236_v51 = vld [vmem:[#allocation13 + $0x244] ss:$8 sps:$4 sm:$0xff]   ;;  %v4234_v62 = vld [vmem:[#allocation13 + $0x240] ss:$8 sps:$4 sm:$0xff]  }
 0x41b   :  { %1937 = vmatpush1.bf16.msra.mxu0 %v4183_v36  ;;  %v1270_v13 = vpack.c.bf16 %v1232_v10, %v1228_v56  ;;  %v4195_v36 = vld [vmem:[#allocation13 + $0x170] ss:$8 sps:$4 sm:$0xff]   ;;  %v4198_v10 = vld [vmem:[#allocation13 + $0x180] ss:$8 sps:$4 sm:$0xff]   ;;  %3830 = vmatprep.subr.bf16.mxu1 %v5083_v48 }
 0x41c   :  { %1938 = vmatprep.subr.bf16.mxu0 %v4188_v47  ;;  %v2107_v56 = vld [vmem:[#allocation15 + $0xd8] sm:$0xff] }
 0x41d   :  { %1962 = vmatprep.mubr.bf16.mxu0 %v1270_v13  ;;  %v5099_v13 = vpack.c.bf16 %v2107_v56, %v2105_v55  ;;  %v2114_v55 = vld [vmem:[#allocation15 + $0x110] sm:$0xff] }
 0x41e   :  { %3832 = vmatpush1.bf16.msra.mxu1 %v5094_v8  ;;  %v4209_v56 = vld [vmem:[#allocation13 + $0x1b4] ss:$8 sps:$4 sm:$0xff]  }
 0x41f   :  { %1939 = vmatpush1.bf16.msra.mxu0 %v4186_v12  ;;  %v1236_v22 = vpop.f32.mrb[36].mxu0  ;;  %3834 = vmatprep.subr.bf16.mxu1 %v5099_v13 }
 0x420   :  { %1940 = vmatprep.subr.bf16.mxu0 %v4191_v17  ;;  %v5062_v27 = vpop.f32.mrb[37].mxu0  ;;  %v4203_v17 = vld [vmem:[#allocation13 + $0x194] ss:$8 sps:$4 sm:$0xff]  }
 0x421   :  { %v1240_v30 = vpop.f32.mrb[38].mxu0 }
 0x422   :  { %v5064_v33 = vpack.c.bf16 %v1240_v30, %v1236_v22  ;;  %v5066_v37 = vpop.f32.mrb[39].mxu0  ;;  %v4201_v22 = vld [vmem:[#allocation13 + $0x190] ss:$8 sps:$4 sm:$0xff]  }
 0x423   :  { %1941 = vmatpush1.bf16.msra.mxu0 %v4189_v21  ;;  %v1272_v40 = vpack.c.bf16 %v5066_v37, %v5062_v27  ;;  %v5102_v21 = vpack.c.bf16 %v2106_v16, %v2104_v15  ;;  %v2119_v15 = vld [vmem:[#allocation15 + $0x138] sm:$0xff]  ;;  %v4242_v37 = vld [vmem:[#allocation13 + $0x264] ss:$8 sps:$4 sm:$0xff]  }
 0x424   :  { %1942 = vmatprep.subr.bf16.mxu0 %v4194_v26  ;;  %1283 = vst [vmem:[#allocation2 + $0x40] sm:$0xff] %v5064_v33  ;;  %v2108_v26 = vld [vmem:[#allocation15 + $0xe0] sm:$0xff]  ;;  %v4237_v27 = vld [vmem:[#allocation13 + $0x250] ss:$8 sps:$4 sm:$0xff]  }
 0x425   :  { %3836 = vmatpush1.bf16.msra.mxu1 %v5102_v21  ;;  %v5118_v46 = vpack.c.bf16 %v2110_v28, %v2108_v26  ;;  %v4212_v26 = vld [vmem:[#allocation13 + $0x1c4] ss:$8 sps:$4 sm:$0xff]  }
 0x426   :  { %3838 = vmatprep.subr.bf16.mxu1 %v5107_v25 }
 0x427   :  { %1943 = vmatpush1.bf16.msra.mxu0 %v4192_v39  ;;  %v5080_v47 = vpop.f32.mrb[40].mxu0  ;;  %v2113_v39 = vld [vmem:[#allocation15 + $0x108] sm:$0xff] }
 0x428   :  { %1944 = vmatprep.subr.bf16.mxu0 %v4197_v44  ;;  %v5085_v54 = vpop.f32.mrb[41].mxu0  ;;  %v5123_v50 = vpack.c.bf16 %v2115_v42, %v2113_v39  ;;  %v4215_v39 = vld [vmem:[#allocation13 + $0x1d4] ss:$8 sps:$4 sm:$0xff]   ;;  %v4213_v42 = vld [vmem:[#allocation13 + $0x1d0] ss:$8 sps:$4 sm:$0xff]  }
 0x429   :  { %v5087_v59 = vpop.f32.mrb[42].mxu0  ;;  %3840 = vmatpush1.bf16.msra.mxu1 %v5118_v46 }
 0x42a   :  { %v1273_v60 = vpack.c.bf16 %v5087_v59, %v5080_v47  ;;  %v5091_v61 = vpop.f32.mrb[43].mxu0  ;;  %3842 = vmatprep.subr.bf16.mxu1 %v5123_v50  ;;  %v2125_v47 = vld [vmem:[#allocation15 + $0x168] sm:$0xff]  ;;  %v2127_v59 = vld [vmem:[#allocation15 + $0x178] sm:$0xff] }
 0x42b   :  { %1945 = vmatpush1.bf16.msra.mxu0 %v4195_v36  ;;  %v1274_v12 = vpack.c.bf16 %v5091_v61, %v5085_v54  ;;  %v4204_v36 = vld [vmem:[#allocation13 + $0x1a0] ss:$8 sps:$4 sm:$0xff]   ;;  %v4251_v61 = vld [vmem:[#allocation13 + $0x294] ss:$8 sps:$4 sm:$0xff]  }
 0x42c   :  { %1946 = vmatprep.subr.bf16.mxu0 %v4200_v53  ;;  %v2112_v53 = vld [vmem:[#allocation15 + $0x100] sm:$0xff] }
 0x42d   :  { %v5126_v16 = vpack.c.bf16 %v2114_v55, %v2112_v53  ;;  %v4216_v53 = vld [vmem:[#allocation13 + $0x1e0] ss:$8 sps:$4 sm:$0xff]   ;;  %v4221_v55 = vld [vmem:[#allocation13 + $0x1f4] ss:$8 sps:$4 sm:$0xff]  }
 0x42e   :  { %v4246_v54 = vld [vmem:[#allocation13 + $0x280] ss:$8 sps:$4 sm:$0xff]  }
 0x42f   :  { %1947 = vmatpush1.bf16.msra.mxu0 %v4198_v10  ;;  %v5104_v24 = vpop.f32.mrb[44].mxu0  ;;  %v2117_v10 = vld [vmem:[#allocation15 + $0x128] sm:$0xff]  ;;  %3844 = vmatpush1.bf16.msra.mxu1 %v5126_v16 }
 0x430   :  { %1948 = vmatprep.subr.bf16.mxu0 %v4203_v17  ;;  %v5109_v30 = vpop.f32.mrb[45].mxu0  ;;  %v4207_v17 = vld [vmem:[#allocation13 + $0x1b0] ss:$8 sps:$4 sm:$0xff]   ;;  %v5129_v18 = vpack.c.bf16 %v2119_v15, %v2117_v10  ;;  %v4224_v10 = vld [vmem:[#allocation13 + $0x204] ss:$8 sps:$4 sm:$0xff]  }
 0x431   :  { %v5111_v43 = vpop.f32.mrb[46].mxu0  ;;  %v4222_v15 = vld [vmem:[#allocation13 + $0x200] ss:$8 sps:$4 sm:$0xff]  }
 0x432   :  { %v1275_v44 = vpack.c.bf16 %v5111_v43, %v5104_v24  ;;  %v5115_v45 = vpop.f32.mrb[47].mxu0  ;;  %3846 = vmatprep.subr.bf16.mxu1 %v5129_v18  ;;  %v2129_v43 = vld [vmem:[#allocation15 + $0x188] sm:$0xff] }
 0x433   :  { %1949 = vmatpush1.bf16.msra.mxu0 %v4201_v22  ;;  %v1276_v49 = vpack.c.bf16 %v5115_v45, %v5109_v30  ;;  %v2118_v22 = vld [vmem:[#allocation15 + $0x130] sm:$0xff]  ;;  %v2124_v30 = vld [vmem:[#allocation15 + $0x160] sm:$0xff] }
 0x434   :  { %1950 = vmatprep.subr.bf16.mxu0 %v4206_v29  ;;  %v5132_v28 = vpack.c.bf16 %v2118_v22, %v2116_v19  ;;  %v4210_v29 = vld [vmem:[#allocation13 + $0x1c0] ss:$8 sps:$4 sm:$0xff]   ;;  %v4225_v19 = vld [vmem:[#allocation13 + $0x210] ss:$8 sps:$4 sm:$0xff]   ;;  %v4230_v22 = vld [vmem:[#allocation13 + $0x224] ss:$8 sps:$4 sm:$0xff]  }
 0x435   :  { %v2126_v45 = vld [vmem:[#allocation15 + $0x170] sm:$0xff] }
 0x436   :  { %3848 = vmatpush1.bf16.msra.mxu1 %v5132_v28  ;;  %v5163_v24 = vpack.c.bf16 %v2126_v45, %v2124_v30 }
 0x437   :  { %1951 = vmatpush1.bf16.msra.mxu0 %v4204_v36  ;;  %v4218_v36 = vld [vmem:[#allocation13 + $0x1e4] ss:$8 sps:$4 sm:$0xff]  }
 0x438   :  { %1952 = vmatprep.subr.bf16.mxu0 %v4209_v56  ;;  %v4219_v56 = vld [vmem:[#allocation13 + $0x1f0] ss:$8 sps:$4 sm:$0xff]  }
 0x43b   :  { %1953 = vmatpush1.bf16.msra.mxu0 %v4207_v17  ;;  %v4227_v17 = vld [vmem:[#allocation13 + $0x214] ss:$8 sps:$4 sm:$0xff]  }
 0x43c   :  { %1954 = vmatprep.subr.bf16.mxu0 %v4212_v26  ;;  %v4228_v26 = vld [vmem:[#allocation13 + $0x220] ss:$8 sps:$4 sm:$0xff]  }
 0x43f   :  { %1955 = vmatpush1.bf16.msra.mxu0 %v4210_v29  ;;  %v4233_v29 = vld [vmem:[#allocation13 + $0x234] ss:$8 sps:$4 sm:$0xff]  }
 0x440   :  { %1956 = vmatprep.subr.bf16.mxu0 %v4215_v39  ;;  %v4231_v39 = vld [vmem:[#allocation13 + $0x230] ss:$8 sps:$4 sm:$0xff]  }
 0x443   :  { %1957 = vmatpush1.bf16.msra.mxu0 %v4213_v42  ;;  %v4243_v42 = vld [vmem:[#allocation13 + $0x270] ss:$8 sps:$4 sm:$0xff]  }
 0x444   :  { %1958 = vmatprep.subr.bf16.mxu0 %v4218_v36  ;;  %v4248_v36 = vld [vmem:[#allocation13 + $0x284] ss:$8 sps:$4 sm:$0xff]  }
 0x447   :  { %1959 = vmatpush1.bf16.msra.mxu0 %v4216_v53  ;;  %v4254_v53 = vld [vmem:[#allocation13 + $0x2a4] ss:$8 sps:$4 sm:$0xff]  }
 0x448   :  { %1960 = vmatprep.subr.bf16.mxu0 %v4221_v55  ;;  %v4252_v55 = vld [vmem:[#allocation13 + $0x2a0] ss:$8 sps:$4 sm:$0xff]  }
 0x44b   :  { %1961 = vmatpush1.bf16.msra.mxu0 %v4219_v56  ;;  %v4257_v56 = vld [vmem:[#allocation13 + $0x2b4] ss:$8 sps:$4 sm:$0xff]  }
 0x44c   :  { %1983 = vmatprep.subr.bf16.mxu0 %v4224_v10  ;;  %v4255_v10 = vld [vmem:[#allocation13 + $0x2b0] ss:$8 sps:$4 sm:$0xff]  }
 0x44e   :  { %1963 = vmatmul.mubr.bf16.vlgmr.msra.gmra.mrb[48].mxu0 %v1269_v9  ;;  %v4239_v9 = vld [vmem:[#allocation13 + $0x254] ss:$8 sps:$4 sm:$0xff]  }
 0x44f   :  { %1984 = vmatpush1.bf16.msra.mxu0 %v4222_v15  ;;  %1972 = vmatprep.mubr.bf16.mxu0 %v1272_v40  ;;  %v4240_v40 = vld [vmem:[#allocation13 + $0x260] ss:$8 sps:$4 sm:$0xff]   ;;  %v4260_v15 = vld [vmem:[#allocation13 + $0x2c4] ss:$8 sps:$4 sm:$0xff]  }
 0x450   :  { %1985 = vmatprep.subr.bf16.mxu0 %v4227_v17  ;;  %v4258_v17 = vld [vmem:[#allocation13 + $0x2c0] ss:$8 sps:$4 sm:$0xff]  }
 0x453   :  { %1986 = vmatpush1.bf16.msra.mxu0 %v4225_v19  ;;  %v4263_v19 = vld [vmem:[#allocation13 + $0x2d4] ss:$8 sps:$4 sm:$0xff]  }
 0x454   :  { %1987 = vmatprep.subr.bf16.mxu0 %v4230_v22  ;;  %v4261_v22 = vld [vmem:[#allocation13 + $0x2d0] ss:$8 sps:$4 sm:$0xff]  }
 0x456   :  { %1973 = vmatmul.mubr.bf16.gmra.mrb[52].mxu0 %v5064_v33  ;;  %v4245_v33 = vld [vmem:[#allocation13 + $0x274] ss:$8 sps:$4 sm:$0xff]  }
 0x457   :  { %1988 = vmatpush1.bf16.msra.mxu0 %v4228_v26  ;;  %2015 = vmatprep.mubr.bf16.mxu0 %v1274_v12  ;;  %v4249_v12 = vld [vmem:[#allocation13 + $0x290] ss:$8 sps:$4 sm:$0xff]   ;;  %v4266_v26 = vld [vmem:[#allocation13 + $0x2e4] ss:$8 sps:$4 sm:$0xff]  }
 0x458   :  { %1989 = vmatprep.subr.bf16.mxu0 %v4233_v29  ;;  %v4264_v29 = vld [vmem:[#allocation13 + $0x2e0] ss:$8 sps:$4 sm:$0xff]  }
 0x45b   :  { %1990 = vmatpush1.bf16.msra.mxu0 %v4231_v39  ;;  %v4269_v39 = vld [vmem:[#allocation13 + $0x2f4] ss:$8 sps:$4 sm:$0xff]  }
 0x45c   :  { %1991 = vmatprep.subr.bf16.mxu0 %v4236_v51  ;;  %v4267_v51 = vld [vmem:[#allocation13 + $0x2f0] ss:$8 sps:$4 sm:$0xff]  }
 0x45f   :  { %1992 = vmatpush1.bf16.msra.mxu0 %v4234_v62  ;;  %v2121_v62 = vld [vmem:[#allocation15 + $0x148] sm:$0xff] }
 0x460   :  { %1993 = vmatprep.subr.bf16.mxu0 %v4239_v9  ;;  %v2123_v9 = vld [vmem:[#allocation15 + $0x158] sm:$0xff] }
 0x463   :  { %1994 = vmatpush1.bf16.msra.mxu0 %v4237_v27  ;;  %v5155_v27 = vpack.c.bf16 %v2123_v9, %v2121_v62  ;;  %v2140_v9 = vld [vmem:[#allocation15 + $0x1e0] sm:$0xff] }
 0x464   :  { %1995 = vmatprep.subr.bf16.mxu0 %v4242_v37  ;;  %v2120_v37 = vld [vmem:[#allocation15 + $0x140] sm:$0xff] }
 0x465   :  { %3850 = vmatprep.subr.bf16.mxu1 %v5155_v27 }
 0x467   :  { %1996 = vmatpush1.bf16.msra.mxu0 %v4240_v40  ;;  %v2122_v40 = vld [vmem:[#allocation15 + $0x150] sm:$0xff] }
 0x468   :  { %1997 = vmatprep.subr.bf16.mxu0 %v4245_v33  ;;  %v5157_v33 = vpack.c.bf16 %v2122_v40, %v2120_v37  ;;  %v2142_v37 = vld [vmem:[#allocation15 + $0x1f0] sm:$0xff] }
 0x469   :  { %v5187_v40 = vpack.c.bf16 %v2142_v37, %v2140_v9 }
 0x46a   :  { %3852 = vmatpush1.bf16.msra.mxu1 %v5157_v33 }
 0x46b   :  { %1998 = vmatpush1.bf16.msra.mxu0 %v4243_v42  ;;  %v2128_v42 = vld [vmem:[#allocation15 + $0x180] sm:$0xff] }
 0x46c   :  { %1999 = vmatprep.subr.bf16.mxu0 %v4248_v36  ;;  %v2130_v36 = vld [vmem:[#allocation15 + $0x190] sm:$0xff] }
 0x46f   :  { %2000 = vmatpush1.bf16.msra.mxu0 %v4246_v54  ;;  %v5169_v54 = vpack.c.bf16 %v2130_v36, %v2128_v42 }
 0x470   :  { %2001 = vmatprep.subr.bf16.mxu0 %v4251_v61  ;;  %v2133_v61 = vld [vmem:[#allocation15 + $0x1a8] sm:$0xff] }
 0x473   :  { %2002 = vmatpush1.bf16.msra.mxu0 %v4249_v12  ;;  %v2135_v12 = vld [vmem:[#allocation15 + $0x1b8] sm:$0xff] }
 0x474   :  { %2003 = vmatprep.subr.bf16.mxu0 %v4254_v53  ;;  %v5173_v53 = vpack.c.bf16 %v2135_v12, %v2133_v61 }
 0x477   :  { %2004 = vmatpush1.bf16.msra.mxu0 %v4252_v55  ;;  %v2132_v55 = vld [vmem:[#allocation15 + $0x1a0] sm:$0xff] }
 0x478   :  { %2005 = vmatprep.subr.bf16.mxu0 %v4257_v56  ;;  %v2134_v56 = vld [vmem:[#allocation15 + $0x1b0] sm:$0xff] }
 0x47b   :  { %2006 = vmatpush1.bf16.msra.mxu0 %v4255_v10  ;;  %v5175_v10 = vpack.c.bf16 %v2134_v56, %v2132_v55 }
 0x47c   :  { %2007 = vmatprep.subr.bf16.mxu0 %v4260_v15  ;;  %v2137_v15 = vld [vmem:[#allocation15 + $0x1c8] sm:$0xff] }
 0x47f   :  { %2008 = vmatpush1.bf16.msra.mxu0 %v4258_v17  ;;  %v2139_v17 = vld [vmem:[#allocation15 + $0x1d8] sm:$0xff] }
 0x480   :  { %2009 = vmatprep.subr.bf16.mxu0 %v4263_v19  ;;  %v5179_v19 = vpack.c.bf16 %v2139_v17, %v2137_v15 }
 0x483   :  { %2010 = vmatpush1.bf16.msra.mxu0 %v4261_v22  ;;  %v2136_v22 = vld [vmem:[#allocation15 + $0x1c0] sm:$0xff] }
 0x484   :  { %2011 = vmatprep.subr.bf16.mxu0 %v4266_v26  ;;  %v2138_v26 = vld [vmem:[#allocation15 + $0x1d0] sm:$0xff] }
 0x487   :  { %2012 = vmatpush1.bf16.msra.mxu0 %v4264_v29  ;;  %v5181_v29 = vpack.c.bf16 %v2138_v26, %v2136_v22 }
 0x488   :  { %2013 = vmatprep.subr.bf16.mxu0 %v4269_v39  ;;  %v2141_v39 = vld [vmem:[#allocation15 + $0x1e8] sm:$0xff] }
 0x48b   :  { %2014 = vmatpush1.bf16.msra.mxu0 %v4267_v51  ;;  %v2143_v51 = vld [vmem:[#allocation15 + $0x1f8] sm:$0xff] }
 0x48c   :  { %v5185_v62 = vpack.c.bf16 %v2143_v51, %v2141_v39 }
 0x48e   :  { %2016 = vmatmul.mubr.bf16.vlgmr.msra.gmra.mrb[48].mxu0 %v1273_v60  ;;  %v5161_v60 = vpack.c.bf16 %v2127_v59, %v2125_v47 }
 0x48f   :  { %2025 = vmatprep.mubr.bf16.mxu0 %v1276_v49 }
 0x490   :  { %3854 = vmatprep.subr.bf16.mxu1 %v5161_v60 }
 0x491   :  { %3856 = vmatpush1.bf16.msra.mxu1 %v5163_v24 }
 0x496   :  { %2026 = vmatmul.mubr.bf16.gmra.mrb[52].mxu0 %v1275_v44  ;;  %v2131_v44 = vld [vmem:[#allocation15 + $0x198] sm:$0xff] }
 0x497   :  { %v5167_v49 = vpack.c.bf16 %v2131_v44, %v2129_v43 }
 0x499   :  { %3858 = vmatprep.subr.bf16.mxu1 %v5167_v49 }
 0x49a   :  { %3860 = vmatpush1.bf16.msra.mxu1 %v5169_v54 }
 0x49b   :  { %3862 = vmatprep.subr.bf16.mxu1 %v5173_v53 }
 0x49e   :  { %3864 = vmatpush1.bf16.msra.mxu1 %v5175_v10 }
 0x49f   :  { %3866 = vmatprep.subr.bf16.mxu1 %v5179_v19 }
 0x4a2   :  { %3868 = vmatpush1.bf16.msra.mxu1 %v5181_v29 }
 0x4a3   :  { %3870 = vmatprep.subr.bf16.mxu1 %v5185_v62 }
 0x4a6   :  { %3872 = vmatpush1.bf16.msra.mxu1 %v5187_v40 }
 0x4a7   :  { %3874 = vmatprep.subr.bf16.mxu1 %v5039_v52 }
 0x561   :  { %v5192_v47 = vpop.f32.mrb[48].mxu0 }
 0x562   :  { %v5194_v59 = vpop.f32.mrb[49].mxu0  ;;  %v2054_v45 = vmul.f32 %v5192_v47, %v5192_v47 }
 0x563   :  { %v5196_v30 = vpop.f32.mrb[50].mxu0  ;;  %v2055_v52 = vmul.f32 %v5194_v59, %v5194_v59 }
 0x564   :  { %v2036_v43 = vadd.f32 %v5196_v30, %v5192_v47  ;;  %v2056_v44 = vmul.f32 %v5196_v30, %v5196_v30  ;;  %v5204_v42 = vpop.f32.mrb[51].mxu0 }
 0x565   :  { %v2045_v36 = vadd.f32 %v5204_v42, %v5194_v59  ;;  %v2057_v61 = vmul.f32 %v5204_v42, %v5204_v42 }
 0x566   :  { %v2062_v12 = vadd.f32 %v2056_v44, %v2054_v45 }
 0x567   :  { %v2071_v55 = vadd.f32 %v2057_v61, %v2055_v52 }
 0x569   :  { %v5212_v56 = vpop.f32.mrb[52].mxu0 }
 0x56a   :  { %5374 = vst [vmem:[#allocation52_spill] sm:$0xff] %v5212_v56  ;;  %v2037_v15 = vadd.f32 %v2036_v43, %v5212_v56  ;;  %v2058_v17 = vmul.f32 %v5212_v56, %v5212_v56  ;;  %v5217_v22 = vpop.f32.mrb[53].mxu0 }
 0x56b   :  { %5375 = vst [vmem:[#allocation53_spill] sm:$0xff] %v5217_v22  ;;  %v2046_v26 = vadd.f32 %v2045_v36, %v5217_v22  ;;  %v2059_v39 = vmul.f32 %v5217_v22, %v5217_v22  ;;  %v5222_v51 = vpop.f32.mrb[54].mxu0 }
 0x56c   :  { %5376 = vst [vmem:[#allocation54_spill] sm:$0xff] %v5222_v51  ;;  %v2063_v9 = vadd.f32 %v2062_v12, %v2058_v17  ;;  %v2038_v37 = vadd.f32 %v2037_v15, %v5222_v51  ;;  %v2060_v45 = vmul.f32 %v5222_v51, %v5222_v51  ;;  %v5227_v44 = vpop.f32.mrb[55].mxu0 }
 0x56d   :  { %5377 = vst [vmem:[#allocation55_spill] sm:$0xff] %v5227_v44  ;;  %v2072_v43 = vadd.f32 %v2071_v55, %v2059_v39  ;;  %v2047_v52 = vadd.f32 %v2046_v26, %v5227_v44  ;;  %v2061_v61 = vmul.f32 %v5227_v44, %v5227_v44 }
 0x56e   :  { %v2039_v36 = vrot.slane %v2038_v37, 4  ;;  %v2064_v63 = vadd.f32 %v2063_v9, %v2060_v45 }
 0x56f   :  { %v2048_v7 = vrot.slane %v2047_v52, 4  ;;  %v2073_v6 = vadd.f32 %v2072_v43, %v2061_v61  ;;  %v2319_v61 = vld [vmem:[#allocation18] sm:$0x3] }
 0x570   :  { %v2040_v5 = vadd.f32 %v2039_v36, %v2038_v37 }
 0x571   :  { %v2049_v4 = vadd.f32 %v2048_v7, %v2047_v52  ;;  %v2074_v12 = vrot.slane %v2073_v6, 4  ;;  %v5380_v37 = vld [vmem:[#allocation52_spill] sm:$0xff] }
 0x572   :  { %v2041_v17 = vrot.slane %v2040_v5, 2 }
 0x573   :  { %v2050_v15 = vrot.slane %v2049_v4, 2  ;;  %v2075_v3 = vadd.f32 %v2074_v12, %v2073_v6  ;;  %v5263_v6 = vld [vmem:[#allocation2 + $0x78] sm:$0xff] }
 0x574   :  { %v2042_v2 = vadd.f32 %v2041_v17, %v2040_v5 }
 0x575   :  { %v2051_v1 = vadd.f32 %v2050_v15, %v2049_v4  ;;  %v2076_v0 = vrot.slane %v2075_v3, 2 }
 0x576   :  { %v2043_v51 = vrot.slane %v2042_v2, 1 }
 0x577   :  { %v2052_v55 = vrot.slane %v2051_v1, 1  ;;  %v2077_v39 = vadd.f32 %v2076_v0, %v2075_v3  ;;  %v2065_v0 = vrot.slane %v2064_v63, 4 }
 0x578   :  { %v2044_v22 = vadd.f32 %v2043_v51, %v2042_v2 }
 0x579   :  { %v2053_v26 = vadd.f32 %v2052_v55, %v2051_v1  ;;  %v2078_v56 = vrot.slane %v2077_v39, 1  ;;  %v2066_v1 = vadd.f32 %v2065_v0, %v2064_v63 }
 0x57b   :  { %2208 = vmatprep.mubr.f32.mxu1 %v2053_v26  ;;  %v2079_v44 = vadd.f32 %v2078_v56, %v2077_v39  ;;  %v2067_v2 = vrot.slane %v2066_v1, 2 }
 0x57c   :  { %2209 = vmatmul.mubr.f32.vlgmr.msra.gmra.mrb[16].mxu1 %v2044_v22  ;;  %v5379_v22 = vld [vmem:[#allocation55_spill] sm:$0xff] }
 0x57d   :  { %3876 = vmatpush1.bf16.msra.mxu1 %v5041_v57  ;;  %2282 = vmatprep.mubr.f32.mxu1 %v2079_v44  ;;  %v2068_v3 = vadd.f32 %v2067_v2, %v2066_v1  ;;  %v5381_v44 = vld [vmem:[#allocation54_spill] sm:$0xff] }
 0x57e   :  { %3878 = vmatprep.subr.bf16.mxu1 %v5043_v58 }
 0x57f   :  { %v2069_v4 = vrot.slane %v2068_v3, 1 }
 0x581   :  { %3880 = vmatpush1.bf16.msra.mxu1 %v5051_v11  ;;  %v2070_v5 = vadd.f32 %v2069_v4, %v2068_v3 }
 0x582   :  { %3882 = vmatprep.subr.bf16.mxu1 %v5054_v14 }
 0x585   :  { %3884 = vmatpush1.bf16.msra.mxu1 %v5057_v20 }
 0x586   :  { %3886 = vmatprep.subr.bf16.mxu1 %v5060_v23 }
 0x589   :  { %3888 = vmatpush1.bf16.msra.mxu1 %v5069_v38 }
 0x58a   :  { %3890 = vmatprep.subr.bf16.mxu1 %v5074_v41 }
 0x58d   :  { %3892 = vmatpush1.bf16.msra.mxu1 %v5078_v35 }
 0x58e   :  { %3894 = vmatprep.subr.bf16.mxu1 %v5083_v48 }
 0x591   :  { %3896 = vmatpush1.bf16.msra.mxu1 %v5094_v8 }
 0x592   :  { %3898 = vmatprep.subr.bf16.mxu1 %v5099_v13 }
 0x595   :  { %3900 = vmatpush1.bf16.msra.mxu1 %v5102_v21  ;;  %v4592_v21 = vmov 1966171168  }
 0x596   :  { %3902 = vmatprep.subr.bf16.mxu1 %v5107_v25  ;;  %v2304_v25 = vunpack.c.l.s4 %v4592_v21 }
 0x599   :  { %3904 = vmatpush1.bf16.msra.mxu1 %v5118_v46  ;;  %v2305_v46 = vunpack.c.0.s8 %v2304_v25 }
 0x59a   :  { %3906 = vmatprep.subr.bf16.mxu1 %v5123_v50 }
 0x59d   :  { %3908 = vmatpush1.bf16.msra.mxu1 %v5126_v16  ;;  %v2308_v16 = vsub.s32 %v2305_v46, %v4998_v31 }
 0x59e   :  { %3910 = vmatprep.subr.bf16.mxu1 %v5129_v18 }
 0x5a1   :  { %3912 = vmatpush1.bf16.msra.mxu1 %v5132_v28 }
 0x5a2   :  { %3914 = vmatprep.subr.bf16.mxu1 %v5155_v27 }
 0x5a5   :  { %3916 = vmatpush1.bf16.msra.mxu1 %v5157_v33  ;;  %v2295_v33 = vld [vmem:[#allocation16] sm:$0x3] }
 0x5a6   :  { %3918 = vmatprep.subr.bf16.mxu1 %v5161_v60 }
 0x5a9   :  { %3920 = vmatpush1.bf16.msra.mxu1 %v5163_v24 }
 0x5aa   :  { %3922 = vmatprep.subr.bf16.mxu1 %v5167_v49 }
 0x5ad   :  { %3924 = vmatpush1.bf16.msra.mxu1 %v5169_v54 }
 0x5ae   :  { %3926 = vmatprep.subr.bf16.mxu1 %v5173_v53 }
 0x5b1   :  { %3928 = vmatpush1.bf16.msra.mxu1 %v5175_v10 }
 0x5b2   :  { %3930 = vmatprep.subr.bf16.mxu1 %v5179_v19 }
 0x5b5   :  { %3932 = vmatpush1.bf16.msra.mxu1 %v5181_v29 }
 0x5b6   :  { %3934 = vmatprep.subr.bf16.mxu1 %v5185_v62 }
 0x5b9   :  { %3936 = vmatpush1.bf16.msra.mxu1 %v5187_v40  ;;  %v5378_v40 = vld [vmem:[#allocation53_spill] sm:$0xff] }
 0x5bc   :  { %2283 = vmatmul.mubr.f32.vlgmr.msra.gmra.mrb[18].mxu1 %v2070_v5 }
 0x5bd   :  { %2454 = vmatprep.mubr.bf16.mxu1 %v5263_v6 }
 0x64f   :  { %v2210_v7 = vpop.f32.mrb[16].mxu1 }
 0x650   :  { %v2212_v63 = vpop.f32.mrb[17].mxu1  ;;  %v2216_v57 = vmul.f32 0.001953125, %v2210_v7 }
 0x651   :  { %v2217_v58 = vmul.f32 0.001953125, %v2212_v63 }
 0x652   :  { %v2291_v14 = vmul.f32 %v2216_v57, %v2216_v57 }
 0x653   :  { %v2292_v38 = vmul.f32 %v2217_v58, %v2217_v58 }
 0x68f   :  { %v2284_v11 = vpop.f32.mrb[18].mxu1 }
 0x690   :  { %v2289_v20 = vmul.f32 0.001953125, %v2284_v11  ;;  %v2286_v23 = vpop.f32.mrb[19].mxu1 }
 0x691   :  { %v2290_v41 = vmul.f32 0.001953125, %v2286_v23  ;;  %v4270_v23 = vld [vmem:[%s5330_s9] sm:$0xff]  }
 0x692   :  { %v2293_v35 = vsub.f32 %v2289_v20, %v2291_v14 }
 0x693   :  { %v2294_v48 = vsub.f32 %v2290_v41, %v2292_v38  ;;  %v4271_v38 = vld [vmem:[%s5330_s9 + $0x8] sm:$0xff]   ;;  %v4272_v41 = vld [vmem:[%s5330_s9 + $0x10] sm:$0xff]  }
 0x694   :  { %v2296_v8 = vadd.f32 1e-05, %v2293_v35 }
 0x695   :  { %v2297_v13 = vadd.f32 1e-05, %v2294_v48 }
 0x696   :  { %4273 = vrsqrt.f32 %v2296_v8 }
 0x697   :  { %4275 = vrsqrt.f32 %v2297_v13 }
 0x6a0   :  { %v4274_v50 = vpop.eup %4273 }
 0x6a1   :  { %v4276_v18 = vpop.eup %4275 }
 0x6a2   :  { %v2302_v28 = vcombine.low %v4274_v50, %v4276_v18 }
 0x6a4   :  { %v2309_v27 = vrot.slane %v2302_v28, %v2308_v16 }
 0x6a6   :  { %v2316_v60 = vrot.slane %v2309_v27, %v2308_v16 }
 0x6a8   :  { %v2318_v24 = vmul.f32 %v2316_v60, %v2295_v33 }
 0x6aa   :  { %v2324_v49 = vrot.slane %v2318_v24, %v5001_v32  ;;  %v2328_v54 = vrot.slane %v2318_v24, %v5004_v34 }
 0x6ac   :  { %v2331_v53 = vmul.f32 %v2324_v49, %v2216_v57  ;;  %v2332_v10 = vmul.f32 %v2328_v54, %v2217_v58  ;;  %v2353_v19 = vmul.f32 %v2328_v54, %v5194_v59  ;;  %v2355_v29 = vmul.f32 %v2328_v54, %v5204_v42 }
 0x6ad   :  { %v2352_v62 = vmul.f32 %v2324_v49, %v5192_v47  ;;  %v2354_v31 = vmul.f32 %v2324_v49, %v5196_v30  ;;  %v2357_v56 = vmul.f32 %v2328_v54, %v5378_v40  ;;  %v2359_v51 = vmul.f32 %v2328_v54, %v5379_v22 }
 0x6ae   :  { %v2335_v9 = vcombine.low %v2331_v53, %v2332_v10  ;;  %v2356_v45 = vmul.f32 %v2324_v49, %v5380_v37  ;;  %v2358_v43 = vmul.f32 %v2324_v49, %v5381_v44 }
 0x6b0   :  { %v2342_v52 = vrot.slane %v2335_v9, %v2308_v16 }
 0x6b2   :  { %v2349_v36 = vrot.slane %v2342_v52, %v2308_v16 }
 0x6b4   :  { %v2351_v12 = vsub.f32 %v2319_v61, %v2349_v36 }
 0x6b6   :  { %v2368_v59 = vrot.slane %v2351_v12, %v5004_v34  ;;  %v2364_v42 = vrot.slane %v2351_v12, %v5001_v32 }
 0x6b8   :  { %v2372_v47 = vadd.f32 %v2368_v59, %v2353_v19  ;;  %v2374_v17 = vadd.f32 %v2368_v59, %v2355_v29  ;;  %v2371_v30 = vadd.f32 %v2364_v42, %v2352_v62  ;;  %v2373_v15 = vadd.f32 %v2364_v42, %v2354_v31 }
 0x6b9   :  { %v2376_v55 = vadd.f32 %v2368_v59, %v2357_v56  ;;  %v2378_v39 = vadd.f32 %v2368_v59, %v2359_v51  ;;  %v2375_v26 = vadd.f32 %v2364_v42, %v2356_v45  ;;  %v2377_v0 = vadd.f32 %v2364_v42, %v2358_v43 }
 0x6ba   :  { %v2380_v1 = vmax.f32 %v2372_v47, 0.0  ;;  %v2382_v2 = vmax.f32 %v2374_v17, 0.0  ;;  %v2379_v3 = vmax.f32 %v2371_v30, 0.0  ;;  %v2381_v4 = vmax.f32 %v2373_v15, 0.0 }
 0x6bb   :  { %v2384_v5 = vmax.f32 %v2376_v55, 0.0  ;;  %v2386_v7 = vmax.f32 %v2378_v39, 0.0  ;;  %v2383_v63 = vmax.f32 %v2375_v26, 0.0  ;;  %v2385_v57 = vmax.f32 %v2377_v0, 0.0 }
 0x6bc   :  { %v2388_v58 = vpack.c.bf16 %v2382_v2, %v2380_v1  ;;  %v2387_v11 = vpack.c.bf16 %v2381_v4, %v2379_v3 }
 0x6bd   :  { %v2390_v14 = vpack.c.bf16 %v2386_v7, %v2384_v5  ;;  %v2389_v20 = vpack.c.bf16 %v2385_v57, %v2383_v63 }
 0x6be   :  { %2422 = vmatprep.subr.bf16.mxu1 %v2388_v58 }
 0x6bf   :  { %2423 = vmatpush1.bf16.msra.mxu1 %v2387_v11 }
 0x6c0   :  { %2424 = vmatprep.subr.bf16.mxu1 %v2390_v14 }
 0x6c3   :  { %2425 = vmatpush1.bf16.msra.mxu1 %v2389_v20 }
 0x6c6   :  { %3636 = vmatmul.mubr.msk.bf16.vlgmr.msra.gmra.mrb[20].mxu1 %vm2412_vm1, %v4270_v23 }
 0x6c7   :  { %2464 = vmatprep.mubr.bf16.mxu1 %v5263_v6 }
 0x6ce   :  { %3637 = vmatmul.mubr.msk.bf16.gmra.mrb[24].mxu1 %vm2412_vm1, %v4271_v38 }
 0x6cf   :  { %2474 = vmatprep.mubr.bf16.mxu1 %v5263_v6 }
 0x6d6   :  { %3638 = vmatmul.mubr.msk.bf16.gmra.mrb[28].mxu1 %vm2412_vm1, %v4272_v41 }
 0x799   :  { %v2456_v35 = vpop.f32.mrb[20].mxu1 }
 0x79a   :  { %v2458_v48 = vpop.f32.mrb[21].mxu1 }
 0x79b   :  { %v2460_v8 = vpop.f32.mrb[22].mxu1 }
 0x79c   :  { %v2485_v13 = vpack.c.bf16 %v2460_v8, %v2456_v35  ;;  %v2462_v21 = vpop.f32.mrb[23].mxu1 }
 0x79d   :  { %v2486_v25 = vpack.c.bf16 %v2462_v21, %v2458_v48 }
 0x79e   :  { %2491 = vst [vmem:[#allocation2] sm:$0xff] %v2485_v13 }
 0x79f   :  { %2492 = vst [vmem:[#allocation2 + $0x8] sm:$0xff] %v2486_v25 }
 0x7a1   :  { %v2466_v46 = vpop.f32.mrb[24].mxu1 }
 0x7a2   :  { %v2468_v50 = vpop.f32.mrb[25].mxu1 }
 0x7a3   :  { %v2470_v16 = vpop.f32.mrb[26].mxu1 }
 0x7a4   :  { %v2487_v18 = vpack.c.bf16 %v2470_v16, %v2466_v46  ;;  %v2472_v28 = vpop.f32.mrb[27].mxu1 }
 0x7a5   :  { %v2488_v27 = vpack.c.bf16 %v2472_v28, %v2468_v50 }
 0x7a6   :  { %2493 = vst [vmem:[#allocation2 + $0x10] sm:$0xff] %v2487_v18 }
 0x7a7   :  { %2494 = vst [vmem:[#allocation2 + $0x18] sm:$0xff] %v2488_v27 }
 0x7a9   :  { %v2476_v6 = vpop.f32.mrb[28].mxu1 }
 0x7aa   :  { %v2478_v33 = vpop.f32.mrb[29].mxu1 }
 0x7ab   :  { %v2480_v60 = vpop.f32.mrb[30].mxu1 }
 0x7ac   :  { %v2489_v24 = vpack.c.bf16 %v2480_v60, %v2476_v6  ;;  %v2482_v49 = vpop.f32.mrb[31].mxu1 }
 0x7ad   :  { %v2490_v54 = vpack.c.bf16 %v2482_v49, %v2478_v33 }
 0x7ae   :  { %2495 = vst [vmem:[#allocation2 + $0x20] sm:$0xff] %v2489_v24 }
 0x7af   :  { %2496 = vst [vmem:[#allocation2 + $0x28] sm:$0xff] %v2490_v54 }
 0x7b0   :  { %4558 = dma.done.wait [#allocation7], 12288 }
 0x7b1   :  { %4559 = vsyncadd [#allocation7], 4294955008  ;;  %v5382_v53 = vmov 0   ;;  %v2508_v10 = vld [vmem:[#allocation3 + $0x8] sm:$0xff]  ;;  %v2507_v19 = vld [vmem:[#allocation3] sm:$0xff]  ;;  %vm2761_vm2 = vcmask 130048  }
 0x7b2   :  { %2800 = vmatprep.mubr.bf16.mxu0 %v5382_v53  ;;  %v2510_v29 = vld [vmem:[#allocation3 + $0x18] sm:$0xff]  ;;  %2615 = vmatprep.subr.bf16.mxu1 %v2508_v10  ;;  %v2509_v62 = vld [vmem:[#allocation3 + $0x10] sm:$0xff]  ;;  %v2512_v31 = vld [vmem:[#allocation3 + $0x28] sm:$0xff] }
 0x7b3   :  { %2616 = vmatpush1.bf16.msra.mxu1 %v2507_v19  ;;  %v2511_v40 = vld [vmem:[#allocation3 + $0x20] sm:$0xff]  ;;  %v2514_v56 = vld [vmem:[#allocation3 + $0x38] sm:$0xff]  ;;  %v2502_v22 = vld [vmem:[#allocation2 + $0x8] sm:$0xff] }
 0x7b4   :  { %2617 = vmatprep.subr.bf16.mxu1 %v2510_v29  ;;  %v2513_v51 = vld [vmem:[#allocation3 + $0x30] sm:$0xff]  ;;  %2647 = vmatprep.mubr.bf16.mxu1 %v2502_v22  ;;  %v2516_v9 = vld [vmem:[#allocation3 + $0x48] sm:$0xff]  ;;  %v2515_v37 = vld [vmem:[#allocation3 + $0x40] sm:$0xff] }
 0x7b5   :  { %v2518_v45 = vld [vmem:[#allocation3 + $0x58] sm:$0xff]  ;;  %v2517_v44 = vld [vmem:[#allocation3 + $0x50] sm:$0xff]  ;;  %v2520_v43 = vld [vmem:[#allocation3 + $0x68] sm:$0xff] }
 0x7b6   :  { %v2519_v52 = vld [vmem:[#allocation3 + $0x60] sm:$0xff]  ;;  %v2522_v61 = vld [vmem:[#allocation3 + $0x78] sm:$0xff]  ;;  %v2521_v36 = vld [vmem:[#allocation3 + $0x70] sm:$0xff] }
 0x7b7   :  { %2618 = vmatpush1.bf16.msra.mxu1 %v2509_v62  ;;  %v2524_v12 = vld [vmem:[#allocation3 + $0x88] sm:$0xff]  ;;  %v2523_v59 = vld [vmem:[#allocation3 + $0x80] sm:$0xff]  ;;  %v2526_v42 = vld [vmem:[#allocation3 + $0x98] sm:$0xff] }
 0x7b8   :  { %2619 = vmatprep.subr.bf16.mxu1 %v2512_v31  ;;  %v2525_v47 = vld [vmem:[#allocation3 + $0x90] sm:$0xff]  ;;  %v2528_v17 = vld [vmem:[#allocation3 + $0xa8] sm:$0xff]  ;;  %v2527_v30 = vld [vmem:[#allocation3 + $0xa0] sm:$0xff] }
 0x7b9   :  { %v2530_v15 = vld [vmem:[#allocation3 + $0xb8] sm:$0xff]  ;;  %v2529_v55 = vld [vmem:[#allocation3 + $0xb0] sm:$0xff]  ;;  %v2532_v39 = vld [vmem:[#allocation3 + $0xc8] sm:$0xff] }
 0x7ba   :  { %v2531_v26 = vld [vmem:[#allocation3 + $0xc0] sm:$0xff]  ;;  %v2534_v0 = vld [vmem:[#allocation3 + $0xd8] sm:$0xff]  ;;  %v2533_v1 = vld [vmem:[#allocation3 + $0xd0] sm:$0xff] }
 0x7bb   :  { %2620 = vmatpush1.bf16.msra.mxu1 %v2511_v40  ;;  %v2536_v2 = vld [vmem:[#allocation3 + $0xe8] sm:$0xff]  ;;  %v2535_v3 = vld [vmem:[#allocation3 + $0xe0] sm:$0xff]  ;;  %v2538_v4 = vld [vmem:[#allocation3 + $0xf8] sm:$0xff] }
 0x7bc   :  { %2621 = vmatprep.subr.bf16.mxu1 %v2514_v56  ;;  %v2537_v5 = vld [vmem:[#allocation3 + $0xf0] sm:$0xff]  ;;  %v2540_v7 = vld [vmem:[#allocation3 + $0x108] sm:$0xff]  ;;  %v2501_v63 = vld [vmem:[#allocation2] sm:$0xff] }
 0x7bd   :  { %v2539_v57 = vld [vmem:[#allocation3 + $0x100] sm:$0xff]  ;;  %v2504_v58 = vld [vmem:[#allocation2 + $0x18] sm:$0xff]  ;;  %v2541_v14 = vld [vmem:[#allocation3 + $0x110] sm:$0xff] }
 0x7be   :  { %v2542_v11 = vld [vmem:[#allocation3 + $0x118] sm:$0xff]  ;;  %v2544_v20 = vld [vmem:[#allocation3 + $0x128] sm:$0xff]  ;;  %v2543_v23 = vld [vmem:[#allocation3 + $0x120] sm:$0xff] }
 0x7bf   :  { %2622 = vmatpush1.bf16.msra.mxu1 %v2513_v51  ;;  %v2546_v38 = vld [vmem:[#allocation3 + $0x138] sm:$0xff]  ;;  %v2545_v41 = vld [vmem:[#allocation3 + $0x130] sm:$0xff]  ;;  %v2548_v35 = vld [vmem:[#allocation3 + $0x148] sm:$0xff] }
 0x7c0   :  { %2623 = vmatprep.subr.bf16.mxu1 %v2516_v9  ;;  %v2547_v48 = vld [vmem:[#allocation3 + $0x140] sm:$0xff]  ;;  %v2550_v8 = vld [vmem:[#allocation3 + $0x158] sm:$0xff]  ;;  %v2549_v13 = vld [vmem:[#allocation3 + $0x150] sm:$0xff] }
 0x7c1   :  { %v2552_v21 = vld [vmem:[#allocation3 + $0x168] sm:$0xff]  ;;  %v2551_v25 = vld [vmem:[#allocation3 + $0x160] sm:$0xff]  ;;  %v2554_v46 = vld [vmem:[#allocation3 + $0x178] sm:$0xff] }
 0x7c2   :  { %v2553_v50 = vld [vmem:[#allocation3 + $0x170] sm:$0xff]  ;;  %v2556_v16 = vld [vmem:[#allocation3 + $0x188] sm:$0xff]  ;;  %v2555_v18 = vld [vmem:[#allocation3 + $0x180] sm:$0xff] }
 0x7c3   :  { %2624 = vmatpush1.bf16.msra.mxu1 %v2515_v37  ;;  %v2558_v28 = vld [vmem:[#allocation3 + $0x198] sm:$0xff]  ;;  %v2557_v27 = vld [vmem:[#allocation3 + $0x190] sm:$0xff]  ;;  %v2560_v6 = vld [vmem:[#allocation3 + $0x1a8] sm:$0xff] }
 0x7c4   :  { %2625 = vmatprep.subr.bf16.mxu1 %v2518_v45  ;;  %v2559_v33 = vld [vmem:[#allocation3 + $0x1a0] sm:$0xff]  ;;  %v2562_v60 = vld [vmem:[#allocation3 + $0x1b8] sm:$0xff]  ;;  %v2561_v24 = vld [vmem:[#allocation3 + $0x1b0] sm:$0xff] }
 0x7c5   :  { %v2564_v49 = vld [vmem:[#allocation3 + $0x1c8] sm:$0xff]  ;;  %v2563_v54 = vld [vmem:[#allocation3 + $0x1c0] sm:$0xff]  ;;  %v2566_v10 = vld [vmem:[#allocation3 + $0x1d8] sm:$0xff] }
 0x7c6   :  { %v2565_v19 = vld [vmem:[#allocation3 + $0x1d0] sm:$0xff]  ;;  %v2568_v29 = vld [vmem:[#allocation3 + $0x1e8] sm:$0xff]  ;;  %v2567_v62 = vld [vmem:[#allocation3 + $0x1e0] sm:$0xff] }
 0x7c7   :  { %2626 = vmatpush1.bf16.msra.mxu1 %v2517_v44  ;;  %v2570_v31 = vld [vmem:[#allocation3 + $0x1f8] sm:$0xff]  ;;  %v2569_v40 = vld [vmem:[#allocation3 + $0x1f0] sm:$0xff]  ;;  %v2572_v56 = vld [vmem:[#allocation3 + $0x208] sm:$0xff] }
 0x7c8   :  { %2627 = vmatprep.subr.bf16.mxu1 %v2520_v43  ;;  %v2503_v22 = vld [vmem:[#allocation2 + $0x10] sm:$0xff]  ;;  %v2571_v51 = vld [vmem:[#allocation3 + $0x200] sm:$0xff]  ;;  %v2506_v9 = vld [vmem:[#allocation2 + $0x28] sm:$0xff] }
 0x7c9   :  { %v2574_v37 = vld [vmem:[#allocation3 + $0x218] sm:$0xff]  ;;  %v2573_v45 = vld [vmem:[#allocation3 + $0x210] sm:$0xff]  ;;  %v2576_v44 = vld [vmem:[#allocation3 + $0x228] sm:$0xff] }
 0x7ca   :  { %v2575_v43 = vld [vmem:[#allocation3 + $0x220] sm:$0xff] }
 0x7cb   :  { %2628 = vmatpush1.bf16.msra.mxu1 %v2519_v52  ;;  %v2578_v52 = vld [vmem:[#allocation3 + $0x238] sm:$0xff] }
 0x7cc   :  { %2629 = vmatprep.subr.bf16.mxu1 %v2522_v61  ;;  %v2577_v61 = vld [vmem:[#allocation3 + $0x230] sm:$0xff] }
 0x7cf   :  { %2630 = vmatpush1.bf16.msra.mxu1 %v2521_v36  ;;  %v2580_v36 = vld [vmem:[#allocation3 + $0x248] sm:$0xff] }
 0x7d0   :  { %2631 = vmatprep.subr.bf16.mxu1 %v2524_v12  ;;  %v2579_v12 = vld [vmem:[#allocation3 + $0x240] sm:$0xff] }
 0x7d3   :  { %2632 = vmatpush1.bf16.msra.mxu1 %v2523_v59  ;;  %v2582_v59 = vld [vmem:[#allocation3 + $0x258] sm:$0xff] }
 0x7d4   :  { %2633 = vmatprep.subr.bf16.mxu1 %v2526_v42  ;;  %v2581_v42 = vld [vmem:[#allocation3 + $0x250] sm:$0xff] }
 0x7d7   :  { %2634 = vmatpush1.bf16.msra.mxu1 %v2525_v47  ;;  %v2584_v47 = vld [vmem:[#allocation3 + $0x268] sm:$0xff] }
 0x7d8   :  { %2635 = vmatprep.subr.bf16.mxu1 %v2528_v17  ;;  %v2583_v17 = vld [vmem:[#allocation3 + $0x260] sm:$0xff] }
 0x7db   :  { %2636 = vmatpush1.bf16.msra.mxu1 %v2527_v30  ;;  %v2586_v30 = vld [vmem:[#allocation3 + $0x278] sm:$0xff] }
 0x7dc   :  { %2637 = vmatprep.subr.bf16.mxu1 %v2530_v15  ;;  %v2585_v15 = vld [vmem:[#allocation3 + $0x270] sm:$0xff] }
 0x7df   :  { %2638 = vmatpush1.bf16.msra.mxu1 %v2529_v55  ;;  %v2588_v55 = vld [vmem:[#allocation3 + $0x288] sm:$0xff] }
 0x7e0   :  { %2639 = vmatprep.subr.bf16.mxu1 %v2532_v39  ;;  %v2587_v39 = vld [vmem:[#allocation3 + $0x280] sm:$0xff] }
 0x7e3   :  { %2640 = vmatpush1.bf16.msra.mxu1 %v2531_v26  ;;  %v2590_v26 = vld [vmem:[#allocation3 + $0x298] sm:$0xff] }
 0x7e4   :  { %2641 = vmatprep.subr.bf16.mxu1 %v2534_v0  ;;  %v2589_v0 = vld [vmem:[#allocation3 + $0x290] sm:$0xff] }
 0x7e7   :  { %2642 = vmatpush1.bf16.msra.mxu1 %v2533_v1  ;;  %v2592_v1 = vld [vmem:[#allocation3 + $0x2a8] sm:$0xff] }
 0x7e8   :  { %2643 = vmatprep.subr.bf16.mxu1 %v2536_v2  ;;  %v2591_v2 = vld [vmem:[#allocation3 + $0x2a0] sm:$0xff] }
 0x7eb   :  { %2644 = vmatpush1.bf16.msra.mxu1 %v2535_v3  ;;  %v2594_v3 = vld [vmem:[#allocation3 + $0x2b8] sm:$0xff] }
 0x7ec   :  { %2645 = vmatprep.subr.bf16.mxu1 %v2538_v4  ;;  %v2593_v4 = vld [vmem:[#allocation3 + $0x2b0] sm:$0xff] }
 0x7ef   :  { %2646 = vmatpush1.bf16.msra.mxu1 %v2537_v5  ;;  %v2596_v5 = vld [vmem:[#allocation3 + $0x2c8] sm:$0xff] }
 0x7f0   :  { %2658 = vmatprep.subr.bf16.mxu1 %v2540_v7  ;;  %v2595_v7 = vld [vmem:[#allocation3 + $0x2c0] sm:$0xff] }
 0x7f2   :  { %2648 = vmatmul.mubr.bf16.vlgmr.msra.gmra.mrb[32].mxu1 %v2501_v63  ;;  %v2598_v63 = vld [vmem:[#allocation3 + $0x2d8] sm:$0xff] }
 0x7f3   :  { %2659 = vmatpush1.bf16.msra.mxu1 %v2539_v57  ;;  %2690 = vmatprep.mubr.bf16.mxu1 %v2504_v58  ;;  %v2597_v57 = vld [vmem:[#allocation3 + $0x2d0] sm:$0xff]  ;;  %v2600_v58 = vld [vmem:[#allocation3 + $0x2e8] sm:$0xff] }
 0x7f4   :  { %2660 = vmatprep.subr.bf16.mxu1 %v2542_v11  ;;  %v2599_v11 = vld [vmem:[#allocation3 + $0x2e0] sm:$0xff] }
 0x7f7   :  { %2661 = vmatpush1.bf16.msra.mxu1 %v2541_v14  ;;  %v2602_v14 = vld [vmem:[#allocation3 + $0x2f8] sm:$0xff] }
 0x7f8   :  { %2662 = vmatprep.subr.bf16.mxu1 %v2544_v20  ;;  %v2601_v20 = vld [vmem:[#allocation3 + $0x2f0] sm:$0xff] }
 0x7fb   :  { %2663 = vmatpush1.bf16.msra.mxu1 %v2543_v23  ;;  %v2505_v23 = vld [vmem:[#allocation2 + $0x20] sm:$0xff] }
 0x7fc   :  { %2664 = vmatprep.subr.bf16.mxu1 %v2546_v38  ;;  %v2603_v38 = vld [vmem:[#allocation19] sm:$0x3] }
 0x7ff   :  { %2665 = vmatpush1.bf16.msra.mxu1 %v2545_v41  ;;  %v2608_v41 = vrot.slane %v2603_v38, %v5001_v32 }
 0x800   :  { %2666 = vmatprep.subr.bf16.mxu1 %v2548_v35  ;;  %v2612_v35 = vrot.slane %v2603_v38, %v5004_v34 }
 0x803   :  { %2667 = vmatpush1.bf16.msra.mxu1 %v2547_v48 }
 0x804   :  { %2668 = vmatprep.subr.bf16.mxu1 %v2550_v8 }
 0x807   :  { %2669 = vmatpush1.bf16.msra.mxu1 %v2549_v13 }
 0x808   :  { %2670 = vmatprep.subr.bf16.mxu1 %v2552_v21 }
 0x80b   :  { %2671 = vmatpush1.bf16.msra.mxu1 %v2551_v25 }
 0x80c   :  { %2672 = vmatprep.subr.bf16.mxu1 %v2554_v46 }
 0x80f   :  { %2673 = vmatpush1.bf16.msra.mxu1 %v2553_v50 }
 0x810   :  { %2674 = vmatprep.subr.bf16.mxu1 %v2556_v16 }
 0x813   :  { %2675 = vmatpush1.bf16.msra.mxu1 %v2555_v18 }
 0x814   :  { %2676 = vmatprep.subr.bf16.mxu1 %v2558_v28 }
 0x817   :  { %2677 = vmatpush1.bf16.msra.mxu1 %v2557_v27 }
 0x818   :  { %2678 = vmatprep.subr.bf16.mxu1 %v2560_v6 }
 0x81b   :  { %2679 = vmatpush1.bf16.msra.mxu1 %v2559_v33 }
 0x81c   :  { %2680 = vmatprep.subr.bf16.mxu1 %v2562_v60 }
 0x81f   :  { %2681 = vmatpush1.bf16.msra.mxu1 %v2561_v24  ;;  %v4278_v24 = vld [vmem:[%s5332_s11] sm:$0xff]  }
 0x820   :  { %2682 = vmatprep.subr.bf16.mxu1 %v2564_v49  ;;  %v4279_v49 = vld [vmem:[%s5332_s11 + $0x8] ss:$0 sps:$4 sm:$0xff]  }
 0x823   :  { %2683 = vmatpush1.bf16.msra.mxu1 %v2563_v54 }
 0x824   :  { %2684 = vmatprep.subr.bf16.mxu1 %v2566_v10 }
 0x827   :  { %2685 = vmatpush1.bf16.msra.mxu1 %v2565_v19 }
 0x828   :  { %2686 = vmatprep.subr.bf16.mxu1 %v2568_v29 }
 0x82b   :  { %2687 = vmatpush1.bf16.msra.mxu1 %v2567_v62 }
 0x82c   :  { %2688 = vmatprep.subr.bf16.mxu1 %v2570_v31 }
 0x82f   :  { %2689 = vmatpush1.bf16.msra.mxu1 %v2569_v40 }
 0x830   :  { %2701 = vmatprep.subr.bf16.mxu1 %v2572_v56 }
 0x832   :  { %2691 = vmatmul.mubr.bf16.vlgmr.msra.gmra.mrb[32].mxu1 %v2503_v22 }
 0x833   :  { %2702 = vmatpush1.bf16.msra.mxu1 %v2571_v51  ;;  %2733 = vmatprep.mubr.bf16.mxu1 %v2506_v9 }
 0x834   :  { %2703 = vmatprep.subr.bf16.mxu1 %v2574_v37 }
 0x837   :  { %2704 = vmatpush1.bf16.msra.mxu1 %v2573_v45 }
 0x838   :  { %2705 = vmatprep.subr.bf16.mxu1 %v2576_v44 }
 0x83b   :  { %2706 = vmatpush1.bf16.msra.mxu1 %v2575_v43 }
 0x83c   :  { %2707 = vmatprep.subr.bf16.mxu1 %v2578_v52 }
 0x83f   :  { %2708 = vmatpush1.bf16.msra.mxu1 %v2577_v61 }
 0x840   :  { %2709 = vmatprep.subr.bf16.mxu1 %v2580_v36 }
 0x843   :  { %2710 = vmatpush1.bf16.msra.mxu1 %v2579_v12 }
 0x844   :  { %2711 = vmatprep.subr.bf16.mxu1 %v2582_v59 }
 0x847   :  { %2712 = vmatpush1.bf16.msra.mxu1 %v2581_v42 }
 0x848   :  { %2713 = vmatprep.subr.bf16.mxu1 %v2584_v47 }
 0x84b   :  { %2714 = vmatpush1.bf16.msra.mxu1 %v2583_v17 }
 0x84c   :  { %2715 = vmatprep.subr.bf16.mxu1 %v2586_v30 }
 0x84f   :  { %2716 = vmatpush1.bf16.msra.mxu1 %v2585_v15 }
 0x850   :  { %2717 = vmatprep.subr.bf16.mxu1 %v2588_v55 }
 0x853   :  { %2718 = vmatpush1.bf16.msra.mxu1 %v2587_v39 }
 0x854   :  { %2719 = vmatprep.subr.bf16.mxu1 %v2590_v26 }
 0x857   :  { %2720 = vmatpush1.bf16.msra.mxu1 %v2589_v0 }
 0x858   :  { %2721 = vmatprep.subr.bf16.mxu1 %v2592_v1 }
 0x85b   :  { %2722 = vmatpush1.bf16.msra.mxu1 %v2591_v2 }
 0x85c   :  { %2723 = vmatprep.subr.bf16.mxu1 %v2594_v3 }
 0x85f   :  { %2724 = vmatpush1.bf16.msra.mxu1 %v2593_v4 }
 0x860   :  { %2725 = vmatprep.subr.bf16.mxu1 %v2596_v5 }
 0x863   :  { %2726 = vmatpush1.bf16.msra.mxu1 %v2595_v7 }
 0x864   :  { %2727 = vmatprep.subr.bf16.mxu1 %v2598_v63 }
 0x867   :  { %2728 = vmatpush1.bf16.msra.mxu1 %v2597_v57 }
 0x868   :  { %2729 = vmatprep.subr.bf16.mxu1 %v2600_v58 }
 0x86b   :  { %2730 = vmatpush1.bf16.msra.mxu1 %v2599_v11 }
 0x86c   :  { %2731 = vmatprep.subr.bf16.mxu1 %v2602_v14 }
 0x86f   :  { %2732 = vmatpush1.bf16.msra.mxu1 %v2601_v20 }
 0x872   :  { %2734 = vmatmul.mubr.bf16.vlgmr.msra.gmra.mrb[32].mxu1 %v2505_v23 }
 0x945   :  { %v2735_v48 = vpop.f32.mrb[32].mxu1 }
 0x946   :  { %v3953_v8 = vadd.f32 %v2735_v48, %v2608_v41  ;;  %v2737_v13 = vpop.f32.mrb[33].mxu1 }
 0x947   :  { %v3954_v21 = vadd.f32 %v2737_v13, %v2612_v35  ;;  %v2739_v25 = vpop.f32.mrb[34].mxu1 }
 0x948   :  { %v3955_v46 = vadd.f32 %v2739_v25, %v2608_v41  ;;  %v2741_v50 = vpop.f32.mrb[35].mxu1  ;;  %v2744_v18 = vmax.f32 %v3953_v8, 0.0 }
 0x949   :  { %v3956_v16 = vadd.f32 %v2741_v50, %v2612_v35  ;;  %v2745_v27 = vmax.f32 %v3954_v21, 0.0 }
 0x94a   :  { %v2746_v28 = vmax.f32 %v3955_v46, 0.0 }
 0x94b   :  { %v2747_v6 = vmax.f32 %v3956_v16, 0.0 }
 0x94c   :  { %v2748_v33 = vpack.c.bf16 %v2746_v28, %v2744_v18 }
 0x94d   :  { %v2749_v60 = vpack.c.bf16 %v2747_v6, %v2745_v27 }
 0x94f   :  { %2768 = vmatprep.subr.bf16.mxu0 %v2749_v60 }
 0x950   :  { %2769 = vmatpush1.bf16.msra.mxu0 %v2748_v33 }
 0x953   :  { %3641 = vmatmul.mubr.msk.bf16.vlgmr.msra.gmra.mrb[56].mxu0 %vm2761_vm2, %v4278_v24 }
 0x954   :  { %2810 = vmatprep.mubr.bf16.mxu0 %v5382_v53 }
 0x95b   :  { %3642 = vmatmul.mubr.msk.bf16.gmra.mrb[60].mxu0 %vm2761_vm2, %v4279_v49 }
 0xa26   :  { %v2802_v54 = vpop.f32.mrb[56].mxu0 }
 0xa27   :  { %v2804_v10 = vpop.f32.mrb[57].mxu0 }
 0xa28   :  { %v2806_v19 = vpop.f32.mrb[58].mxu0 }
 0xa29   :  { %v2819_v29 = vpack.c.bf16 %v2806_v19, %v2802_v54  ;;  %v2808_v62 = vpop.f32.mrb[59].mxu0 }
 0xa2a   :  { %v2820_v31 = vpack.c.bf16 %v2808_v62, %v2804_v10 }
 0xa2b   :  { %2823 = vst [vmem:[#allocation2] sm:$0xf] %v2819_v29  ;;  %v2827_v40 = vrot.slane %v2819_v29, 4 }
 0xa2c   :  { %2824 = vst [vmem:[#allocation2 + $0x8] sm:$0xf] %v2820_v31  ;;  %v2828_v56 = vrot.slane %v2820_v31, 4 }
 0xa2d   :  { %2831 = vst [vmem:[#allocation2 + $0x10] sm:$0xf] %v2827_v40 }
 0xa2e   :  { %2832 = vst [vmem:[#allocation2 + $0x18] sm:$0xf] %v2828_v56  ;;  %v2812_v22 = vpop.f32.mrb[60].mxu0 }
 0xa2f   :  { %v2821_v51 = vpack.c.bf16 %v2812_v22, %v2812_v22  ;;  %v2814_v9 = vpop.f32.mrb[61].mxu0 }
 0xa30   :  { %v2822_v37 = vpack.c.bf16 %v2814_v9, %v2814_v9  ;;  %v2816_v45 = vpop.f32.mrb[62].mxu0 }
 0xa31   :  { %2833 = vst [vmem:[#allocation2 + $0x20] sm:$0xf] %v2821_v51  ;;  %v2817_v44 = vpop.f32.mrb[63].mxu0 }
 0xa32   :  { %2834 = vst [vmem:[#allocation2 + $0x28] sm:$0xf] %v2822_v37 }
 0xa33   :  { %4560 = dma.done.wait [#allocation7 + $0x1], 12288 }
 0xa34   :  { %4561 = vsyncadd [#allocation7 + $0x1], 4294955008  ;;  %v2844_v43 = vld [vmem:[#allocation4 + $0x8] sm:$0xff]  ;;  %v2843_v52 = vld [vmem:[#allocation4] sm:$0xff]  ;;  %vm3096_vm3 = vcmask 1043456   ;;  %s5383_s16 = sld [smem:[#allocation61_spill]] }
 0xa35   :  { %v2846_v61 = vld [vmem:[#allocation4 + $0x18] sm:$0xff]  ;;  %2951 = vmatprep.subr.bf16.mxu0 %v2844_v43  ;;  %v2845_v36 = vld [vmem:[#allocation4 + $0x10] sm:$0xff]  ;;  %v2848_v12 = vld [vmem:[#allocation4 + $0x28] sm:$0xff]  ;;  %vm3089_vm4 = vcmask 64512  }
 0xa36   :  { %2952 = vmatpush1.bf16.msra.mxu0 %v2843_v52  ;;  %v2847_v59 = vld [vmem:[#allocation4 + $0x20] sm:$0xff]  ;;  %v2850_v42 = vld [vmem:[#allocation4 + $0x38] sm:$0xff]  ;;  %v2838_v47 = vld [vmem:[#allocation2 + $0x8] sm:$0xf] }
 0xa37   :  { %2953 = vmatprep.subr.bf16.mxu0 %v2846_v61  ;;  %v2849_v17 = vld [vmem:[#allocation4 + $0x30] sm:$0xff]  ;;  %2983 = vmatprep.mubr.bf16.mxu0 %v2838_v47  ;;  %v2852_v30 = vld [vmem:[#allocation4 + $0x48] sm:$0xff]  ;;  %v2851_v15 = vld [vmem:[#allocation4 + $0x40] sm:$0xff] }
 0xa38   :  { %v2854_v55 = vld [vmem:[#allocation4 + $0x58] sm:$0xff]  ;;  %v2853_v39 = vld [vmem:[#allocation4 + $0x50] sm:$0xff]  ;;  %v2856_v26 = vld [vmem:[#allocation4 + $0x68] sm:$0xff] }
 0xa39   :  { %v2855_v0 = vld [vmem:[#allocation4 + $0x60] sm:$0xff]  ;;  %v2858_v1 = vld [vmem:[#allocation4 + $0x78] sm:$0xff]  ;;  %v2857_v2 = vld [vmem:[#allocation4 + $0x70] sm:$0xff] }
 0xa3a   :  { %2954 = vmatpush1.bf16.msra.mxu0 %v2845_v36  ;;  %v2860_v3 = vld [vmem:[#allocation4 + $0x88] sm:$0xff]  ;;  %v2859_v4 = vld [vmem:[#allocation4 + $0x80] sm:$0xff]  ;;  %v2862_v5 = vld [vmem:[#allocation4 + $0x98] sm:$0xff] }
 0xa3b   :  { %2955 = vmatprep.subr.bf16.mxu0 %v2848_v12  ;;  %v2861_v7 = vld [vmem:[#allocation4 + $0x90] sm:$0xff]  ;;  %v2864_v63 = vld [vmem:[#allocation4 + $0xa8] sm:$0xff]  ;;  %v2863_v57 = vld [vmem:[#allocation4 + $0xa0] sm:$0xff] }
 0xa3c   :  { %v2866_v58 = vld [vmem:[#allocation4 + $0xb8] sm:$0xff]  ;;  %v2865_v11 = vld [vmem:[#allocation4 + $0xb0] sm:$0xff]  ;;  %v2868_v14 = vld [vmem:[#allocation4 + $0xc8] sm:$0xff] }
 0xa3d   :  { %v2867_v20 = vld [vmem:[#allocation4 + $0xc0] sm:$0xff]  ;;  %v2870_v23 = vld [vmem:[#allocation4 + $0xd8] sm:$0xff]  ;;  %v2869_v38 = vld [vmem:[#allocation4 + $0xd0] sm:$0xff] }
 0xa3e   :  { %2956 = vmatpush1.bf16.msra.mxu0 %v2847_v59  ;;  %v2872_v41 = vld [vmem:[#allocation4 + $0xe8] sm:$0xff]  ;;  %v2871_v35 = vld [vmem:[#allocation4 + $0xe0] sm:$0xff]  ;;  %v2874_v48 = vld [vmem:[#allocation4 + $0xf8] sm:$0xff] }
 0xa3f   :  { %2957 = vmatprep.subr.bf16.mxu0 %v2850_v42  ;;  %v2873_v8 = vld [vmem:[#allocation4 + $0xf0] sm:$0xff]  ;;  %v2876_v13 = vld [vmem:[#allocation4 + $0x108] sm:$0xff]  ;;  %v2837_v21 = vld [vmem:[#allocation2] sm:$0xf] }
 0xa40   :  { %v2875_v25 = vld [vmem:[#allocation4 + $0x100] sm:$0xff]  ;;  %v2840_v46 = vld [vmem:[#allocation2 + $0x18] sm:$0xf]  ;;  %v2877_v16 = vld [vmem:[#allocation4 + $0x110] sm:$0xff] }
 0xa41   :  { %v2878_v50 = vld [vmem:[#allocation4 + $0x118] sm:$0xff]  ;;  %v2880_v18 = vld [vmem:[#allocation4 + $0x128] sm:$0xff]  ;;  %v2879_v28 = vld [vmem:[#allocation4 + $0x120] sm:$0xff] }
 0xa42   :  { %2958 = vmatpush1.bf16.msra.mxu0 %v2849_v17  ;;  %v2882_v27 = vld [vmem:[#allocation4 + $0x138] sm:$0xff]  ;;  %v2881_v6 = vld [vmem:[#allocation4 + $0x130] sm:$0xff]  ;;  %v2884_v33 = vld [vmem:[#allocation4 + $0x148] sm:$0xff] }
 0xa43   :  { %2959 = vmatprep.subr.bf16.mxu0 %v2852_v30  ;;  %v2883_v60 = vld [vmem:[#allocation4 + $0x140] sm:$0xff]  ;;  %v2886_v24 = vld [vmem:[#allocation4 + $0x158] sm:$0xff]  ;;  %v2885_v49 = vld [vmem:[#allocation4 + $0x150] sm:$0xff] }
 0xa44   :  { %v2888_v54 = vld [vmem:[#allocation4 + $0x168] sm:$0xff]  ;;  %v2887_v10 = vld [vmem:[#allocation4 + $0x160] sm:$0xff]  ;;  %v2890_v19 = vld [vmem:[#allocation4 + $0x178] sm:$0xff] }
 0xa45   :  { %v2889_v29 = vld [vmem:[#allocation4 + $0x170] sm:$0xff]  ;;  %v2892_v62 = vld [vmem:[#allocation4 + $0x188] sm:$0xff]  ;;  %v2891_v31 = vld [vmem:[#allocation4 + $0x180] sm:$0xff] }
 0xa46   :  { %2960 = vmatpush1.bf16.msra.mxu0 %v2851_v15  ;;  %v2894_v40 = vld [vmem:[#allocation4 + $0x198] sm:$0xff]  ;;  %v2893_v56 = vld [vmem:[#allocation4 + $0x190] sm:$0xff]  ;;  %v2896_v22 = vld [vmem:[#allocation4 + $0x1a8] sm:$0xff] }
 0xa47   :  { %2961 = vmatprep.subr.bf16.mxu0 %v2854_v55  ;;  %v2895_v51 = vld [vmem:[#allocation4 + $0x1a0] sm:$0xff]  ;;  %v2898_v9 = vld [vmem:[#allocation4 + $0x1b8] sm:$0xff]  ;;  %v2897_v37 = vld [vmem:[#allocation4 + $0x1b0] sm:$0xff] }
 0xa48   :  { %v2900_v45 = vld [vmem:[#allocation4 + $0x1c8] sm:$0xff]  ;;  %v2899_v44 = vld [vmem:[#allocation4 + $0x1c0] sm:$0xff]  ;;  %v2902_v43 = vld [vmem:[#allocation4 + $0x1d8] sm:$0xff] }
 0xa49   :  { %v2901_v52 = vld [vmem:[#allocation4 + $0x1d0] sm:$0xff]  ;;  %v2904_v61 = vld [vmem:[#allocation4 + $0x1e8] sm:$0xff]  ;;  %v2903_v36 = vld [vmem:[#allocation4 + $0x1e0] sm:$0xff] }
 0xa4a   :  { %2962 = vmatpush1.bf16.msra.mxu0 %v2853_v39  ;;  %v2906_v12 = vld [vmem:[#allocation4 + $0x1f8] sm:$0xff]  ;;  %v2905_v59 = vld [vmem:[#allocation4 + $0x1f0] sm:$0xff]  ;;  %v2908_v42 = vld [vmem:[#allocation4 + $0x208] sm:$0xff] }
 0xa4b   :  { %2963 = vmatprep.subr.bf16.mxu0 %v2856_v26  ;;  %v2839_v47 = vld [vmem:[#allocation2 + $0x10] sm:$0xf]  ;;  %v2907_v17 = vld [vmem:[#allocation4 + $0x200] sm:$0xff]  ;;  %v2842_v30 = vld [vmem:[#allocation2 + $0x28] sm:$0xf] }
 0xa4c   :  { %v2910_v15 = vld [vmem:[#allocation4 + $0x218] sm:$0xff]  ;;  %v2909_v55 = vld [vmem:[#allocation4 + $0x210] sm:$0xff]  ;;  %v2912_v39 = vld [vmem:[#allocation4 + $0x228] sm:$0xff] }
 0xa4d   :  { %v2911_v26 = vld [vmem:[#allocation4 + $0x220] sm:$0xff] }
 0xa4e   :  { %2964 = vmatpush1.bf16.msra.mxu0 %v2855_v0  ;;  %v2914_v0 = vld [vmem:[#allocation4 + $0x238] sm:$0xff] }
 0xa4f   :  { %2965 = vmatprep.subr.bf16.mxu0 %v2858_v1  ;;  %v2913_v1 = vld [vmem:[#allocation4 + $0x230] sm:$0xff] }
 0xa52   :  { %2966 = vmatpush1.bf16.msra.mxu0 %v2857_v2  ;;  %v2916_v2 = vld [vmem:[#allocation4 + $0x248] sm:$0xff] }
 0xa53   :  { %2967 = vmatprep.subr.bf16.mxu0 %v2860_v3  ;;  %v2915_v3 = vld [vmem:[#allocation4 + $0x240] sm:$0xff] }
 0xa56   :  { %2968 = vmatpush1.bf16.msra.mxu0 %v2859_v4  ;;  %v2918_v4 = vld [vmem:[#allocation4 + $0x258] sm:$0xff] }
 0xa57   :  { %2969 = vmatprep.subr.bf16.mxu0 %v2862_v5  ;;  %v2917_v5 = vld [vmem:[#allocation4 + $0x250] sm:$0xff] }
 0xa5a   :  { %2970 = vmatpush1.bf16.msra.mxu0 %v2861_v7  ;;  %v2920_v7 = vld [vmem:[#allocation4 + $0x268] sm:$0xff] }
 0xa5b   :  { %2971 = vmatprep.subr.bf16.mxu0 %v2864_v63  ;;  %v2919_v63 = vld [vmem:[#allocation4 + $0x260] sm:$0xff] }
 0xa5e   :  { %2972 = vmatpush1.bf16.msra.mxu0 %v2863_v57  ;;  %v2922_v57 = vld [vmem:[#allocation4 + $0x278] sm:$0xff] }
 0xa5f   :  { %2973 = vmatprep.subr.bf16.mxu0 %v2866_v58  ;;  %v2921_v58 = vld [vmem:[#allocation4 + $0x270] sm:$0xff] }
 0xa62   :  { %2974 = vmatpush1.bf16.msra.mxu0 %v2865_v11  ;;  %v2924_v11 = vld [vmem:[#allocation4 + $0x288] sm:$0xff] }
 0xa63   :  { %2975 = vmatprep.subr.bf16.mxu0 %v2868_v14  ;;  %v2923_v14 = vld [vmem:[#allocation4 + $0x280] sm:$0xff] }
 0xa66   :  { %2976 = vmatpush1.bf16.msra.mxu0 %v2867_v20  ;;  %v2926_v20 = vld [vmem:[#allocation4 + $0x298] sm:$0xff] }
 0xa67   :  { %2977 = vmatprep.subr.bf16.mxu0 %v2870_v23  ;;  %v2925_v23 = vld [vmem:[#allocation4 + $0x290] sm:$0xff] }
 0xa6a   :  { %2978 = vmatpush1.bf16.msra.mxu0 %v2869_v38  ;;  %v2928_v38 = vld [vmem:[#allocation4 + $0x2a8] sm:$0xff] }
 0xa6b   :  { %2979 = vmatprep.subr.bf16.mxu0 %v2872_v41  ;;  %v2927_v41 = vld [vmem:[#allocation4 + $0x2a0] sm:$0xff] }
 0xa6e   :  { %2980 = vmatpush1.bf16.msra.mxu0 %v2871_v35  ;;  %v2930_v35 = vld [vmem:[#allocation4 + $0x2b8] sm:$0xff] }
 0xa6f   :  { %2981 = vmatprep.subr.bf16.mxu0 %v2874_v48  ;;  %v2929_v48 = vld [vmem:[#allocation4 + $0x2b0] sm:$0xff] }
 0xa72   :  { %2982 = vmatpush1.bf16.msra.mxu0 %v2873_v8  ;;  %v2932_v8 = vld [vmem:[#allocation4 + $0x2c8] sm:$0xff] }
 0xa73   :  { %2992 = vmatprep.subr.bf16.mxu0 %v2876_v13  ;;  %v2931_v13 = vld [vmem:[#allocation4 + $0x2c0] sm:$0xff] }
 0xa75   :  { %2984 = vmatmul.mubr.bf16.vlgmr.msra.gmra.mrb[64].mxu0 %v2837_v21  ;;  %v2934_v21 = vld [vmem:[#allocation4 + $0x2d8] sm:$0xff] }
 0xa76   :  { %2993 = vmatpush1.bf16.msra.mxu0 %v2875_v25  ;;  %3024 = vmatprep.mubr.bf16.mxu0 %v2840_v46  ;;  %v2933_v25 = vld [vmem:[#allocation4 + $0x2d0] sm:$0xff]  ;;  %v2936_v46 = vld [vmem:[#allocation4 + $0x2e8] sm:$0xff] }
 0xa77   :  { %2994 = vmatprep.subr.bf16.mxu0 %v2878_v50  ;;  %v2935_v50 = vld [vmem:[#allocation4 + $0x2e0] sm:$0xff] }
 0xa7a   :  { %2995 = vmatpush1.bf16.msra.mxu0 %v2877_v16  ;;  %v2938_v16 = vld [vmem:[#allocation4 + $0x2f8] sm:$0xff] }
 0xa7b   :  { %2996 = vmatprep.subr.bf16.mxu0 %v2880_v18  ;;  %v2937_v18 = vld [vmem:[#allocation4 + $0x2f0] sm:$0xff] }
 0xa7e   :  { %2997 = vmatpush1.bf16.msra.mxu0 %v2879_v28  ;;  %v2841_v28 = vld [vmem:[#allocation2 + $0x20] sm:$0xf] }
 0xa7f   :  { %2998 = vmatprep.subr.bf16.mxu0 %v2882_v27  ;;  %v2939_v27 = vld [vmem:[#allocation21] sm:$0x3] }
 0xa82   :  { %2999 = vmatpush1.bf16.msra.mxu0 %v2881_v6  ;;  %v2944_v6 = vrot.slane %v2939_v27, %v5001_v32  ;;  %v4281_v32 = vld [vmem:[%s5383_s16 + $0x8] ss:$0 sps:$4 sm:$0xff]  }
 0xa83   :  { %3000 = vmatprep.subr.bf16.mxu0 %v2884_v33  ;;  %v2948_v33 = vrot.slane %v2939_v27, %v5004_v34 }
 0xa86   :  { %3001 = vmatpush1.bf16.msra.mxu0 %v2883_v60 }
 0xa87   :  { %3002 = vmatprep.subr.bf16.mxu0 %v2886_v24 }
 0xa8a   :  { %3003 = vmatpush1.bf16.msra.mxu0 %v2885_v49 }
 0xa8b   :  { %3004 = vmatprep.subr.bf16.mxu0 %v2888_v54 }
 0xa8e   :  { %3005 = vmatpush1.bf16.msra.mxu0 %v2887_v10 }
 0xa8f   :  { %3006 = vmatprep.subr.bf16.mxu0 %v2890_v19 }
 0xa92   :  { %3007 = vmatpush1.bf16.msra.mxu0 %v2889_v29 }
 0xa93   :  { %3008 = vmatprep.subr.bf16.mxu0 %v2892_v62 }
 0xa96   :  { %3009 = vmatpush1.bf16.msra.mxu0 %v2891_v31 }
 0xa97   :  { %3010 = vmatprep.subr.bf16.mxu0 %v2894_v40 }
 0xa9a   :  { %3011 = vmatpush1.bf16.msra.mxu0 %v2893_v56 }
 0xa9b   :  { %3012 = vmatprep.subr.bf16.mxu0 %v2896_v22  ;;  %v4280_v22 = vld [vmem:[%s5383_s16] sm:$0xff]  }
 0xa9e   :  { %3013 = vmatpush1.bf16.msra.mxu0 %v2895_v51 }
 0xa9f   :  { %3014 = vmatprep.subr.bf16.mxu0 %v2898_v9 }
 0xaa2   :  { %3015 = vmatpush1.bf16.msra.mxu0 %v2897_v37 }
 0xaa3   :  { %3016 = vmatprep.subr.bf16.mxu0 %v2900_v45 }
 0xaa6   :  { %3017 = vmatpush1.bf16.msra.mxu0 %v2899_v44 }
 0xaa7   :  { %3018 = vmatprep.subr.bf16.mxu0 %v2902_v43 }
 0xaaa   :  { %3019 = vmatpush1.bf16.msra.mxu0 %v2901_v52 }
 0xaab   :  { %3020 = vmatprep.subr.bf16.mxu0 %v2904_v61 }
 0xaae   :  { %3021 = vmatpush1.bf16.msra.mxu0 %v2903_v36 }
 0xaaf   :  { %3022 = vmatprep.subr.bf16.mxu0 %v2906_v12 }
 0xab2   :  { %3023 = vmatpush1.bf16.msra.mxu0 %v2905_v59 }
 0xab3   :  { %3033 = vmatprep.subr.bf16.mxu0 %v2908_v42 }
 0xab5   :  { %3025 = vmatmul.mubr.bf16.vlgmr.msra.gmra.mrb[64].mxu0 %v2839_v47 }
 0xab6   :  { %3034 = vmatpush1.bf16.msra.mxu0 %v2907_v17  ;;  %3065 = vmatprep.mubr.bf16.mxu0 %v2842_v30 }
 0xab7   :  { %3035 = vmatprep.subr.bf16.mxu0 %v2910_v15 }
 0xaba   :  { %3036 = vmatpush1.bf16.msra.mxu0 %v2909_v55 }
 0xabb   :  { %3037 = vmatprep.subr.bf16.mxu0 %v2912_v39 }
 0xabe   :  { %3038 = vmatpush1.bf16.msra.mxu0 %v2911_v26 }
 0xabf   :  { %3039 = vmatprep.subr.bf16.mxu0 %v2914_v0 }
 0xac2   :  { %3040 = vmatpush1.bf16.msra.mxu0 %v2913_v1 }
 0xac3   :  { %3041 = vmatprep.subr.bf16.mxu0 %v2916_v2 }
 0xac6   :  { %3042 = vmatpush1.bf16.msra.mxu0 %v2915_v3 }
 0xac7   :  { %3043 = vmatprep.subr.bf16.mxu0 %v2918_v4 }
 0xaca   :  { %3044 = vmatpush1.bf16.msra.mxu0 %v2917_v5 }
 0xacb   :  { %3045 = vmatprep.subr.bf16.mxu0 %v2920_v7 }
 0xace   :  { %3046 = vmatpush1.bf16.msra.mxu0 %v2919_v63 }
 0xacf   :  { %3047 = vmatprep.subr.bf16.mxu0 %v2922_v57 }
 0xad2   :  { %3048 = vmatpush1.bf16.msra.mxu0 %v2921_v58 }
 0xad3   :  { %3049 = vmatprep.subr.bf16.mxu0 %v2924_v11 }
 0xad6   :  { %3050 = vmatpush1.bf16.msra.mxu0 %v2923_v14 }
 0xad7   :  { %3051 = vmatprep.subr.bf16.mxu0 %v2926_v20 }
 0xada   :  { %3052 = vmatpush1.bf16.msra.mxu0 %v2925_v23 }
 0xadb   :  { %3053 = vmatprep.subr.bf16.mxu0 %v2928_v38 }
 0xade   :  { %3054 = vmatpush1.bf16.msra.mxu0 %v2927_v41 }
 0xadf   :  { %3055 = vmatprep.subr.bf16.mxu0 %v2930_v35 }
 0xae2   :  { %3056 = vmatpush1.bf16.msra.mxu0 %v2929_v48 }
 0xae3   :  { %3057 = vmatprep.subr.bf16.mxu0 %v2932_v8 }
 0xae6   :  { %3058 = vmatpush1.bf16.msra.mxu0 %v2931_v13 }
 0xae7   :  { %3059 = vmatprep.subr.bf16.mxu0 %v2934_v21 }
 0xaea   :  { %3060 = vmatpush1.bf16.msra.mxu0 %v2933_v25 }
 0xaeb   :  { %3061 = vmatprep.subr.bf16.mxu0 %v2936_v46 }
 0xaee   :  { %3062 = vmatpush1.bf16.msra.mxu0 %v2935_v50 }
 0xaef   :  { %3063 = vmatprep.subr.bf16.mxu0 %v2938_v16 }
 0xaf2   :  { %3064 = vmatpush1.bf16.msra.mxu0 %v2937_v18 }
 0xaf5   :  { %3066 = vmatmul.mubr.bf16.vlgmr.msra.gmra.mrb[64].mxu0 %v2841_v28 }
 0xaf6   :  { %3135 = vmatprep.mubr.bf16.mxu0 %v5382_v53 }
 0xbc8   :  { %v3067_v60 = vpop.f32.mrb[64].mxu0 }
 0xbc9   :  { %v3957_v24 = vadd.f32 %v3067_v60, %v2944_v6  ;;  %v3069_v49 = vpop.f32.mrb[65].mxu0 }
 0xbca   :  { %v3958_v54 = vadd.f32 %v3069_v49, %v2948_v33  ;;  %v3071_v10 = vpop.f32.mrb[66].mxu0 }
 0xbcb   :  { %v3074_v19 = vmax.f32 %v3957_v24, 0.0  ;;  %v3072_v29 = vpop.f32.mrb[67].mxu0 }
 0xbcc   :  { %v3075_v62 = vmax.f32 %v3958_v54, 0.0 }
 0xbcd   :  { %v3076_v31 = vpack.c.bf16 %v3074_v19, %v3074_v19 }
 0xbce   :  { %v3077_v40 = vpack.c.bf16 %v3075_v62, %v3075_v62 }
 0xbcf   :  { %v3098_v56 = vsel %vm3096_vm3, %v3076_v31, 0 }
 0xbd0   :  { %3645 = vmatprep.subr.msk.bf16.mxu0 %vm3096_vm3, %v3077_v40 }
 0xbd1   :  { %3104 = vmatpush1.bf16.msra.mxu0 %v3098_v56 }
 0xbd4   :  { %3646 = vmatmul.mubr.msk.bf16.vlgmr.msra.gmra.mrb[68].mxu0 %vm3089_vm4, %v4280_v22 }
 0xbd5   :  { %3145 = vmatprep.mubr.bf16.mxu0 %v5382_v53 }
 0xbdc   :  { %3647 = vmatmul.mubr.msk.bf16.gmra.mrb[72].mxu0 %vm3089_vm4, %v4281_v32 }
 0xca7   :  { %v3137_v34 = vpop.f32.mrb[68].mxu0 }
 0xca8   :  { %v3139_v51 = vpop.f32.mrb[69].mxu0 }
 0xca9   :  { %v3141_v9 = vpop.f32.mrb[70].mxu0 }
 0xcaa   :  { %v3154_v37 = vpack.c.bf16 %v3141_v9, %v3137_v34  ;;  %v3143_v45 = vpop.f32.mrb[71].mxu0 }
 0xcab   :  { %v3155_v44 = vpack.c.bf16 %v3143_v45, %v3139_v51 }
 0xcac   :  { %3158 = vst [vmem:[#allocation2] sm:$0xf] %v3154_v37  ;;  %v3162_v43 = vrot.slane %v3154_v37, 4 }
 0xcad   :  { %3159 = vst [vmem:[#allocation2 + $0x8] sm:$0xf] %v3155_v44  ;;  %v3163_v52 = vrot.slane %v3155_v44, 4 }
 0xcae   :  { %3166 = vst [vmem:[#allocation2 + $0x10] sm:$0xf] %v3162_v43 }
 0xcaf   :  { %3167 = vst [vmem:[#allocation2 + $0x18] sm:$0xf] %v3163_v52  ;;  %v3147_v61 = vpop.f32.mrb[72].mxu0 }
 0xcb0   :  { %v3156_v36 = vpack.c.bf16 %v3147_v61, %v3147_v61  ;;  %v3149_v53 = vpop.f32.mrb[73].mxu0 }
 0xcb1   :  { %v3157_v12 = vpack.c.bf16 %v3149_v53, %v3149_v53  ;;  %v3151_v59 = vpop.f32.mrb[74].mxu0 }
 0xcb2   :  { %3168 = vst [vmem:[#allocation2 + $0x20] sm:$0xf] %v3156_v36  ;;  %v3152_v42 = vpop.f32.mrb[75].mxu0 }
 0xcb3   :  { %3169 = vst [vmem:[#allocation2 + $0x28] sm:$0xf] %v3157_v12 }
 0xcb4   :  { %4562 = dma.done.wait [#allocation7 + $0x2], 6144 }
 0xcb5   :  { %4563 = vsyncadd [#allocation7 + $0x2], 4294961152  ;;  %v3187_v47 = vld [vmem:[#allocation5 + $0x40] sm:$0xff]  ;;  %v3188_v30 = vld [vmem:[#allocation5 + $0x48] sm:$0xff] }
 0xcb6   :  { %v3179_v17 = vld [vmem:[#allocation5] sm:$0xff]  ;;  %3674 = vmatprep.subr.bf16.mxu1 %v3187_v47  ;;  %v3180_v15 = vld [vmem:[#allocation5 + $0x8] sm:$0xff]  ;;  %v3189_v55 = vld [vmem:[#allocation5 + $0x50] sm:$0xff] }
 0xcb7   :  { %3675 = vmatpush3.bf16.msra.mxu1 %v3179_v17  ;;  %v3174_v39 = vld [vmem:[#allocation2 + $0x8] sm:$0xf]  ;;  %v3219_v26 = vld [vmem:[#allocation5 + $0x140] sm:$0xff]  ;;  %v3181_v1 = vld [vmem:[#allocation5 + $0x10] sm:$0xff] }
 0xcb8   :  { %3676 = vmatprep.subr.bf16.mxu1 %v3188_v30  ;;  %3266 = vmatprep.mubr.bf16.mxu1 %v3174_v39  ;;  %v3211_v0 = vld [vmem:[#allocation5 + $0x100] sm:$0xff]  ;;  %v3220_v2 = vld [vmem:[#allocation5 + $0x148] sm:$0xff]  ;;  %v3190_v3 = vld [vmem:[#allocation5 + $0x58] sm:$0xff] }
 0xcb9   :  { %3718 = vmatprep.subr.bf16.mxu0 %v3219_v26  ;;  %v3212_v4 = vld [vmem:[#allocation5 + $0x108] sm:$0xff]  ;;  %v3221_v5 = vld [vmem:[#allocation5 + $0x150] sm:$0xff]  ;;  %v3182_v7 = vld [vmem:[#allocation5 + $0x18] sm:$0xff] }
 0xcba   :  { %3719 = vmatpush3.bf16.msra.mxu0 %v3211_v0  ;;  %v3191_v63 = vld [vmem:[#allocation5 + $0x60] sm:$0xff]  ;;  %v3213_v57 = vld [vmem:[#allocation5 + $0x110] sm:$0xff]  ;;  %v3222_v58 = vld [vmem:[#allocation5 + $0x158] sm:$0xff] }
 0xcbb   :  { %3677 = vmatpush3.bf16.msra.mxu1 %v3180_v15  ;;  %3720 = vmatprep.subr.bf16.mxu0 %v3220_v2  ;;  %v3183_v11 = vld [vmem:[#allocation5 + $0x20] sm:$0xff]  ;;  %v3192_v14 = vld [vmem:[#allocation5 + $0x68] sm:$0xff]  ;;  %v3214_v23 = vld [vmem:[#allocation5 + $0x118] sm:$0xff] }
 0xcbc   :  { %3678 = vmatprep.subr.bf16.mxu1 %v3189_v55  ;;  %v3178_v20 = vld [vmem:[#allocation2 + $0x28] sm:$0xf]  ;;  %v3223_v38 = vld [vmem:[#allocation5 + $0x160] sm:$0xff]  ;;  %v3193_v35 = vld [vmem:[#allocation5 + $0x70] sm:$0xff] }
 0xcbd   :  { %3346 = vmatprep.mubr.bf16.mxu0 %v3178_v20  ;;  %v3184_v41 = vld [vmem:[#allocation5 + $0x28] sm:$0xff]  ;;  %v3215_v48 = vld [vmem:[#allocation5 + $0x120] sm:$0xff]  ;;  %v3185_v13 = vld [vmem:[#allocation5 + $0x30] sm:$0xff] }
 0xcbe   :  { %3721 = vmatpush3.bf16.msra.mxu0 %v3212_v4  ;;  %v3224_v8 = vld [vmem:[#allocation5 + $0x168] sm:$0xff]  ;;  %v3194_v21 = vld [vmem:[#allocation5 + $0x78] sm:$0xff]  ;;  %v3225_v46 = vld [vmem:[#allocation5 + $0x170] sm:$0xff] }
 0xcbf   :  { %3679 = vmatpush3.bf16.msra.mxu1 %v3181_v1  ;;  %3722 = vmatprep.subr.bf16.mxu0 %v3221_v5  ;;  %v3216_v25 = vld [vmem:[#allocation5 + $0x128] sm:$0xff]  ;;  %v3186_v50 = vld [vmem:[#allocation5 + $0x38] sm:$0xff]  ;;  %v3203_v16 = vld [vmem:[#allocation5 + $0xc0] sm:$0xff] }
 0xcc0   :  { %3680 = vmatprep.subr.bf16.mxu1 %v3190_v3  ;;  %v3217_v18 = vld [vmem:[#allocation5 + $0x130] sm:$0xff]  ;;  %v3173_v28 = vld [vmem:[#allocation2] sm:$0xf]  ;;  %v3226_v27 = vld [vmem:[#allocation5 + $0x178] sm:$0xff] }
 0xcc1   :  { %v3195_v6 = vld [vmem:[#allocation5 + $0x80] sm:$0xff]  ;;  %v3176_v33 = vld [vmem:[#allocation2 + $0x18] sm:$0xf]  ;;  %v3204_v60 = vld [vmem:[#allocation5 + $0xc8] sm:$0xff] }
 0xcc2   :  { %3723 = vmatpush3.bf16.msra.mxu0 %v3213_v57  ;;  %v3218_v24 = vld [vmem:[#allocation5 + $0x138] sm:$0xff]  ;;  %v3196_v49 = vld [vmem:[#allocation5 + $0x88] sm:$0xff]  ;;  %v3205_v54 = vld [vmem:[#allocation5 + $0xd0] sm:$0xff] }
 0xcc3   :  { %3681 = vmatpush3.bf16.msra.mxu1 %v3182_v7  ;;  %3724 = vmatprep.subr.bf16.mxu0 %v3222_v58  ;;  %v3177_v10 = vld [vmem:[#allocation2 + $0x20] sm:$0xf]  ;;  %v3197_v19 = vld [vmem:[#allocation5 + $0x90] sm:$0xff]  ;;  %v3206_v29 = vld [vmem:[#allocation5 + $0xd8] sm:$0xff] }
 0xcc4   :  { %3682 = vmatprep.subr.bf16.mxu1 %v3191_v63  ;;  %v3198_v62 = vld [vmem:[#allocation5 + $0x98] sm:$0xff]  ;;  %v3207_v31 = vld [vmem:[#allocation5 + $0xe0] sm:$0xff]  ;;  %v3208_v56 = vld [vmem:[#allocation5 + $0xe8] sm:$0xff] }
 0xcc5   :  { %v3199_v40 = vld [vmem:[#allocation5 + $0xa0] sm:$0xff]  ;;  %v3200_v22 = vld [vmem:[#allocation5 + $0xa8] sm:$0xff]  ;;  %v3209_v32 = vld [vmem:[#allocation5 + $0xf0] sm:$0xff] }
 0xcc6   :  { %3725 = vmatpush3.bf16.msra.mxu0 %v3214_v23  ;;  %v3201_v34 = vld [vmem:[#allocation5 + $0xb0] sm:$0xff]  ;;  %v3210_v51 = vld [vmem:[#allocation5 + $0xf8] sm:$0xff]  ;;  %v3648_v47 = vld [vmem:[#allocation22] ss:$0 sm:$0xff] }
 0xcc7   :  { %3683 = vmatpush3.bf16.msra.mxu1 %v3183_v11  ;;  %3726 = vmatprep.subr.bf16.mxu0 %v3223_v38  ;;  %v3202_v9 = vld [vmem:[#allocation5 + $0xb8] sm:$0xff]  ;;  %v3175_v37 = vld [vmem:[#allocation2 + $0x10] sm:$0xf] }
 0xcc8   :  { %3684 = vmatprep.subr.bf16.mxu1 %v3192_v14 }
 0xcca   :  { %3727 = vmatpush3.bf16.msra.mxu0 %v3215_v48 }
 0xccb   :  { %3685 = vmatpush3.bf16.msra.mxu1 %v3184_v41  ;;  %3728 = vmatprep.subr.bf16.mxu0 %v3224_v8 }
 0xccc   :  { %3686 = vmatprep.subr.bf16.mxu1 %v3193_v35 }
 0xcce   :  { %3729 = vmatpush3.bf16.msra.mxu0 %v3216_v25 }
 0xccf   :  { %3687 = vmatpush3.bf16.msra.mxu1 %v3185_v13  ;;  %3730 = vmatprep.subr.bf16.mxu0 %v3225_v46 }
 0xcd0   :  { %3688 = vmatprep.subr.bf16.mxu1 %v3194_v21 }
 0xcd2   :  { %3731 = vmatpush3.bf16.msra.mxu0 %v3217_v18 }
 0xcd3   :  { %3689 = vmatpush3.bf16.msra.mxu1 %v3186_v50  ;;  %3732 = vmatprep.subr.bf16.mxu0 %v3226_v27 }
 0xcd4   :  { %3696 = vmatprep.subr.bf16.mxu1 %v3203_v16 }
 0xcd6   :  { %3267 = vmatmul.mubr.bf16.vlgmr.msra.gmra.mrb[36].mxu1 %v3173_v28  ;;  %3733 = vmatpush3.bf16.msra.mxu0 %v3218_v24 }
 0xcd7   :  { %3697 = vmatpush3.bf16.msra.mxu1 %v3195_v6  ;;  %3306 = vmatprep.mubr.bf16.mxu1 %v3176_v33 }
 0xcd8   :  { %3698 = vmatprep.subr.bf16.mxu1 %v3204_v60 }
 0xcd9   :  { %3347 = vmatmul.mubr.bf16.vlgmr.msra.gmra.mrb[76].mxu0 %v3177_v10 }
 0xcdb   :  { %3699 = vmatpush3.bf16.msra.mxu1 %v3196_v49 }
 0xcdc   :  { %3700 = vmatprep.subr.bf16.mxu1 %v3205_v54 }
 0xcdf   :  { %3701 = vmatpush3.bf16.msra.mxu1 %v3197_v19 }
 0xce0   :  { %3702 = vmatprep.subr.bf16.mxu1 %v3206_v29 }
 0xce3   :  { %3703 = vmatpush3.bf16.msra.mxu1 %v3198_v62 }
 0xce4   :  { %3704 = vmatprep.subr.bf16.mxu1 %v3207_v31 }
 0xce7   :  { %3705 = vmatpush3.bf16.msra.mxu1 %v3199_v40 }
 0xce8   :  { %3706 = vmatprep.subr.bf16.mxu1 %v3208_v56 }
 0xceb   :  { %3707 = vmatpush3.bf16.msra.mxu1 %v3200_v22 }
 0xcec   :  { %3708 = vmatprep.subr.bf16.mxu1 %v3209_v32 }
 0xcef   :  { %3709 = vmatpush3.bf16.msra.mxu1 %v3201_v34 }
 0xcf0   :  { %3710 = vmatprep.subr.bf16.mxu1 %v3210_v51 }
 0xcf3   :  { %3711 = vmatpush3.bf16.msra.mxu1 %v3202_v9 }
 0xcf6   :  { %3307 = vmatmul.mubr.bf16.vlgmr.msra.gmra.mrb[40].mxu1 %v3175_v37 }
 0xda9   :  { %v3690_v45 = vpop.f32.mrb[36].mxu1 }
 0xdaa   :  { %v3691_v44 = vpop.f32.mrb[37].mxu1 }
 0xdab   :  { %v3692_v43 = vadd.f32 %v3691_v44, %v3690_v45  ;;  %v3693_v52 = vpop.f32.mrb[38].mxu1 }
 0xdac   :  { %v3694_v61 = vpop.f32.mrb[39].mxu1  ;;  %v3734_v36 = vpop.f32.mrb[76].mxu0 }
 0xdad   :  { %v3735_v53 = vpop.f32.mrb[77].mxu0  ;;  %v3269_v15 = vadd.f32 %v3692_v43, %v3648_v47 }
 0xdae   :  { %v3736_v12 = vadd.f32 %v3735_v53, %v3734_v36  ;;  %v3737_v59 = vpop.f32.mrb[78].mxu0 }
 0xdaf   :  { %v3738_v42 = vpop.f32.mrb[79].mxu0 }
 0xdc9   :  { %v3712_v17 = vpop.f32.mrb[40].mxu1 }
 0xdca   :  { %v3713_v30 = vpop.f32.mrb[41].mxu1 }
 0xdcb   :  { %v3714_v55 = vadd.f32 %v3713_v30, %v3712_v17  ;;  %v3715_v39 = vpop.f32.mrb[42].mxu1 }
 0xdcc   :  { %v3716_v26 = vpop.f32.mrb[43].mxu1 }
 0xdcd   :  { %v3309_v0 = vadd.f32 %v3714_v55, %v3269_v15 }
 0xdcf   :  { %v3349_v1 = vadd.f32 %v3736_v12, %v3309_v0 }
 0xdd1   :  { %v3354_v2 = vmax.f32 %v3349_v1, 0.0 }
 0xdd3   :  { %v3355_v3 = vpack.c.bf16 %v3354_v2, %v3354_v2 }
 0xdd4   :  { %4564 = dma.done.wait [#allocation7 + $0x3], 1024 }
 0xdd5   :  { %4565 = vsyncadd [#allocation7 + $0x3], 4294966272  ;;  %v4593_v4 = vmov 0.0   ;;  %vm4594_vm5 = vmmov 0   ;;  %v5384_v5 = vld [vmem:[#allocation44_spill] sm:$0xff]  ;;  %v5385_v7 = vld [vmem:[#allocation45_spill] sm:$0xff] }
 0xdd6   :  { %3789 = vmatprep.subr.bf16.mxu1 %v4593_v4  ;;  %3805 = vmatprep.mubr.msk.bf16.mxu1 %vm4594_vm5, %v4593_v4  ;;  %v5386_v63 = vld [vmem:[#allocation46_spill] sm:$0xff]  ;;  %v5387_v57 = vld [vmem:[#allocation47_spill] sm:$0xff]  ;;  %v5388_v58 = vld [vmem:[#allocation48_spill] sm:$0xff]  ;;  %s5392_s12 = sld [smem:[#allocation62_spill]] }
 0xdd7   :  { %3790 = vmatpush3.bf16.msra.mxu1 %v5384_v5  ;;  %v5389_v11 = vld [vmem:[#allocation49_spill] sm:$0xff]  ;;  %v5390_v14 = vld [vmem:[#allocation50_spill] sm:$0xff]  ;;  %v5391_v20 = vld [vmem:[#allocation51_spill] sm:$0xff] }
 0xdd8   :  { %3791 = vmatprep.subr.bf16.mxu1 %v4593_v4  ;;  %v3649_v23 = vld [vmem:[#allocation24] ss:$0 sm:$0xff] }
 0xddb   :  { %3792 = vmatpush3.bf16.msra.mxu1 %v5385_v7 }
 0xddc   :  { %3793 = vmatprep.subr.bf16.mxu1 %v4593_v4 }
 0xddf   :  { %3794 = vmatpush3.bf16.msra.mxu1 %v5386_v63 }
 0xde0   :  { %3795 = vmatprep.subr.bf16.mxu1 %v4593_v4 }
 0xde3   :  { %3796 = vmatpush3.bf16.msra.mxu1 %v5387_v57 }
 0xde4   :  { %3797 = vmatprep.subr.bf16.mxu1 %v4593_v4 }
 0xde7   :  { %3798 = vmatpush3.bf16.msra.mxu1 %v5388_v58 }
 0xde8   :  { %3799 = vmatprep.subr.bf16.mxu1 %v4593_v4 }
 0xdeb   :  { %3800 = vmatpush3.bf16.msra.mxu1 %v5389_v11 }
 0xdec   :  { %3801 = vmatprep.subr.bf16.mxu1 %v4593_v4 }
 0xdef   :  { %3802 = vmatpush3.bf16.msra.mxu1 %v5390_v14 }
 0xdf0   :  { %3803 = vmatprep.subr.bf16.mxu1 %v4593_v4 }
 0xdf3   :  { %3804 = vmatpush3.bf16.msra.mxu1 %v5391_v20 }
 0xdf6   :  { %3806 = vmatmul.mubr.bf16.vlgmr.msra.gmra.mrb[44].mxu1 %v3355_v3 }
 0xec9   :  { %v3409_v38 = vpop.f32.mrb[44].mxu1 }
 0xeca   :  { %v3410_v41 = vadd.f32 %v3649_v23, %v3409_v38  ;;  %v3807_v35 = vpop.f32.mrb[45].mxu1 }
 0xecb   :  { %v3412_v48 = vpop.f32.mrb[46].mxu1 }
 0xecc   :  { %3415 = vst [vmem:[%s5392_s12] sm:$0xff] %v3410_v41  ;;  %v3808_v8 = vpop.f32.mrb[47].mxu1 }
 0xecd   :  { %3420 = vsyncpa [#allocation9], 1 }
 0xece   :  { %3421 = vsyncpa [#allocation11], 1 }
 0xecf   :  { %3422 = vsyncpa [#allocation14], 1 }
 0xed0   :  { %3423 = vsyncpa [#allocation17], 1 }
 0xed1   :  { %3424 = vsyncpa [#allocation20], 1 }
 0xed2   :  { %3425 = vsyncpa [#allocation23], 1 }
 0xed3   :  { %3426 = vsyncmov [#allocation7] }
 0xed6   :  { %s3427_s24 = vpop.sfrf %3426 }
 0xed7   :  { %p3650_p12 = scmp.ne.s32.totalorder %s3427_s24, 0 }
 0xed9   :  { %3431 = shalt.err (%p3650_p12)  }
 0xeda   :  { %3433 = vsyncmov [#allocation7 + $0x1] }
 0xedd   :  { %s3434_s7 = vpop.sfrf %3433 }
 0xede   :  { %p3651_p13 = scmp.ne.s32.totalorder %s3434_s7, 0 }
 0xee0   :  { %3438 = shalt.err (%p3651_p13)  }
 0xee1   :  { %3440 = vsyncmov [#allocation7 + $0x2] }
 0xee4   :  { %s3441_s25 = vpop.sfrf %3440 }
 0xee5   :  { %p3652_p0 = scmp.ne.s32.totalorder %s3441_s25, 0 }
 0xee7   :  { %3445 = shalt.err (%p3652_p0)  }
 0xee8   :  { %3447 = vsyncmov [#allocation7 + $0x3] }
 0xeeb   :  { %s3448_s29 = vpop.sfrf %3447 }
 0xeec   :  { %p3653_p1 = scmp.ne.s32.totalorder %s3448_s29, 0 }
 0xeee   :  { %3452 = shalt.err (%p3653_p1)  }

</bundles_post_ra>
